<compile_context>
chip_gen: v7x
topology: tpu7x:2x2x1
jax: 0.10.0
libtpu: 0.0.40
codegen_flags: <defaults>
</compile_context>

<pallas_src>
import numpy as np
import jax
import jax.numpy as jnp
from jax.experimental import pallas as pl
from jax.experimental.pallas import tpu as pltpu


# ----------------------------- Pallas kernels ------------------------------

def _make_conv_kernel(D, H, W, cins, cout, fuse_bn_relu):
    """3x3x3 conv (padding=1) via one lane-dense im2col MXU matmul per sample.

    Inputs are channels-first flattened (1, Cin_j, DHW) tiles; several inputs
    are treated as a channel concat (fused cat).  Optionally fuses the
    previous layer's BatchNorm+ReLU onto the input tile and always emits this
    layer's per-sample channel sum / sum-of-squares for BatchNorm.
    """
    DHW = D * H * W
    HW = H * W
    nin = len(cins)
    cin_total = sum(cins)
    if fuse_bn_relu:
        assert nin == 1

    # Flat-index offset of each of the 27 taps (kd, kh, kw).
    offs = [(kd - 1) * HW + (kh - 1) * W + (kw - 1)
            for kd in range(3) for kh in range(3) for kw in range(3)]
    # Lane-aligned halo so the staging store sits at a 128-aligned offset.
    pad = HW + W + 1                      # max |tap offset|
    halo = ((pad + 127) // 128) * 128
    chan_off = list(np.cumsum([0] + list(cins[:-1])))

    def kernel(*refs):
        x_refs = refs[:nin]
        i = nin
        if fuse_bn_relu:
            sc_ref, sh_ref = refs[i], refs[i + 1]
            i += 2
        mask_ref, w_ref, b_ref = refs[i], refs[i + 1], refs[i + 2]
        out_ref, sum_ref, ssq_ref = refs[i + 3], refs[i + 4], refs[i + 5]
        xpad_ref, slab_ref = refs[i + 6], refs[i + 7]

        # Zero only the halo columns (interior is fully overwritten below).
        xpad_ref[:, :halo] = jnp.zeros((cin_total, halo), jnp.bfloat16)
        xpad_ref[:, halo + DHW:] = jnp.zeros((cin_total, halo), jnp.bfloat16)

        # Stage inputs channels-first (fused channel concat), casting to bf16
        # exactly once; optionally apply the previous layer's BN+ReLU in fp32.
        for j in range(nin):
            x = x_refs[j][0].astype(jnp.float32)          # (Cin_j, DHW)
            if fuse_bn_relu:
                x = jnp.maximum(x * sc_ref[...] + sh_ref[...], 0.0)
            xpad_ref[chan_off[j]:chan_off[j] + cins[j], halo:halo + DHW] = (
                x.astype(jnp.bfloat16))

        # Build the (27*Cin, DHW) lane-dense im2col slab: per tap, one
        # full-lane-row store of all Cin channels; 3-D boundary positions are
        # zeroed by the precomputed 0/1 mask row (halo columns are zero too).
        for tap, off in enumerate(offs):
            win = xpad_ref[:, halo + off:halo + off + DHW]     # (Cin, DHW)
            slab_ref[tap * cin_total:(tap + 1) * cin_total, :] = (
                win * mask_ref[tap:tap + 1, :])

        # Single MXU matmul: (Cout, 27*Cin) @ (27*Cin, DHW), fp32 accumulation,
        # N-dim = DHW (lane-dense), no output transpose needed.
        y = jnp.dot(w_ref[...], slab_ref[...],
                    preferred_element_type=jnp.float32) + b_ref[...]

        # Per-sample BatchNorm partial statistics (fp32).
        sum_ref[...] = jnp.sum(y, axis=1, keepdims=True)[None]
        ssq_ref[...] = jnp.sum(y * y, axis=1, keepdims=True)[None]

        # Channels-first, lane-dense store (bf16 for the conv1 intermediate).
        out_ref[...] = y.astype(out_ref.dtype)[None]

    return kernel


def _bn_relu_kernel(y_ref, sc_ref, sh_ref, o_ref):
    # y_ref/o_ref: (1, C, DHW) lane-dense blocks; sc_ref/sh_ref: (C, 1).
    y = y_ref[0]
    o_ref[...] = jnp.maximum(y * sc_ref[...] + sh_ref[...], 0.0)[None]


# ----------------------------- kernel wrappers ------------------------------

def _tap_masks(D, H, W):
    """(27, D*H*W) bf16 0/1 masks: tap valid inside the (D,H,W) volume."""
    HW = H * W
    p = np.arange(D * H * W)
    dd, hh, ww = p // HW, (p // W) % H, p % W
    rows = []
    for kd in range(3):
        for kh in range(3):
            for kw in range(3):
                od, oh, ow = kd - 1, kh - 1, kw - 1
                rows.append(((dd + od >= 0) & (dd + od < D) &
                             (hh + oh >= 0) & (hh + oh < H) &
                             (ww + ow >= 0) & (ww + ow < W)))
    return jnp.asarray(np.stack(rows), dtype=jnp.bfloat16)


def conv3d_im2col(xs, wmat, bias, masks, *, spatial, scale=None, shift=None,
                  out_dtype=jnp.float32):
    """3x3x3 conv (padding=1) on channels-first (N, Cin_j, DHW) activations.

    `xs` is a list of inputs that are concatenated along channels inside the
    kernel (fused torch.cat).  Returns (y, sum, sumsq) with y (N, Cout, DHW).
    If scale/shift are given, relu(x*scale + shift) (the previous layer's
    BN+ReLU) is applied to the input inside the kernel.
    """
    if not isinstance(xs, (list, tuple)):
        xs = [xs]
    N, _, DHW = xs[0].shape
    D, H, W = spatial
    assert DHW == D * H * W
    cins = tuple(x.shape[1] for x in xs)
    cin_total = sum(cins)
    cout = wmat.shape[0]
    fused = scale is not None

    kernel = _make_conv_kernel(D, H, W, cins, cout, fused)

    in_specs = [pl.BlockSpec((1, c, DHW), lambda n: (n, 0, 0)) for c in cins]
    args = list(xs)
    if fused:
        in_specs += [pl.BlockSpec((cin_total, 1), lambda n: (0, 0)),
                     pl.BlockSpec((cin_total, 1), lambda n: (0, 0))]
        args += [scale, shift]
    in_specs += [pl.BlockSpec((27, DHW), lambda n: (0, 0)),
                 pl.BlockSpec((cout, 27 * cin_total), lambda n: (0, 0)),
                 pl.BlockSpec((cout, 1), lambda n: (0, 0))]
    args += [masks, wmat, bias]

    pad = H * W + W + 1
    halo = ((pad + 127) // 128) * 128

    # TODO(synk): at real U-Net sizes add a D-tiled grid axis (1-voxel halo),
    # size tiles against the per-generation VMEM budget (64 MiB on v7x) and
    # raise vmem_limit_bytes; at these toy sizes one sample per step is fine.
    return pl.pallas_call(
        kernel,
        grid=(N,),
        in_specs=in_specs,
        out_specs=(
            pl.BlockSpec((1, cout, DHW), lambda n: (n, 0, 0)),
            pl.BlockSpec((1, cout, 1), lambda n: (n, 0, 0)),
            pl.BlockSpec((1, cout, 1), lambda n: (n, 0, 0)),
        ),
        out_shape=(
            jax.ShapeDtypeStruct((N, cout, DHW), out_dtype),
            jax.ShapeDtypeStruct((N, cout, 1), jnp.float32),
            jax.ShapeDtypeStruct((N, cout, 1), jnp.float32),
        ),
        scratch_shapes=[
            pltpu.VMEM((cin_total, DHW + 2 * halo), jnp.bfloat16),  # staging
            pltpu.VMEM((27 * cin_total, DHW), jnp.bfloat16),        # im2col slab
        ],
        compiler_params=pltpu.CompilerParams(dimension_semantics=("parallel",)),
    )(*args)


def bn_relu_cf(y_flat, scale, shift):
    """BatchNorm affine + ReLU, in place, on channels-first (N, C, DHW)."""
    N, C, DHW = y_flat.shape
    return pl.pallas_call(
        _bn_relu_kernel,
        grid=(N,),
        in_specs=[
            pl.BlockSpec((1, C, DHW), lambda n: (n, 0, 0)),
            pl.BlockSpec((C, 1), lambda n: (0, 0)),
            pl.BlockSpec((C, 1), lambda n: (0, 0)),
        ],
        out_specs=pl.BlockSpec((1, C, DHW), lambda n: (n, 0, 0)),
        out_shape=jax.ShapeDtypeStruct((N, C, DHW), jnp.float32),
        input_output_aliases={0: 0},   # in-place epilogue (memory-bound)
        compiler_params=pltpu.CompilerParams(dimension_semantics=("parallel",)),
    )(y_flat, scale, shift)


def _bn_scale_shift(s, ss, gamma, beta, count, eps=1e-5):
    # Training-mode BatchNorm: batch mean / biased variance over (N, D, H, W),
    # fp32, E[x^2]-E[x]^2 clamped at 0 against catastrophic cancellation.
    mean = jnp.sum(s, axis=(0, 2)) / count
    var = jnp.maximum(jnp.sum(ss, axis=(0, 2)) / count - mean * mean, 0.0)
    scale = gamma / jnp.sqrt(var + eps)
    shift = beta - mean * scale
    return scale.reshape(-1, 1), shift.reshape(-1, 1)


def double_conv_cf(xs, spatial, params):
    """(Conv3d 3x3x3 pad=1 => BatchNorm3d(train stats) => ReLU) * 2, on
    channels-first flattened (N, C, D*H*W) activations (xs = concat inputs)."""
    N, _, DHW = xs[0].shape
    count = N * DHW
    masks = _tap_masks(*spatial)
    # conv1: fused channel concat of xs; intermediate stored in bf16.
    y1, s1, ss1 = conv3d_im2col(xs, params["w1"], params["b1"], masks,
                                spatial=spatial, out_dtype=jnp.bfloat16)
    sc1, sh1 = _bn_scale_shift(s1, ss1, params["g1"], params["be1"], count)
    # conv2: BN1 + ReLU applied *inside* the kernel (fused input path).
    y2, s2, ss2 = conv3d_im2col([y1], params["w2"], params["b2"], masks,
                                spatial=spatial, scale=sc1, shift=sh1,
                                out_dtype=jnp.float32)
    sc2, sh2 = _bn_scale_shift(s2, ss2, params["g2"], params["be2"], count)
    return bn_relu_cf(y2, sc2, sh2)


# ---------------------- upsample / pad glue (outside Pallas) ----------------
# TODO(synk): trilinear upsample + F.pad stay as gather-free JAX glue; they
# could be folded into conv1's staging (spatial offsets in the VMEM scratch).

def _interp_matrix(size_in):
    """(size_in, 2*size_in) linear-interp matrix, align_corners=True, scale 2."""
    size_out = 2 * size_in
    if size_in == 1:
        return jnp.ones((1, size_out), jnp.float32)
    pos = (jnp.arange(size_out, dtype=jnp.float32)
           * (size_in - 1) / (size_out - 1))
    lo = jnp.floor(pos)
    frac = pos - lo
    hi = jnp.minimum(lo + 1.0, float(size_in - 1))
    src = jnp.arange(size_in, dtype=jnp.float32)[:, None]
    return ((src == lo[None, :]).astype(jnp.float32) * (1.0 - frac)[None, :]
            + (src == hi[None, :]).astype(jnp.float32) * frac[None, :])


def upsample2x_align_corners(x):
    # nn.Upsample(scale_factor=2, mode='trilinear', align_corners=True),
    # as three tiny gather-free interpolation-matrix contractions.
    _, _, D, H, W = x.shape
    x = jnp.einsum('ncdhw,dp->ncphw', x, _interp_matrix(D))
    x = jnp.einsum('ncdhw,hp->ncdpw', x, _interp_matrix(H))
    x = jnp.einsum('ncdhw,wp->ncdhp', x, _interp_matrix(W))
    return x


def up_forward(x1, x2, params):
    """Up.forward(x1, x2) with bilinear=True, groupnorm=False.  Inputs NCDHW."""
    x1u = upsample2x_align_corners(x1)
    diffY = x2.shape[2] - x1u.shape[2]          # measured on D (as in the module)
    diffX = x2.shape[3] - x1u.shape[3]          # measured on H (as in the module)
    # F.pad(x1, [diffX//2, 0, diffY//2, 0]): pad W-left diffX//2, H-left diffY//2.
    x1p = jnp.pad(x1u, ((0, 0), (0, 0), (0, 0),
                        (diffY // 2, 0), (diffX // 2, 0)))
    assert x1p.shape[2:] == x2.shape[2:]        # torch.cat requires matching spatial
    N, C2, D, H, W = x2.shape
    # Channel concat is fused into conv1's input staging: pass both tensors.
    xs = [x2.reshape(N, C2, D * H * W),
          x1p.reshape(N, x1p.shape[1], D * H * W)]
    y = double_conv_cf(xs, (D, H, W), params)
    return y.reshape(N, -1, D, H, W)            # already channels-first


# ----------------------------- parameter setup ------------------------------

def init_up_params(key, in_channels, out_channels):
    mid = in_channels // 2
    ks = jax.random.split(key, 8)

    def conv_w(k, cin, cout):
        # PyTorch Conv3d weight (cout, cin, 3, 3, 3)
        #   -> (cout, 27*cin) with K-order (kd, kh, kw, cin), bf16 (MXU LHS).
        w = jax.random.normal(k, (cout, cin, 3, 3, 3), jnp.float32) * 0.05
        w = jnp.transpose(w, (0, 2, 3, 4, 1)).reshape(cout, 27 * cin)
        return w.astype(jnp.bfloat16)

    return {
        "w1": conv_w(ks[0], in_channels, mid),
        "b1": jax.random.normal(ks[1], (mid, 1), jnp.float32) * 0.05,
        "g1": 1.0 + 0.1 * jax.random.normal(ks[2], (mid,), jnp.float32),
        "be1": 0.1 * jax.random.normal(ks[3], (mid,), jnp.float32),
        "w2": conv_w(ks[4], mid, out_channels),
        "b2": jax.random.normal(ks[5], (out_channels, 1), jnp.float32) * 0.05,
        "g2": 1.0 + 0.1 * jax.random.normal(ks[6], (out_channels,), jnp.float32),
        "be2": 0.1 * jax.random.normal(ks[7], (out_channels,), jnp.float32),
    }


# --------------------------------- driver -----------------------------------

if __name__ == "__main__":
    key = jax.random.PRNGKey(0)
    k1, k2, kp = jax.random.split(key, 3)

    N, C_half = 2, 4
    in_channels = 2 * C_half        # channels after concat = Up's in_channels
    out_channels = 4

    # x1: deep/low-res feature, x2: skip connection (2x spatial of x1), NCDHW
    x1 = jax.random.normal(k1, (N, C_half, 4, 4, 4), jnp.float32)
    x2 = jax.random.normal(k2, (N, C_half, 8, 8, 8), jnp.float32)

    params = init_up_params(kp, in_channels, out_channels)

    fwd = jax.jit(up_forward)
    out = jax.block_until_ready(fwd(x1, x2, params))
    assert out.shape == (N, out_channels, 8, 8, 8), out.shape
    assert bool(jnp.all(jnp.isfinite(out)))
    print("KERNEL_OK")
</pallas_src>

<mosaic_0001>
module attributes {stable_mosaic.version = 11 : i64} {
  func.func @kernel(%arg0: i32, %arg1: memref<1x4x512xf32, #tpu.memory_space<vmem>>, %arg2: memref<1x4x512xf32, #tpu.memory_space<vmem>>, %arg3: memref<27x512xbf16, #tpu.memory_space<vmem>>, %arg4: memref<4x216xbf16, #tpu.memory_space<vmem>>, %arg5: memref<4x1xf32, #tpu.memory_space<vmem>>, %arg6: memref<1x4x512xbf16, #tpu.memory_space<vmem>>, %arg7: memref<1x4x1xf32, #tpu.memory_space<vmem>>, %arg8: memref<1x4x1xf32, #tpu.memory_space<vmem>>, %arg9: memref<8x768xbf16, #tpu.memory_space<vmem>>, %arg10: memref<216x512xbf16, #tpu.memory_space<vmem>>) attributes {dimension_semantics = [#tpu.dimension_semantics<parallel>], iteration_bounds = array<i64: 2>, scalar_prefetch = 0 : i64, scratch_operands = 2 : i64, tpu.core_type = #tpu.core_type<tc>, window_params = [{transform_indices = @transform_0, window_bounds = array<i64: 1, 4, 512>}, {transform_indices = @transform_1, window_bounds = array<i64: 1, 4, 512>}, {pipeline_mode = #tpu.pipeline_mode<synchronous>, transform_indices = @transform_2, window_bounds = array<i64: 27, 512>}, {pipeline_mode = #tpu.pipeline_mode<synchronous>, transform_indices = @transform_3, window_bounds = array<i64: 4, 216>}, {pipeline_mode = #tpu.pipeline_mode<synchronous>, transform_indices = @transform_4, window_bounds = array<i64: 4, 1>}, {transform_indices = @transform_5, window_bounds = array<i64: 1, 4, 512>}, {transform_indices = @transform_6, window_bounds = array<i64: 1, 4, 1>}, {transform_indices = @transform_7, window_bounds = array<i64: 1, 4, 1>}]} {
    %cst = arith.constant 0.000000e+00 : bf16
    %0 = vector.broadcast %cst : bf16 to vector<8x128xbf16>
    %c0 = arith.constant 0 : index
    %c0_0 = arith.constant 0 : index
    %1 = vector.load %arg9[%c0, %c0_0] : memref<8x768xbf16, #tpu.memory_space<vmem>>, vector<8x128xbf16>
    tpu.vector_store %arg9[%c0, %c0_0], %0 {strides = array<i32>} : memref<8x768xbf16, #tpu.memory_space<vmem>>, vector<8x128xbf16>,
    %cst_1 = arith.constant 0.000000e+00 : bf16
    %2 = vector.broadcast %cst_1 : bf16 to vector<8x128xbf16>
    %c0_2 = arith.constant 0 : index
    %c640 = arith.constant 640 : index
    %3 = vector.load %arg9[%c0_2, %c640] : memref<8x768xbf16, #tpu.memory_space<vmem>>, vector<8x128xbf16>
    tpu.vector_store %arg9[%c0_2, %c640], %2 {strides = array<i32>} : memref<8x768xbf16, #tpu.memory_space<vmem>>, vector<8x128xbf16>,
    %c0_3 = arith.constant 0 : index
    %c0_4 = arith.constant 0 : index
    %c0_5 = arith.constant 0 : index
    %4 = vector.load %arg1[%c0_3, %c0_4, %c0_5] : memref<1x4x512xf32, #tpu.memory_space<vmem>>, vector<1x4x512xf32>
    %5 = vector.shape_cast %4 : vector<1x4x512xf32> to vector<4x512xf32>
    %6 = arith.truncf %5 : vector<4x512xf32> to vector<4x512xbf16>
    %c0_6 = arith.constant 0 : index
    %c128 = arith.constant 128 : index
    %7 = vector.load %arg9[%c0_6, %c128] : memref<8x768xbf16, #tpu.memory_space<vmem>>, vector<4x512xbf16>
    tpu.vector_store %arg9[%c0_6, %c128], %6 {strides = array<i32>} : memref<8x768xbf16, #tpu.memory_space<vmem>>, vector<4x512xbf16>,
    %c0_7 = arith.constant 0 : index
    %c0_8 = arith.constant 0 : index
    %c0_9 = arith.constant 0 : index
    %8 = vector.load %arg2[%c0_7, %c0_8, %c0_9] : memref<1x4x512xf32, #tpu.memory_space<vmem>>, vector<1x4x512xf32>
    %9 = vector.shape_cast %8 : vector<1x4x512xf32> to vector<4x512xf32>
    %10 = arith.truncf %9 : vector<4x512xf32> to vector<4x512xbf16>
    %c4 = arith.constant 4 : index
    %c128_10 = arith.constant 128 : index
    %11 = vector.load %arg9[%c4, %c128_10] : memref<8x768xbf16, #tpu.memory_space<vmem>>, vector<4x512xbf16>
    tpu.vector_store %arg9[%c4, %c128_10], %10 {strides = array<i32>} : memref<8x768xbf16, #tpu.memory_space<vmem>>, vector<4x512xbf16>,
    %c0_11 = arith.constant 0 : index
    %c55 = arith.constant 55 : index
    %12 = vector.load %arg9[%c0_11, %c55] : memref<8x768xbf16, #tpu.memory_space<vmem>>, vector<8x512xbf16>
    %c0_12 = arith.constant 0 : index
    %c0_13 = arith.constant 0 : index
    %13 = vector.load %arg3[%c0_12, %c0_13] : memref<27x512xbf16, #tpu.memory_space<vmem>>, vector<1x512xbf16>
    %14 = vector.broadcast %13 : vector<1x512xbf16> to vector<8x512xbf16>
    %15 = arith.mulf %12, %14 : vector<8x512xbf16>
    %c0_14 = arith.constant 0 : index
    %c0_15 = arith.constant 0 : index
    %16 = vector.load %arg10[%c0_14, %c0_15] : memref<216x512xbf16, #tpu.memory_space<vmem>>, vector<8x512xbf16>
    tpu.vector_store %arg10[%c0_14, %c0_15], %15 {strides = array<i32>} : memref<216x512xbf16, #tpu.memory_space<vmem>>, vector<8x512xbf16>,
    %c0_16 = arith.constant 0 : index
    %c56 = arith.constant 56 : index
    %17 = vector.load %arg9[%c0_16, %c56] : memref<8x768xbf16, #tpu.memory_space<vmem>>, vector<8x512xbf16>
    %c1 = arith.constant 1 : index
    %c0_17 = arith.constant 0 : index
    %18 = vector.load %arg3[%c1, %c0_17] : memref<27x512xbf16, #tpu.memory_space<vmem>>, vector<1x512xbf16>
    %19 = vector.broadcast %18 : vector<1x512xbf16> to vector<8x512xbf16>
    %20 = arith.mulf %17, %19 : vector<8x512xbf16>
    %c8 = arith.constant 8 : index
    %c0_18 = arith.constant 0 : index
    %21 = vector.load %arg10[%c8, %c0_18] : memref<216x512xbf16, #tpu.memory_space<vmem>>, vector<8x512xbf16>
    tpu.vector_store %arg10[%c8, %c0_18], %20 {strides = array<i32>} : memref<216x512xbf16, #tpu.memory_space<vmem>>, vector<8x512xbf16>,
    %c0_19 = arith.constant 0 : index
    %c57 = arith.constant 57 : index
    %22 = vector.load %arg9[%c0_19, %c57] : memref<8x768xbf16, #tpu.memory_space<vmem>>, vector<8x512xbf16>
    %c2 = arith.constant 2 : index
    %c0_20 = arith.constant 0 : index
    %23 = vector.load %arg3[%c2, %c0_20] : memref<27x512xbf16, #tpu.memory_space<vmem>>, vector<1x512xbf16>
    %24 = vector.broadcast %23 : vector<1x512xbf16> to vector<8x512xbf16>
    %25 = arith.mulf %22, %24 : vector<8x512xbf16>
    %c16 = arith.constant 16 : index
    %c0_21 = arith.constant 0 : index
    %26 = vector.load %arg10[%c16, %c0_21] : memref<216x512xbf16, #tpu.memory_space<vmem>>, vector<8x512xbf16>
    tpu.vector_store %arg10[%c16, %c0_21], %25 {strides = array<i32>} : memref<216x512xbf16, #tpu.memory_space<vmem>>, vector<8x512xbf16>,
    %c0_22 = arith.constant 0 : index
    %c63 = arith.constant 63 : index
    %27 = vector.load %arg9[%c0_22, %c63] : memref<8x768xbf16, #tpu.memory_space<vmem>>, vector<8x512xbf16>
    %c3 = arith.constant 3 : index
    %c0_23 = arith.constant 0 : index
    %28 = vector.load %arg3[%c3, %c0_23] : memref<27x512xbf16, #tpu.memory_space<vmem>>, vector<1x512xbf16>
    %29 = vector.broadcast %28 : vector<1x512xbf16> to vector<8x512xbf16>
    %30 = arith.mulf %27, %29 : vector<8x512xbf16>
    %c24 = arith.constant 24 : index
    %c0_24 = arith.constant 0 : index
    %31 = vector.load %arg10[%c24, %c0_24] : memref<216x512xbf16, #tpu.memory_space<vmem>>, vector<8x512xbf16>
    tpu.vector_store %arg10[%c24, %c0_24], %30 {strides = array<i32>} : memref<216x512xbf16, #tpu.memory_space<vmem>>, vector<8x512xbf16>,
    %c0_25 = arith.constant 0 : index
    %c64 = arith.constant 64 : index
    %32 = vector.load %arg9[%c0_25, %c64] : memref<8x768xbf16, #tpu.memory_space<vmem>>, vector<8x512xbf16>
    %c4_26 = arith.constant 4 : index
    %c0_27 = arith.constant 0 : index
    %33 = vector.load %arg3[%c4_26, %c0_27] : memref<27x512xbf16, #tpu.memory_space<vmem>>, vector<1x512xbf16>
    %34 = vector.broadcast %33 : vector<1x512xbf16> to vector<8x512xbf16>
    %35 = arith.mulf %32, %34 : vector<8x512xbf16>
    %c32 = arith.constant 32 : index
    %c0_28 = arith.constant 0 : index
    %36 = vector.load %arg10[%c32, %c0_28] : memref<216x512xbf16, #tpu.memory_space<vmem>>, vector<8x512xbf16>
    tpu.vector_store %arg10[%c32, %c0_28], %35 {strides = array<i32>} : memref<216x512xbf16, #tpu.memory_space<vmem>>, vector<8x512xbf16>,
    %c0_29 = arith.constant 0 : index
    %c65 = arith.constant 65 : index
    %37 = vector.load %arg9[%c0_29, %c65] : memref<8x768xbf16, #tpu.memory_space<vmem>>, vector<8x512xbf16>
    %c5 = arith.constant 5 : index
    %c0_30 = arith.constant 0 : index
    %38 = vector.load %arg3[%c5, %c0_30] : memref<27x512xbf16, #tpu.memory_space<vmem>>, vector<1x512xbf16>
    %39 = vector.broadcast %38 : vector<1x512xbf16> to vector<8x512xbf16>
    %40 = arith.mulf %37, %39 : vector<8x512xbf16>
    %c40 = arith.constant 40 : index
    %c0_31 = arith.constant 0 : index
    %41 = vector.load %arg10[%c40, %c0_31] : memref<216x512xbf16, #tpu.memory_space<vmem>>, vector<8x512xbf16>
    tpu.vector_store %arg10[%c40, %c0_31], %40 {strides = array<i32>} : memref<216x512xbf16, #tpu.memory_space<vmem>>, vector<8x512xbf16>,
    %c0_32 = arith.constant 0 : index
    %c71 = arith.constant 71 : index
    %42 = vector.load %arg9[%c0_32, %c71] : memref<8x768xbf16, #tpu.memory_space<vmem>>, vector<8x512xbf16>
    %c6 = arith.constant 6 : index
    %c0_33 = arith.constant 0 : index
    %43 = vector.load %arg3[%c6, %c0_33] : memref<27x512xbf16, #tpu.memory_space<vmem>>, vector<1x512xbf16>
    %44 = vector.broadcast %43 : vector<1x512xbf16> to vector<8x512xbf16>
    %45 = arith.mulf %42, %44 : vector<8x512xbf16>
    %c48 = arith.constant 48 : index
    %c0_34 = arith.constant 0 : index
    %46 = vector.load %arg10[%c48, %c0_34] : memref<216x512xbf16, #tpu.memory_space<vmem>>, vector<8x512xbf16>
    tpu.vector_store %arg10[%c48, %c0_34], %45 {strides = array<i32>} : memref<216x512xbf16, #tpu.memory_space<vmem>>, vector<8x512xbf16>,
    %c0_35 = arith.constant 0 : index
    %c72 = arith.constant 72 : index
    %47 = vector.load %arg9[%c0_35, %c72] : memref<8x768xbf16, #tpu.memory_space<vmem>>, vector<8x512xbf16>
    %c7 = arith.constant 7 : index
    %c0_36 = arith.constant 0 : index
    %48 = vector.load %arg3[%c7, %c0_36] : memref<27x512xbf16, #tpu.memory_space<vmem>>, vector<1x512xbf16>
    %49 = vector.broadcast %48 : vector<1x512xbf16> to vector<8x512xbf16>
    %50 = arith.mulf %47, %49 : vector<8x512xbf16>
    %c56_37 = arith.constant 56 : index
    %c0_38 = arith.constant 0 : index
    %51 = vector.load %arg10[%c56_37, %c0_38] : memref<216x512xbf16, #tpu.memory_space<vmem>>, vector<8x512xbf16>
    tpu.vector_store %arg10[%c56_37, %c0_38], %50 {strides = array<i32>} : memref<216x512xbf16, #tpu.memory_space<vmem>>, vector<8x512xbf16>,
    %c0_39 = arith.constant 0 : index
    %c73 = arith.constant 73 : index
    %52 = vector.load %arg9[%c0_39, %c73] : memref<8x768xbf16, #tpu.memory_space<vmem>>, vector<8x512xbf16>
    %c8_40 = arith.constant 8 : index
    %c0_41 = arith.constant 0 : index
    %53 = vector.load %arg3[%c8_40, %c0_41] : memref<27x512xbf16, #tpu.memory_space<vmem>>, vector<1x512xbf16>
    %54 = vector.broadcast %53 : vector<1x512xbf16> to vector<8x512xbf16>
    %55 = arith.mulf %52, %54 : vector<8x512xbf16>
    %c64_42 = arith.constant 64 : index
    %c0_43 = arith.constant 0 : index
    %56 = vector.load %arg10[%c64_42, %c0_43] : memref<216x512xbf16, #tpu.memory_space<vmem>>, vector<8x512xbf16>
    tpu.vector_store %arg10[%c64_42, %c0_43], %55 {strides = array<i32>} : memref<216x512xbf16, #tpu.memory_space<vmem>>, vector<8x512xbf16>,
    %c0_44 = arith.constant 0 : index
    %c119 = arith.constant 119 : index
    %57 = vector.load %arg9[%c0_44, %c119] : memref<8x768xbf16, #tpu.memory_space<vmem>>, vector<8x512xbf16>
    %c9 = arith.constant 9 : index
    %c0_45 = arith.constant 0 : index
    %58 = vector.load %arg3[%c9, %c0_45] : memref<27x512xbf16, #tpu.memory_space<vmem>>, vector<1x512xbf16>
    %59 = vector.broadcast %58 : vector<1x512xbf16> to vector<8x512xbf16>
    %60 = arith.mulf %57, %59 : vector<8x512xbf16>
    %c72_46 = arith.constant 72 : index
    %c0_47 = arith.constant 0 : index
    %61 = vector.load %arg10[%c72_46, %c0_47] : memref<216x512xbf16, #tpu.memory_space<vmem>>, vector<8x512xbf16>
    tpu.vector_store %arg10[%c72_46, %c0_47], %60 {strides = array<i32>} : memref<216x512xbf16, #tpu.memory_space<vmem>>, vector<8x512xbf16>,
    %c0_48 = arith.constant 0 : index
    %c120 = arith.constant 120 : index
    %62 = vector.load %arg9[%c0_48, %c120] : memref<8x768xbf16, #tpu.memory_space<vmem>>, vector<8x512xbf16>
    %c10 = arith.constant 10 : index
    %c0_49 = arith.constant 0 : index
    %63 = vector.load %arg3[%c10, %c0_49] : memref<27x512xbf16, #tpu.memory_space<vmem>>, vector<1x512xbf16>
    %64 = vector.broadcast %63 : vector<1x512xbf16> to vector<8x512xbf16>
    %65 = arith.mulf %62, %64 : vector<8x512xbf16>
    %c80 = arith.constant 80 : index
    %c0_50 = arith.constant 0 : index
    %66 = vector.load %arg10[%c80, %c0_50] : memref<216x512xbf16, #tpu.memory_space<vmem>>, vector<8x512xbf16>
    tpu.vector_store %arg10[%c80, %c0_50], %65 {strides = array<i32>} : memref<216x512xbf16, #tpu.memory_space<vmem>>, vector<8x512xbf16>,
    %c0_51 = arith.constant 0 : index
    %c121 = arith.constant 121 : index
    %67 = vector.load %arg9[%c0_51, %c121] : memref<8x768xbf16, #tpu.memory_space<vmem>>, vector<8x512xbf16>
    %c11 = arith.constant 11 : index
    %c0_52 = arith.constant 0 : index
    %68 = vector.load %arg3[%c11, %c0_52] : memref<27x512xbf16, #tpu.memory_space<vmem>>, vector<1x512xbf16>
    %69 = vector.broadcast %68 : vector<1x512xbf16> to vector<8x512xbf16>
    %70 = arith.mulf %67, %69 : vector<8x512xbf16>
    %c88 = arith.constant 88 : index
    %c0_53 = arith.constant 0 : index
    %71 = vector.load %arg10[%c88, %c0_53] : memref<216x512xbf16, #tpu.memory_space<vmem>>, vector<8x512xbf16>
    tpu.vector_store %arg10[%c88, %c0_53], %70 {strides = array<i32>} : memref<216x512xbf16, #tpu.memory_space<vmem>>, vector<8x512xbf16>,
    %c0_54 = arith.constant 0 : index
    %c127 = arith.constant 127 : index
    %72 = vector.load %arg9[%c0_54, %c127] : memref<8x768xbf16, #tpu.memory_space<vmem>>, vector<8x512xbf16>
    %c12 = arith.constant 12 : index
    %c0_55 = arith.constant 0 : index
    %73 = vector.load %arg3[%c12, %c0_55] : memref<27x512xbf16, #tpu.memory_space<vmem>>, vector<1x512xbf16>
    %74 = vector.broadcast %73 : vector<1x512xbf16> to vector<8x512xbf16>
    %75 = arith.mulf %72, %74 : vector<8x512xbf16>
    %c96 = arith.constant 96 : index
    %c0_56 = arith.constant 0 : index
    %76 = vector.load %arg10[%c96, %c0_56] : memref<216x512xbf16, #tpu.memory_space<vmem>>, vector<8x512xbf16>
    tpu.vector_store %arg10[%c96, %c0_56], %75 {strides = array<i32>} : memref<216x512xbf16, #tpu.memory_space<vmem>>, vector<8x512xbf16>,
    %c0_57 = arith.constant 0 : index
    %c128_58 = arith.constant 128 : index
    %77 = vector.load %arg9[%c0_57, %c128_58] : memref<8x768xbf16, #tpu.memory_space<vmem>>, vector<8x512xbf16>
    %c13 = arith.constant 13 : index
    %c0_59 = arith.constant 0 : index
    %78 = vector.load %arg3[%c13, %c0_59] : memref<27x512xbf16, #tpu.memory_space<vmem>>, vector<1x512xbf16>
    %79 = vector.broadcast %78 : vector<1x512xbf16> to vector<8x512xbf16>
    %80 = arith.mulf %77, %79 : vector<8x512xbf16>
    %c104 = arith.constant 104 : index
    %c0_60 = arith.constant 0 : index
    %81 = vector.load %arg10[%c104, %c0_60] : memref<216x512xbf16, #tpu.memory_space<vmem>>, vector<8x512xbf16>
    tpu.vector_store %arg10[%c104, %c0_60], %80 {strides = array<i32>} : memref<216x512xbf16, #tpu.memory_space<vmem>>, vector<8x512xbf16>,
    %c0_61 = arith.constant 0 : index
    %c129 = arith.constant 129 : index
    %82 = vector.load %arg9[%c0_61, %c129] : memref<8x768xbf16, #tpu.memory_space<vmem>>, vector<8x512xbf16>
    %c14 = arith.constant 14 : index
    %c0_62 = arith.constant 0 : index
    %83 = vector.load %arg3[%c14, %c0_62] : memref<27x512xbf16, #tpu.memory_space<vmem>>, vector<1x512xbf16>
    %84 = vector.broadcast %83 : vector<1x512xbf16> to vector<8x512xbf16>
    %85 = arith.mulf %82, %84 : vector<8x512xbf16>
    %c112 = arith.constant 112 : index
    %c0_63 = arith.constant 0 : index
    %86 = vector.load %arg10[%c112, %c0_63] : memref<216x512xbf16, #tpu.memory_space<vmem>>, vector<8x512xbf16>
    tpu.vector_store %arg10[%c112, %c0_63], %85 {strides = array<i32>} : memref<216x512xbf16, #tpu.memory_space<vmem>>, vector<8x512xbf16>,
    %c0_64 = arith.constant 0 : index
    %c135 = arith.constant 135 : index
    %87 = vector.load %arg9[%c0_64, %c135] : memref<8x768xbf16, #tpu.memory_space<vmem>>, vector<8x512xbf16>
    %c15 = arith.constant 15 : index
    %c0_65 = arith.constant 0 : index
    %88 = vector.load %arg3[%c15, %c0_65] : memref<27x512xbf16, #tpu.memory_space<vmem>>, vector<1x512xbf16>
    %89 = vector.broadcast %88 : vector<1x512xbf16> to vector<8x512xbf16>
    %90 = arith.mulf %87, %89 : vector<8x512xbf16>
    %c120_66 = arith.constant 120 : index
    %c0_67 = arith.constant 0 : index
    %91 = vector.load %arg10[%c120_66, %c0_67] : memref<216x512xbf16, #tpu.memory_space<vmem>>, vector<8x512xbf16>
    tpu.vector_store %arg10[%c120_66, %c0_67], %90 {strides = array<i32>} : memref<216x512xbf16, #tpu.memory_space<vmem>>, vector<8x512xbf16>,
    %c0_68 = arith.constant 0 : index
    %c136 = arith.constant 136 : index
    %92 = vector.load %arg9[%c0_68, %c136] : memref<8x768xbf16, #tpu.memory_space<vmem>>, vector<8x512xbf16>
    %c16_69 = arith.constant 16 : index
    %c0_70 = arith.constant 0 : index
    %93 = vector.load %arg3[%c16_69, %c0_70] : memref<27x512xbf16, #tpu.memory_space<vmem>>, vector<1x512xbf16>
    %94 = vector.broadcast %93 : vector<1x512xbf16> to vector<8x512xbf16>
    %95 = arith.mulf %92, %94 : vector<8x512xbf16>
    %c128_71 = arith.constant 128 : index
    %c0_72 = arith.constant 0 : index
    %96 = vector.load %arg10[%c128_71, %c0_72] : memref<216x512xbf16, #tpu.memory_space<vmem>>, vector<8x512xbf16>
    tpu.vector_store %arg10[%c128_71, %c0_72], %95 {strides = array<i32>} : memref<216x512xbf16, #tpu.memory_space<vmem>>, vector<8x512xbf16>,
    %c0_73 = arith.constant 0 : index
    %c137 = arith.constant 137 : index
    %97 = vector.load %arg9[%c0_73, %c137] : memref<8x768xbf16, #tpu.memory_space<vmem>>, vector<8x512xbf16>
    %c17 = arith.constant 17 : index
    %c0_74 = arith.constant 0 : index
    %98 = vector.load %arg3[%c17, %c0_74] : memref<27x512xbf16, #tpu.memory_space<vmem>>, vector<1x512xbf16>
    %99 = vector.broadcast %98 : vector<1x512xbf16> to vector<8x512xbf16>
    %100 = arith.mulf %97, %99 : vector<8x512xbf16>
    %c136_75 = arith.constant 136 : index
    %c0_76 = arith.constant 0 : index
    %101 = vector.load %arg10[%c136_75, %c0_76] : memref<216x512xbf16, #tpu.memory_space<vmem>>, vector<8x512xbf16>
    tpu.vector_store %arg10[%c136_75, %c0_76], %100 {strides = array<i32>} : memref<216x512xbf16, #tpu.memory_space<vmem>>, vector<8x512xbf16>,
    %c0_77 = arith.constant 0 : index
    %c183 = arith.constant 183 : index
    %102 = vector.load %arg9[%c0_77, %c183] : memref<8x768xbf16, #tpu.memory_space<vmem>>, vector<8x512xbf16>
    %c18 = arith.constant 18 : index
    %c0_78 = arith.constant 0 : index
    %103 = vector.load %arg3[%c18, %c0_78] : memref<27x512xbf16, #tpu.memory_space<vmem>>, vector<1x512xbf16>
    %104 = vector.broadcast %103 : vector<1x512xbf16> to vector<8x512xbf16>
    %105 = arith.mulf %102, %104 : vector<8x512xbf16>
    %c144 = arith.constant 144 : index
    %c0_79 = arith.constant 0 : index
    %106 = vector.load %arg10[%c144, %c0_79] : memref<216x512xbf16, #tpu.memory_space<vmem>>, vector<8x512xbf16>
    tpu.vector_store %arg10[%c144, %c0_79], %105 {strides = array<i32>} : memref<216x512xbf16, #tpu.memory_space<vmem>>, vector<8x512xbf16>,
    %c0_80 = arith.constant 0 : index
    %c184 = arith.constant 184 : index
    %107 = vector.load %arg9[%c0_80, %c184] : memref<8x768xbf16, #tpu.memory_space<vmem>>, vector<8x512xbf16>
    %c19 = arith.constant 19 : index
    %c0_81 = arith.constant 0 : index
    %108 = vector.load %arg3[%c19, %c0_81] : memref<27x512xbf16, #tpu.memory_space<vmem>>, vector<1x512xbf16>
    %109 = vector.broadcast %108 : vector<1x512xbf16> to vector<8x512xbf16>
    %110 = arith.mulf %107, %109 : vector<8x512xbf16>
    %c152 = arith.constant 152 : index
    %c0_82 = arith.constant 0 : index
    %111 = vector.load %arg10[%c152, %c0_82] : memref<216x512xbf16, #tpu.memory_space<vmem>>, vector<8x512xbf16>
    tpu.vector_store %arg10[%c152, %c0_82], %110 {strides = array<i32>} : memref<216x512xbf16, #tpu.memory_space<vmem>>, vector<8x512xbf16>,
    %c0_83 = arith.constant 0 : index
    %c185 = arith.constant 185 : index
    %112 = vector.load %arg9[%c0_83, %c185] : memref<8x768xbf16, #tpu.memory_space<vmem>>, vector<8x512xbf16>
    %c20 = arith.constant 20 : index
    %c0_84 = arith.constant 0 : index
    %113 = vector.load %arg3[%c20, %c0_84] : memref<27x512xbf16, #tpu.memory_space<vmem>>, vector<1x512xbf16>
    %114 = vector.broadcast %113 : vector<1x512xbf16> to vector<8x512xbf16>
    %115 = arith.mulf %112, %114 : vector<8x512xbf16>
    %c160 = arith.constant 160 : index
    %c0_85 = arith.constant 0 : index
    %116 = vector.load %arg10[%c160, %c0_85] : memref<216x512xbf16, #tpu.memory_space<vmem>>, vector<8x512xbf16>
    tpu.vector_store %arg10[%c160, %c0_85], %115 {strides = array<i32>} : memref<216x512xbf16, #tpu.memory_space<vmem>>, vector<8x512xbf16>,
    %c0_86 = arith.constant 0 : index
    %c191 = arith.constant 191 : index
    %117 = vector.load %arg9[%c0_86, %c191] : memref<8x768xbf16, #tpu.memory_space<vmem>>, vector<8x512xbf16>
    %c21 = arith.constant 21 : index
    %c0_87 = arith.constant 0 : index
    %118 = vector.load %arg3[%c21, %c0_87] : memref<27x512xbf16, #tpu.memory_space<vmem>>, vector<1x512xbf16>
    %119 = vector.broadcast %118 : vector<1x512xbf16> to vector<8x512xbf16>
    %120 = arith.mulf %117, %119 : vector<8x512xbf16>
    %c168 = arith.constant 168 : index
    %c0_88 = arith.constant 0 : index
    %121 = vector.load %arg10[%c168, %c0_88] : memref<216x512xbf16, #tpu.memory_space<vmem>>, vector<8x512xbf16>
    tpu.vector_store %arg10[%c168, %c0_88], %120 {strides = array<i32>} : memref<216x512xbf16, #tpu.memory_space<vmem>>, vector<8x512xbf16>,
    %c0_89 = arith.constant 0 : index
    %c192 = arith.constant 192 : index
    %122 = vector.load %arg9[%c0_89, %c192] : memref<8x768xbf16, #tpu.memory_space<vmem>>, vector<8x512xbf16>
    %c22 = arith.constant 22 : index
    %c0_90 = arith.constant 0 : index
    %123 = vector.load %arg3[%c22, %c0_90] : memref<27x512xbf16, #tpu.memory_space<vmem>>, vector<1x512xbf16>
    %124 = vector.broadcast %123 : vector<1x512xbf16> to vector<8x512xbf16>
    %125 = arith.mulf %122, %124 : vector<8x512xbf16>
    %c176 = arith.constant 176 : index
    %c0_91 = arith.constant 0 : index
    %126 = vector.load %arg10[%c176, %c0_91] : memref<216x512xbf16, #tpu.memory_space<vmem>>, vector<8x512xbf16>
    tpu.vector_store %arg10[%c176, %c0_91], %125 {strides = array<i32>} : memref<216x512xbf16, #tpu.memory_space<vmem>>, vector<8x512xbf16>,
    %c0_92 = arith.constant 0 : index
    %c193 = arith.constant 193 : index
    %127 = vector.load %arg9[%c0_92, %c193] : memref<8x768xbf16, #tpu.memory_space<vmem>>, vector<8x512xbf16>
    %c23 = arith.constant 23 : index
    %c0_93 = arith.constant 0 : index
    %128 = vector.load %arg3[%c23, %c0_93] : memref<27x512xbf16, #tpu.memory_space<vmem>>, vector<1x512xbf16>
    %129 = vector.broadcast %128 : vector<1x512xbf16> to vector<8x512xbf16>
    %130 = arith.mulf %127, %129 : vector<8x512xbf16>
    %c184_94 = arith.constant 184 : index
    %c0_95 = arith.constant 0 : index
    %131 = vector.load %arg10[%c184_94, %c0_95] : memref<216x512xbf16, #tpu.memory_space<vmem>>, vector<8x512xbf16>
    tpu.vector_store %arg10[%c184_94, %c0_95], %130 {strides = array<i32>} : memref<216x512xbf16, #tpu.memory_space<vmem>>, vector<8x512xbf16>,
    %c0_96 = arith.constant 0 : index
    %c199 = arith.constant 199 : index
    %132 = vector.load %arg9[%c0_96, %c199] : memref<8x768xbf16, #tpu.memory_space<vmem>>, vector<8x512xbf16>
    %c24_97 = arith.constant 24 : index
    %c0_98 = arith.constant 0 : index
    %133 = vector.load %arg3[%c24_97, %c0_98] : memref<27x512xbf16, #tpu.memory_space<vmem>>, vector<1x512xbf16>
    %134 = vector.broadcast %133 : vector<1x512xbf16> to vector<8x512xbf16>
    %135 = arith.mulf %132, %134 : vector<8x512xbf16>
    %c192_99 = arith.constant 192 : index
    %c0_100 = arith.constant 0 : index
    %136 = vector.load %arg10[%c192_99, %c0_100] : memref<216x512xbf16, #tpu.memory_space<vmem>>, vector<8x512xbf16>
    tpu.vector_store %arg10[%c192_99, %c0_100], %135 {strides = array<i32>} : memref<216x512xbf16, #tpu.memory_space<vmem>>, vector<8x512xbf16>,
    %c0_101 = arith.constant 0 : index
    %c200 = arith.constant 200 : index
    %137 = vector.load %arg9[%c0_101, %c200] : memref<8x768xbf16, #tpu.memory_space<vmem>>, vector<8x512xbf16>
    %c25 = arith.constant 25 : index
    %c0_102 = arith.constant 0 : index
    %138 = vector.load %arg3[%c25, %c0_102] : memref<27x512xbf16, #tpu.memory_space<vmem>>, vector<1x512xbf16>
    %139 = vector.broadcast %138 : vector<1x512xbf16> to vector<8x512xbf16>
    %140 = arith.mulf %137, %139 : vector<8x512xbf16>
    %c200_103 = arith.constant 200 : index
    %c0_104 = arith.constant 0 : index
    %141 = vector.load %arg10[%c200_103, %c0_104] : memref<216x512xbf16, #tpu.memory_space<vmem>>, vector<8x512xbf16>
    tpu.vector_store %arg10[%c200_103, %c0_104], %140 {strides = array<i32>} : memref<216x512xbf16, #tpu.memory_space<vmem>>, vector<8x512xbf16>,
    %c0_105 = arith.constant 0 : index
    %c201 = arith.constant 201 : index
    %142 = vector.load %arg9[%c0_105, %c201] : memref<8x768xbf16, #tpu.memory_space<vmem>>, vector<8x512xbf16>
    %c26 = arith.constant 26 : index
    %c0_106 = arith.constant 0 : index
    %143 = vector.load %arg3[%c26, %c0_106] : memref<27x512xbf16, #tpu.memory_space<vmem>>, vector<1x512xbf16>
    %144 = vector.broadcast %143 : vector<1x512xbf16> to vector<8x512xbf16>
    %145 = arith.mulf %142, %144 : vector<8x512xbf16>
    %c208 = arith.constant 208 : index
    %c0_107 = arith.constant 0 : index
    %146 = vector.load %arg10[%c208, %c0_107] : memref<216x512xbf16, #tpu.memory_space<vmem>>, vector<8x512xbf16>
    tpu.vector_store %arg10[%c208, %c0_107], %145 {strides = array<i32>} : memref<216x512xbf16, #tpu.memory_space<vmem>>, vector<8x512xbf16>,
    %c0_108 = arith.constant 0 : index
    %c0_109 = arith.constant 0 : index
    %147 = vector.load %arg4[%c0_108, %c0_109] : memref<4x216xbf16, #tpu.memory_space<vmem>>, vector<4x216xbf16>
    %c0_110 = arith.constant 0 : index
    %c0_111 = arith.constant 0 : index
    %148 = vector.load %arg10[%c0_110, %c0_111] : memref<216x512xbf16, #tpu.memory_space<vmem>>, vector<216x512xbf16>
    %cst_112 = arith.constant dense<0.000000e+00> : vector<4x512xf32>
    %149 = tpu.matmul %147, %148, %cst_112 {dimension_numbers = #tpu.dot_dimension_numbers<[1], [0], [0], [1], [0, 0, 1, 1], [], []>} : vector<4x216xbf16>, vector<216x512xbf16>, vector<4x512xf32> -> vector<4x512xf32>
    %c0_113 = arith.constant 0 : index
    %c0_114 = arith.constant 0 : index
    %150 = vector.load %arg5[%c0_113, %c0_114] : memref<4x1xf32, #tpu.memory_space<vmem>>, vector<4x1xf32>
    %151 = vector.broadcast %150 : vector<4x1xf32> to vector<4x512xf32>
    %152 = arith.addf %149, %151 : vector<4x512xf32>
    %cst_115 = arith.constant dense<0.000000e+00> : vector<4xf32>
    %153 = vector.multi_reduction <add>, %152, %cst_115 [1] : vector<4x512xf32> to vector<4xf32>
    %154 = vector.shape_cast %153 : vector<4xf32> to vector<4x1xf32>
    %155 = vector.shape_cast %154 : vector<4x1xf32> to vector<1x4x1xf32>
    %c0_116 = arith.constant 0 : index
    %c0_117 = arith.constant 0 : index
    %c0_118 = arith.constant 0 : index
    %156 = vector.load %arg7[%c0_116, %c0_117, %c0_118] : memref<1x4x1xf32, #tpu.memory_space<vmem>>, vector<1x4x1xf32>
    tpu.vector_store %arg7[%c0_116, %c0_117, %c0_118], %155 {strides = array<i32>} : memref<1x4x1xf32, #tpu.memory_space<vmem>>, vector<1x4x1xf32>,
    %157 = arith.mulf %152, %152 : vector<4x512xf32>
    %cst_119 = arith.constant dense<0.000000e+00> : vector<4xf32>
    %158 = vector.multi_reduction <add>, %157, %cst_119 [1] : vector<4x512xf32> to vector<4xf32>
    %159 = vector.shape_cast %158 : vector<4xf32> to vector<4x1xf32>
    %160 = vector.shape_cast %159 : vector<4x1xf32> to vector<1x4x1xf32>
    %c0_120 = arith.constant 0 : index
    %c0_121 = arith.constant 0 : index
    %c0_122 = arith.constant 0 : index
    %161 = vector.load %arg8[%c0_120, %c0_121, %c0_122] : memref<1x4x1xf32, #tpu.memory_space<vmem>>, vector<1x4x1xf32>
    tpu.vector_store %arg8[%c0_120, %c0_121, %c0_122], %160 {strides = array<i32>} : memref<1x4x1xf32, #tpu.memory_space<vmem>>, vector<1x4x1xf32>,
    %162 = arith.truncf %152 : vector<4x512xf32> to vector<4x512xbf16>
    %163 = vector.shape_cast %162 : vector<4x512xbf16> to vector<1x4x512xbf16>
    %c0_123 = arith.constant 0 : index
    %c0_124 = arith.constant 0 : index
    %c0_125 = arith.constant 0 : index
    %164 = vector.load %arg6[%c0_123, %c0_124, %c0_125] : memref<1x4x512xbf16, #tpu.memory_space<vmem>>, vector<1x4x512xbf16>
    tpu.vector_store %arg6[%c0_123, %c0_124, %c0_125], %163 {strides = array<i32>} : memref<1x4x512xbf16, #tpu.memory_space<vmem>>, vector<1x4x512xbf16>,
    return
  }
  func.func @transform_0(%arg0: i32) -> (i32, i32, i32) {
    %c0_i32 = arith.constant 0 : i32
    %c0_i32_0 = arith.constant 0 : i32
    %c0_i32_1 = arith.constant 0 : i32
    return %arg0, %c0_i32, %c0_i32_0 : i32, i32, i32
  }
  func.func @transform_1(%arg0: i32) -> (i32, i32, i32) {
    %c0_i32 = arith.constant 0 : i32
    %c0_i32_0 = arith.constant 0 : i32
    %c0_i32_1 = arith.constant 0 : i32
    return %arg0, %c0_i32, %c0_i32_0 : i32, i32, i32
  }
  func.func @transform_2(%arg0: i32) -> (i32, i32) {
    %c0_i32 = arith.constant 0 : i32
    %c0_i32_0 = arith.constant 0 : i32
    %c0_i32_1 = arith.constant 0 : i32
    return %c0_i32, %c0_i32_0 : i32, i32
  }
  func.func @transform_3(%arg0: i32) -> (i32, i32) {
    %c0_i32 = arith.constant 0 : i32
    %c0_i32_0 = arith.constant 0 : i32
    %c0_i32_1 = arith.constant 0 : i32
    return %c0_i32, %c0_i32_0 : i32, i32
  }
  func.func @transform_4(%arg0: i32) -> (i32, i32) {
    %c0_i32 = arith.constant 0 : i32
    %c0_i32_0 = arith.constant 0 : i32
    %c0_i32_1 = arith.constant 0 : i32
    return %c0_i32, %c0_i32_0 : i32, i32
  }
  func.func @transform_5(%arg0: i32) -> (i32, i32, i32) {
    %c0_i32 = arith.constant 0 : i32
    %c0_i32_0 = arith.constant 0 : i32
    %c0_i32_1 = arith.constant 0 : i32
    return %arg0, %c0_i32, %c0_i32_0 : i32, i32, i32
  }
  func.func @transform_6(%arg0: i32) -> (i32, i32, i32) {
    %c0_i32 = arith.constant 0 : i32
    %c0_i32_0 = arith.constant 0 : i32
    %c0_i32_1 = arith.constant 0 : i32
    return %arg0, %c0_i32, %c0_i32_0 : i32, i32, i32
  }
  func.func @transform_7(%arg0: i32) -> (i32, i32, i32) {
    %c0_i32 = arith.constant 0 : i32
    %c0_i32_0 = arith.constant 0 : i32
    %c0_i32_1 = arith.constant 0 : i32
    return %arg0, %c0_i32, %c0_i32_0 : i32, i32, i32
  }
}

module attributes {stable_mosaic.version = 11 : i64} {
  func.func @kernel(%arg0: i32, %arg1: memref<1x4x512xbf16, #tpu.memory_space<vmem>>, %arg2: memref<4x1xf32, #tpu.memory_space<vmem>>, %arg3: memref<4x1xf32, #tpu.memory_space<vmem>>, %arg4: memref<27x512xbf16, #tpu.memory_space<vmem>>, %arg5: memref<4x108xbf16, #tpu.memory_space<vmem>>, %arg6: memref<4x1xf32, #tpu.memory_space<vmem>>, %arg7: memref<1x4x512xf32, #tpu.memory_space<vmem>>, %arg8: memref<1x4x1xf32, #tpu.memory_space<vmem>>, %arg9: memref<1x4x1xf32, #tpu.memory_space<vmem>>, %arg10: memref<4x768xbf16, #tpu.memory_space<vmem>>, %arg11: memref<108x512xbf16, #tpu.memory_space<vmem>>) attributes {dimension_semantics = [#tpu.dimension_semantics<parallel>], iteration_bounds = array<i64: 2>, scalar_prefetch = 0 : i64, scratch_operands = 2 : i64, tpu.core_type = #tpu.core_type<tc>, window_params = [{transform_indices = @transform_0, window_bounds = array<i64: 1, 4, 512>}, {pipeline_mode = #tpu.pipeline_mode<synchronous>, transform_indices = @transform_1, window_bounds = array<i64: 4, 1>}, {pipeline_mode = #tpu.pipeline_mode<synchronous>, transform_indices = @transform_2, window_bounds = array<i64: 4, 1>}, {pipeline_mode = #tpu.pipeline_mode<synchronous>, transform_indices = @transform_3, window_bounds = array<i64: 27, 512>}, {pipeline_mode = #tpu.pipeline_mode<synchronous>, transform_indices = @transform_4, window_bounds = array<i64: 4, 108>}, {pipeline_mode = #tpu.pipeline_mode<synchronous>, transform_indices = @transform_5, window_bounds = array<i64: 4, 1>}, {transform_indices = @transform_6, window_bounds = array<i64: 1, 4, 512>}, {transform_indices = @transform_7, window_bounds = array<i64: 1, 4, 1>}, {transform_indices = @transform_8, window_bounds = array<i64: 1, 4, 1>}]} {
    %cst = arith.constant 0.000000e+00 : bf16
    %0 = vector.broadcast %cst : bf16 to vector<4x128xbf16>
    %c0 = arith.constant 0 : index
    %c0_0 = arith.constant 0 : index
    %1 = vector.load %arg10[%c0, %c0_0] : memref<4x768xbf16, #tpu.memory_space<vmem>>, vector<4x128xbf16>
    tpu.vector_store %arg10[%c0, %c0_0], %0 {strides = array<i32>} : memref<4x768xbf16, #tpu.memory_space<vmem>>, vector<4x128xbf16>,
    %cst_1 = arith.constant 0.000000e+00 : bf16
    %2 = vector.broadcast %cst_1 : bf16 to vector<4x128xbf16>
    %c0_2 = arith.constant 0 : index
    %c640 = arith.constant 640 : index
    %3 = vector.load %arg10[%c0_2, %c640] : memref<4x768xbf16, #tpu.memory_space<vmem>>, vector<4x128xbf16>
    tpu.vector_store %arg10[%c0_2, %c640], %2 {strides = array<i32>} : memref<4x768xbf16, #tpu.memory_space<vmem>>, vector<4x128xbf16>,
    %c0_3 = arith.constant 0 : index
    %c0_4 = arith.constant 0 : index
    %c0_5 = arith.constant 0 : index
    %4 = vector.load %arg1[%c0_3, %c0_4, %c0_5] : memref<1x4x512xbf16, #tpu.memory_space<vmem>>, vector<1x4x512xbf16>
    %5 = vector.shape_cast %4 : vector<1x4x512xbf16> to vector<4x512xbf16>
    %6 = arith.extf %5 : vector<4x512xbf16> to vector<4x512xf32>
    %c0_6 = arith.constant 0 : index
    %c0_7 = arith.constant 0 : index
    %7 = vector.load %arg2[%c0_6, %c0_7] : memref<4x1xf32, #tpu.memory_space<vmem>>, vector<4x1xf32>
    %8 = vector.broadcast %7 : vector<4x1xf32> to vector<4x512xf32>
    %9 = arith.mulf %6, %8 : vector<4x512xf32>
    %c0_8 = arith.constant 0 : index
    %c0_9 = arith.constant 0 : index
    %10 = vector.load %arg3[%c0_8, %c0_9] : memref<4x1xf32, #tpu.memory_space<vmem>>, vector<4x1xf32>
    %11 = vector.broadcast %10 : vector<4x1xf32> to vector<4x512xf32>
    %12 = arith.addf %9, %11 : vector<4x512xf32>
    %cst_10 = arith.constant 0.000000e+00 : f32
    %13 = vector.broadcast %cst_10 : f32 to vector<4x512xf32>
    %14 = arith.maximumf %12, %13 : vector<4x512xf32>
    %15 = arith.truncf %14 : vector<4x512xf32> to vector<4x512xbf16>
    %c0_11 = arith.constant 0 : index
    %c128 = arith.constant 128 : index
    %16 = vector.load %arg10[%c0_11, %c128] : memref<4x768xbf16, #tpu.memory_space<vmem>>, vector<4x512xbf16>
    tpu.vector_store %arg10[%c0_11, %c128], %15 {strides = array<i32>} : memref<4x768xbf16, #tpu.memory_space<vmem>>, vector<4x512xbf16>,
    %c0_12 = arith.constant 0 : index
    %c55 = arith.constant 55 : index
    %17 = vector.load %arg10[%c0_12, %c55] : memref<4x768xbf16, #tpu.memory_space<vmem>>, vector<4x512xbf16>
    %c0_13 = arith.constant 0 : index
    %c0_14 = arith.constant 0 : index
    %18 = vector.load %arg4[%c0_13, %c0_14] : memref<27x512xbf16, #tpu.memory_space<vmem>>, vector<1x512xbf16>
    %19 = vector.broadcast %18 : vector<1x512xbf16> to vector<4x512xbf16>
    %20 = arith.mulf %17, %19 : vector<4x512xbf16>
    %c0_15 = arith.constant 0 : index
    %c0_16 = arith.constant 0 : index
    %21 = vector.load %arg11[%c0_15, %c0_16] : memref<108x512xbf16, #tpu.memory_space<vmem>>, vector<4x512xbf16>
    tpu.vector_store %arg11[%c0_15, %c0_16], %20 {strides = array<i32>} : memref<108x512xbf16, #tpu.memory_space<vmem>>, vector<4x512xbf16>,
    %c0_17 = arith.constant 0 : index
    %c56 = arith.constant 56 : index
    %22 = vector.load %arg10[%c0_17, %c56] : memref<4x768xbf16, #tpu.memory_space<vmem>>, vector<4x512xbf16>
    %c1 = arith.constant 1 : index
    %c0_18 = arith.constant 0 : index
    %23 = vector.load %arg4[%c1, %c0_18] : memref<27x512xbf16, #tpu.memory_space<vmem>>, vector<1x512xbf16>
    %24 = vector.broadcast %23 : vector<1x512xbf16> to vector<4x512xbf16>
    %25 = arith.mulf %22, %24 : vector<4x512xbf16>
    %c4 = arith.constant 4 : index
    %c0_19 = arith.constant 0 : index
    %26 = vector.load %arg11[%c4, %c0_19] : memref<108x512xbf16, #tpu.memory_space<vmem>>, vector<4x512xbf16>
    tpu.vector_store %arg11[%c4, %c0_19], %25 {strides = array<i32>} : memref<108x512xbf16, #tpu.memory_space<vmem>>, vector<4x512xbf16>,
    %c0_20 = arith.constant 0 : index
    %c57 = arith.constant 57 : index
    %27 = vector.load %arg10[%c0_20, %c57] : memref<4x768xbf16, #tpu.memory_space<vmem>>, vector<4x512xbf16>
    %c2 = arith.constant 2 : index
    %c0_21 = arith.constant 0 : index
    %28 = vector.load %arg4[%c2, %c0_21] : memref<27x512xbf16, #tpu.memory_space<vmem>>, vector<1x512xbf16>
    %29 = vector.broadcast %28 : vector<1x512xbf16> to vector<4x512xbf16>
    %30 = arith.mulf %27, %29 : vector<4x512xbf16>
    %c8 = arith.constant 8 : index
    %c0_22 = arith.constant 0 : index
    %31 = vector.load %arg11[%c8, %c0_22] : memref<108x512xbf16, #tpu.memory_space<vmem>>, vector<4x512xbf16>
    tpu.vector_store %arg11[%c8, %c0_22], %30 {strides = array<i32>} : memref<108x512xbf16, #tpu.memory_space<vmem>>, vector<4x512xbf16>,
    %c0_23 = arith.constant 0 : index
    %c63 = arith.constant 63 : index
    %32 = vector.load %arg10[%c0_23, %c63] : memref<4x768xbf16, #tpu.memory_space<vmem>>, vector<4x512xbf16>
    %c3 = arith.constant 3 : index
    %c0_24 = arith.constant 0 : index
    %33 = vector.load %arg4[%c3, %c0_24] : memref<27x512xbf16, #tpu.memory_space<vmem>>, vector<1x512xbf16>
    %34 = vector.broadcast %33 : vector<1x512xbf16> to vector<4x512xbf16>
    %35 = arith.mulf %32, %34 : vector<4x512xbf16>
    %c12 = arith.constant 12 : index
    %c0_25 = arith.constant 0 : index
    %36 = vector.load %arg11[%c12, %c0_25] : memref<108x512xbf16, #tpu.memory_space<vmem>>, vector<4x512xbf16>
    tpu.vector_store %arg11[%c12, %c0_25], %35 {strides = array<i32>} : memref<108x512xbf16, #tpu.memory_space<vmem>>, vector<4x512xbf16>,
    %c0_26 = arith.constant 0 : index
    %c64 = arith.constant 64 : index
    %37 = vector.load %arg10[%c0_26, %c64] : memref<4x768xbf16, #tpu.memory_space<vmem>>, vector<4x512xbf16>
    %c4_27 = arith.constant 4 : index
    %c0_28 = arith.constant 0 : index
    %38 = vector.load %arg4[%c4_27, %c0_28] : memref<27x512xbf16, #tpu.memory_space<vmem>>, vector<1x512xbf16>
    %39 = vector.broadcast %38 : vector<1x512xbf16> to vector<4x512xbf16>
    %40 = arith.mulf %37, %39 : vector<4x512xbf16>
    %c16 = arith.constant 16 : index
    %c0_29 = arith.constant 0 : index
    %41 = vector.load %arg11[%c16, %c0_29] : memref<108x512xbf16, #tpu.memory_space<vmem>>, vector<4x512xbf16>
    tpu.vector_store %arg11[%c16, %c0_29], %40 {strides = array<i32>} : memref<108x512xbf16, #tpu.memory_space<vmem>>, vector<4x512xbf16>,
    %c0_30 = arith.constant 0 : index
    %c65 = arith.constant 65 : index
    %42 = vector.load %arg10[%c0_30, %c65] : memref<4x768xbf16, #tpu.memory_space<vmem>>, vector<4x512xbf16>
    %c5 = arith.constant 5 : index
    %c0_31 = arith.constant 0 : index
    %43 = vector.load %arg4[%c5, %c0_31] : memref<27x512xbf16, #tpu.memory_space<vmem>>, vector<1x512xbf16>
    %44 = vector.broadcast %43 : vector<1x512xbf16> to vector<4x512xbf16>
    %45 = arith.mulf %42, %44 : vector<4x512xbf16>
    %c20 = arith.constant 20 : index
    %c0_32 = arith.constant 0 : index
    %46 = vector.load %arg11[%c20, %c0_32] : memref<108x512xbf16, #tpu.memory_space<vmem>>, vector<4x512xbf16>
    tpu.vector_store %arg11[%c20, %c0_32], %45 {strides = array<i32>} : memref<108x512xbf16, #tpu.memory_space<vmem>>, vector<4x512xbf16>,
    %c0_33 = arith.constant 0 : index
    %c71 = arith.constant 71 : index
    %47 = vector.load %arg10[%c0_33, %c71] : memref<4x768xbf16, #tpu.memory_space<vmem>>, vector<4x512xbf16>
    %c6 = arith.constant 6 : index
    %c0_34 = arith.constant 0 : index
    %48 = vector.load %arg4[%c6, %c0_34] : memref<27x512xbf16, #tpu.memory_space<vmem>>, vector<1x512xbf16>
    %49 = vector.broadcast %48 : vector<1x512xbf16> to vector<4x512xbf16>
    %50 = arith.mulf %47, %49 : vector<4x512xbf16>
    %c24 = arith.constant 24 : index
    %c0_35 = arith.constant 0 : index
    %51 = vector.load %arg11[%c24, %c0_35] : memref<108x512xbf16, #tpu.memory_space<vmem>>, vector<4x512xbf16>
    tpu.vector_store %arg11[%c24, %c0_35], %50 {strides = array<i32>} : memref<108x512xbf16, #tpu.memory_space<vmem>>, vector<4x512xbf16>,
    %c0_36 = arith.constant 0 : index
    %c72 = arith.constant 72 : index
    %52 = vector.load %arg10[%c0_36, %c72] : memref<4x768xbf16, #tpu.memory_space<vmem>>, vector<4x512xbf16>
    %c7 = arith.constant 7 : index
    %c0_37 = arith.constant 0 : index
    %53 = vector.load %arg4[%c7, %c0_37] : memref<27x512xbf16, #tpu.memory_space<vmem>>, vector<1x512xbf16>
    %54 = vector.broadcast %53 : vector<1x512xbf16> to vector<4x512xbf16>
    %55 = arith.mulf %52, %54 : vector<4x512xbf16>
    %c28 = arith.constant 28 : index
    %c0_38 = arith.constant 0 : index
    %56 = vector.load %arg11[%c28, %c0_38] : memref<108x512xbf16, #tpu.memory_space<vmem>>, vector<4x512xbf16>
    tpu.vector_store %arg11[%c28, %c0_38], %55 {strides = array<i32>} : memref<108x512xbf16, #tpu.memory_space<vmem>>, vector<4x512xbf16>,
    %c0_39 = arith.constant 0 : index
    %c73 = arith.constant 73 : index
    %57 = vector.load %arg10[%c0_39, %c73] : memref<4x768xbf16, #tpu.memory_space<vmem>>, vector<4x512xbf16>
    %c8_40 = arith.constant 8 : index
    %c0_41 = arith.constant 0 : index
    %58 = vector.load %arg4[%c8_40, %c0_41] : memref<27x512xbf16, #tpu.memory_space<vmem>>, vector<1x512xbf16>
    %59 = vector.broadcast %58 : vector<1x512xbf16> to vector<4x512xbf16>
    %60 = arith.mulf %57, %59 : vector<4x512xbf16>
    %c32 = arith.constant 32 : index
    %c0_42 = arith.constant 0 : index
    %61 = vector.load %arg11[%c32, %c0_42] : memref<108x512xbf16, #tpu.memory_space<vmem>>, vector<4x512xbf16>
    tpu.vector_store %arg11[%c32, %c0_42], %60 {strides = array<i32>} : memref<108x512xbf16, #tpu.memory_space<vmem>>, vector<4x512xbf16>,
    %c0_43 = arith.constant 0 : index
    %c119 = arith.constant 119 : index
    %62 = vector.load %arg10[%c0_43, %c119] : memref<4x768xbf16, #tpu.memory_space<vmem>>, vector<4x512xbf16>
    %c9 = arith.constant 9 : index
    %c0_44 = arith.constant 0 : index
    %63 = vector.load %arg4[%c9, %c0_44] : memref<27x512xbf16, #tpu.memory_space<vmem>>, vector<1x512xbf16>
    %64 = vector.broadcast %63 : vector<1x512xbf16> to vector<4x512xbf16>
    %65 = arith.mulf %62, %64 : vector<4x512xbf16>
    %c36 = arith.constant 36 : index
    %c0_45 = arith.constant 0 : index
    %66 = vector.load %arg11[%c36, %c0_45] : memref<108x512xbf16, #tpu.memory_space<vmem>>, vector<4x512xbf16>
    tpu.vector_store %arg11[%c36, %c0_45], %65 {strides = array<i32>} : memref<108x512xbf16, #tpu.memory_space<vmem>>, vector<4x512xbf16>,
    %c0_46 = arith.constant 0 : index
    %c120 = arith.constant 120 : index
    %67 = vector.load %arg10[%c0_46, %c120] : memref<4x768xbf16, #tpu.memory_space<vmem>>, vector<4x512xbf16>
    %c10 = arith.constant 10 : index
    %c0_47 = arith.constant 0 : index
    %68 = vector.load %arg4[%c10, %c0_47] : memref<27x512xbf16, #tpu.memory_space<vmem>>, vector<1x512xbf16>
    %69 = vector.broadcast %68 : vector<1x512xbf16> to vector<4x512xbf16>
    %70 = arith.mulf %67, %69 : vector<4x512xbf16>
    %c40 = arith.constant 40 : index
    %c0_48 = arith.constant 0 : index
    %71 = vector.load %arg11[%c40, %c0_48] : memref<108x512xbf16, #tpu.memory_space<vmem>>, vector<4x512xbf16>
    tpu.vector_store %arg11[%c40, %c0_48], %70 {strides = array<i32>} : memref<108x512xbf16, #tpu.memory_space<vmem>>, vector<4x512xbf16>,
    %c0_49 = arith.constant 0 : index
    %c121 = arith.constant 121 : index
    %72 = vector.load %arg10[%c0_49, %c121] : memref<4x768xbf16, #tpu.memory_space<vmem>>, vector<4x512xbf16>
    %c11 = arith.constant 11 : index
    %c0_50 = arith.constant 0 : index
    %73 = vector.load %arg4[%c11, %c0_50] : memref<27x512xbf16, #tpu.memory_space<vmem>>, vector<1x512xbf16>
    %74 = vector.broadcast %73 : vector<1x512xbf16> to vector<4x512xbf16>
    %75 = arith.mulf %72, %74 : vector<4x512xbf16>
    %c44 = arith.constant 44 : index
    %c0_51 = arith.constant 0 : index
    %76 = vector.load %arg11[%c44, %c0_51] : memref<108x512xbf16, #tpu.memory_space<vmem>>, vector<4x512xbf16>
    tpu.vector_store %arg11[%c44, %c0_51], %75 {strides = array<i32>} : memref<108x512xbf16, #tpu.memory_space<vmem>>, vector<4x512xbf16>,
    %c0_52 = arith.constant 0 : index
    %c127 = arith.constant 127 : index
    %77 = vector.load %arg10[%c0_52, %c127] : memref<4x768xbf16, #tpu.memory_space<vmem>>, vector<4x512xbf16>
    %c12_53 = arith.constant 12 : index
    %c0_54 = arith.constant 0 : index
    %78 = vector.load %arg4[%c12_53, %c0_54] : memref<27x512xbf16, #tpu.memory_space<vmem>>, vector<1x512xbf16>
    %79 = vector.broadcast %78 : vector<1x512xbf16> to vector<4x512xbf16>
    %80 = arith.mulf %77, %79 : vector<4x512xbf16>
    %c48 = arith.constant 48 : index
    %c0_55 = arith.constant 0 : index
    %81 = vector.load %arg11[%c48, %c0_55] : memref<108x512xbf16, #tpu.memory_space<vmem>>, vector<4x512xbf16>
    tpu.vector_store %arg11[%c48, %c0_55], %80 {strides = array<i32>} : memref<108x512xbf16, #tpu.memory_space<vmem>>, vector<4x512xbf16>,
    %c0_56 = arith.constant 0 : index
    %c128_57 = arith.constant 128 : index
    %82 = vector.load %arg10[%c0_56, %c128_57] : memref<4x768xbf16, #tpu.memory_space<vmem>>, vector<4x512xbf16>
    %c13 = arith.constant 13 : index
    %c0_58 = arith.constant 0 : index
    %83 = vector.load %arg4[%c13, %c0_58] : memref<27x512xbf16, #tpu.memory_space<vmem>>, vector<1x512xbf16>
    %84 = vector.broadcast %83 : vector<1x512xbf16> to vector<4x512xbf16>
    %85 = arith.mulf %82, %84 : vector<4x512xbf16>
    %c52 = arith.constant 52 : index
    %c0_59 = arith.constant 0 : index
    %86 = vector.load %arg11[%c52, %c0_59] : memref<108x512xbf16, #tpu.memory_space<vmem>>, vector<4x512xbf16>
    tpu.vector_store %arg11[%c52, %c0_59], %85 {strides = array<i32>} : memref<108x512xbf16, #tpu.memory_space<vmem>>, vector<4x512xbf16>,
    %c0_60 = arith.constant 0 : index
    %c129 = arith.constant 129 : index
    %87 = vector.load %arg10[%c0_60, %c129] : memref<4x768xbf16, #tpu.memory_space<vmem>>, vector<4x512xbf16>
    %c14 = arith.constant 14 : index
    %c0_61 = arith.constant 0 : index
    %88 = vector.load %arg4[%c14, %c0_61] : memref<27x512xbf16, #tpu.memory_space<vmem>>, vector<1x512xbf16>
    %89 = vector.broadcast %88 : vector<1x512xbf16> to vector<4x512xbf16>
    %90 = arith.mulf %87, %89 : vector<4x512xbf16>
    %c56_62 = arith.constant 56 : index
    %c0_63 = arith.constant 0 : index
    %91 = vector.load %arg11[%c56_62, %c0_63] : memref<108x512xbf16, #tpu.memory_space<vmem>>, vector<4x512xbf16>
    tpu.vector_store %arg11[%c56_62, %c0_63], %90 {strides = array<i32>} : memref<108x512xbf16, #tpu.memory_space<vmem>>, vector<4x512xbf16>,
    %c0_64 = arith.constant 0 : index
    %c135 = arith.constant 135 : index
    %92 = vector.load %arg10[%c0_64, %c135] : memref<4x768xbf16, #tpu.memory_space<vmem>>, vector<4x512xbf16>
    %c15 = arith.constant 15 : index
    %c0_65 = arith.constant 0 : index
    %93 = vector.load %arg4[%c15, %c0_65] : memref<27x512xbf16, #tpu.memory_space<vmem>>, vector<1x512xbf16>
    %94 = vector.broadcast %93 : vector<1x512xbf16> to vector<4x512xbf16>
    %95 = arith.mulf %92, %94 : vector<4x512xbf16>
    %c60 = arith.constant 60 : index
    %c0_66 = arith.constant 0 : index
    %96 = vector.load %arg11[%c60, %c0_66] : memref<108x512xbf16, #tpu.memory_space<vmem>>, vector<4x512xbf16>
    tpu.vector_store %arg11[%c60, %c0_66], %95 {strides = array<i32>} : memref<108x512xbf16, #tpu.memory_space<vmem>>, vector<4x512xbf16>,
    %c0_67 = arith.constant 0 : index
    %c136 = arith.constant 136 : index
    %97 = vector.load %arg10[%c0_67, %c136] : memref<4x768xbf16, #tpu.memory_space<vmem>>, vector<4x512xbf16>
    %c16_68 = arith.constant 16 : index
    %c0_69 = arith.constant 0 : index
    %98 = vector.load %arg4[%c16_68, %c0_69] : memref<27x512xbf16, #tpu.memory_space<vmem>>, vector<1x512xbf16>
    %99 = vector.broadcast %98 : vector<1x512xbf16> to vector<4x512xbf16>
    %100 = arith.mulf %97, %99 : vector<4x512xbf16>
    %c64_70 = arith.constant 64 : index
    %c0_71 = arith.constant 0 : index
    %101 = vector.load %arg11[%c64_70, %c0_71] : memref<108x512xbf16, #tpu.memory_space<vmem>>, vector<4x512xbf16>
    tpu.vector_store %arg11[%c64_70, %c0_71], %100 {strides = array<i32>} : memref<108x512xbf16, #tpu.memory_space<vmem>>, vector<4x512xbf16>,
    %c0_72 = arith.constant 0 : index
    %c137 = arith.constant 137 : index
    %102 = vector.load %arg10[%c0_72, %c137] : memref<4x768xbf16, #tpu.memory_space<vmem>>, vector<4x512xbf16>
    %c17 = arith.constant 17 : index
    %c0_73 = arith.constant 0 : index
    %103 = vector.load %arg4[%c17, %c0_73] : memref<27x512xbf16, #tpu.memory_space<vmem>>, vector<1x512xbf16>
    %104 = vector.broadcast %103 : vector<1x512xbf16> to vector<4x512xbf16>
    %105 = arith.mulf %102, %104 : vector<4x512xbf16>
    %c68 = arith.constant 68 : index
    %c0_74 = arith.constant 0 : index
    %106 = vector.load %arg11[%c68, %c0_74] : memref<108x512xbf16, #tpu.memory_space<vmem>>, vector<4x512xbf16>
    tpu.vector_store %arg11[%c68, %c0_74], %105 {strides = array<i32>} : memref<108x512xbf16, #tpu.memory_space<vmem>>, vector<4x512xbf16>,
    %c0_75 = arith.constant 0 : index
    %c183 = arith.constant 183 : index
    %107 = vector.load %arg10[%c0_75, %c183] : memref<4x768xbf16, #tpu.memory_space<vmem>>, vector<4x512xbf16>
    %c18 = arith.constant 18 : index
    %c0_76 = arith.constant 0 : index
    %108 = vector.load %arg4[%c18, %c0_76] : memref<27x512xbf16, #tpu.memory_space<vmem>>, vector<1x512xbf16>
    %109 = vector.broadcast %108 : vector<1x512xbf16> to vector<4x512xbf16>
    %110 = arith.mulf %107, %109 : vector<4x512xbf16>
    %c72_77 = arith.constant 72 : index
    %c0_78 = arith.constant 0 : index
    %111 = vector.load %arg11[%c72_77, %c0_78] : memref<108x512xbf16, #tpu.memory_space<vmem>>, vector<4x512xbf16>
    tpu.vector_store %arg11[%c72_77, %c0_78], %110 {strides = array<i32>} : memref<108x512xbf16, #tpu.memory_space<vmem>>, vector<4x512xbf16>,
    %c0_79 = arith.constant 0 : index
    %c184 = arith.constant 184 : index
    %112 = vector.load %arg10[%c0_79, %c184] : memref<4x768xbf16, #tpu.memory_space<vmem>>, vector<4x512xbf16>
    %c19 = arith.constant 19 : index
    %c0_80 = arith.constant 0 : index
    %113 = vector.load %arg4[%c19, %c0_80] : memref<27x512xbf16, #tpu.memory_space<vmem>>, vector<1x512xbf16>
    %114 = vector.broadcast %113 : vector<1x512xbf16> to vector<4x512xbf16>
    %115 = arith.mulf %112, %114 : vector<4x512xbf16>
    %c76 = arith.constant 76 : index
    %c0_81 = arith.constant 0 : index
    %116 = vector.load %arg11[%c76, %c0_81] : memref<108x512xbf16, #tpu.memory_space<vmem>>, vector<4x512xbf16>
    tpu.vector_store %arg11[%c76, %c0_81], %115 {strides = array<i32>} : memref<108x512xbf16, #tpu.memory_space<vmem>>, vector<4x512xbf16>,
    %c0_82 = arith.constant 0 : index
    %c185 = arith.constant 185 : index
    %117 = vector.load %arg10[%c0_82, %c185] : memref<4x768xbf16, #tpu.memory_space<vmem>>, vector<4x512xbf16>
    %c20_83 = arith.constant 20 : index
    %c0_84 = arith.constant 0 : index
    %118 = vector.load %arg4[%c20_83, %c0_84] : memref<27x512xbf16, #tpu.memory_space<vmem>>, vector<1x512xbf16>
    %119 = vector.broadcast %118 : vector<1x512xbf16> to vector<4x512xbf16>
    %120 = arith.mulf %117, %119 : vector<4x512xbf16>
    %c80 = arith.constant 80 : index
    %c0_85 = arith.constant 0 : index
    %121 = vector.load %arg11[%c80, %c0_85] : memref<108x512xbf16, #tpu.memory_space<vmem>>, vector<4x512xbf16>
    tpu.vector_store %arg11[%c80, %c0_85], %120 {strides = array<i32>} : memref<108x512xbf16, #tpu.memory_space<vmem>>, vector<4x512xbf16>,
    %c0_86 = arith.constant 0 : index
    %c191 = arith.constant 191 : index
    %122 = vector.load %arg10[%c0_86, %c191] : memref<4x768xbf16, #tpu.memory_space<vmem>>, vector<4x512xbf16>
    %c21 = arith.constant 21 : index
    %c0_87 = arith.constant 0 : index
    %123 = vector.load %arg4[%c21, %c0_87] : memref<27x512xbf16, #tpu.memory_space<vmem>>, vector<1x512xbf16>
    %124 = vector.broadcast %123 : vector<1x512xbf16> to vector<4x512xbf16>
    %125 = arith.mulf %122, %124 : vector<4x512xbf16>
    %c84 = arith.constant 84 : index
    %c0_88 = arith.constant 0 : index
    %126 = vector.load %arg11[%c84, %c0_88] : memref<108x512xbf16, #tpu.memory_space<vmem>>, vector<4x512xbf16>
    tpu.vector_store %arg11[%c84, %c0_88], %125 {strides = array<i32>} : memref<108x512xbf16, #tpu.memory_space<vmem>>, vector<4x512xbf16>,
    %c0_89 = arith.constant 0 : index
    %c192 = arith.constant 192 : index
    %127 = vector.load %arg10[%c0_89, %c192] : memref<4x768xbf16, #tpu.memory_space<vmem>>, vector<4x512xbf16>
    %c22 = arith.constant 22 : index
    %c0_90 = arith.constant 0 : index
    %128 = vector.load %arg4[%c22, %c0_90] : memref<27x512xbf16, #tpu.memory_space<vmem>>, vector<1x512xbf16>
    %129 = vector.broadcast %128 : vector<1x512xbf16> to vector<4x512xbf16>
    %130 = arith.mulf %127, %129 : vector<4x512xbf16>
    %c88 = arith.constant 88 : index
    %c0_91 = arith.constant 0 : index
    %131 = vector.load %arg11[%c88, %c0_91] : memref<108x512xbf16, #tpu.memory_space<vmem>>, vector<4x512xbf16>
    tpu.vector_store %arg11[%c88, %c0_91], %130 {strides = array<i32>} : memref<108x512xbf16, #tpu.memory_space<vmem>>, vector<4x512xbf16>,
    %c0_92 = arith.constant 0 : index
    %c193 = arith.constant 193 : index
    %132 = vector.load %arg10[%c0_92, %c193] : memref<4x768xbf16, #tpu.memory_space<vmem>>, vector<4x512xbf16>
    %c23 = arith.constant 23 : index
    %c0_93 = arith.constant 0 : index
    %133 = vector.load %arg4[%c23, %c0_93] : memref<27x512xbf16, #tpu.memory_space<vmem>>, vector<1x512xbf16>
    %134 = vector.broadcast %133 : vector<1x512xbf16> to vector<4x512xbf16>
    %135 = arith.mulf %132, %134 : vector<4x512xbf16>
    %c92 = arith.constant 92 : index
    %c0_94 = arith.constant 0 : index
    %136 = vector.load %arg11[%c92, %c0_94] : memref<108x512xbf16, #tpu.memory_space<vmem>>, vector<4x512xbf16>
    tpu.vector_store %arg11[%c92, %c0_94], %135 {strides = array<i32>} : memref<108x512xbf16, #tpu.memory_space<vmem>>, vector<4x512xbf16>,
    %c0_95 = arith.constant 0 : index
    %c199 = arith.constant 199 : index
    %137 = vector.load %arg10[%c0_95, %c199] : memref<4x768xbf16, #tpu.memory_space<vmem>>, vector<4x512xbf16>
    %c24_96 = arith.constant 24 : index
    %c0_97 = arith.constant 0 : index
    %138 = vector.load %arg4[%c24_96, %c0_97] : memref<27x512xbf16, #tpu.memory_space<vmem>>, vector<1x512xbf16>
    %139 = vector.broadcast %138 : vector<1x512xbf16> to vector<4x512xbf16>
    %140 = arith.mulf %137, %139 : vector<4x512xbf16>
    %c96 = arith.constant 96 : index
    %c0_98 = arith.constant 0 : index
    %141 = vector.load %arg11[%c96, %c0_98] : memref<108x512xbf16, #tpu.memory_space<vmem>>, vector<4x512xbf16>
    tpu.vector_store %arg11[%c96, %c0_98], %140 {strides = array<i32>} : memref<108x512xbf16, #tpu.memory_space<vmem>>, vector<4x512xbf16>,
    %c0_99 = arith.constant 0 : index
    %c200 = arith.constant 200 : index
    %142 = vector.load %arg10[%c0_99, %c200] : memref<4x768xbf16, #tpu.memory_space<vmem>>, vector<4x512xbf16>
    %c25 = arith.constant 25 : index
    %c0_100 = arith.constant 0 : index
    %143 = vector.load %arg4[%c25, %c0_100] : memref<27x512xbf16, #tpu.memory_space<vmem>>, vector<1x512xbf16>
    %144 = vector.broadcast %143 : vector<1x512xbf16> to vector<4x512xbf16>
    %145 = arith.mulf %142, %144 : vector<4x512xbf16>
    %c100 = arith.constant 100 : index
    %c0_101 = arith.constant 0 : index
    %146 = vector.load %arg11[%c100, %c0_101] : memref<108x512xbf16, #tpu.memory_space<vmem>>, vector<4x512xbf16>
    tpu.vector_store %arg11[%c100, %c0_101], %145 {strides = array<i32>} : memref<108x512xbf16, #tpu.memory_space<vmem>>, vector<4x512xbf16>,
    %c0_102 = arith.constant 0 : index
    %c201 = arith.constant 201 : index
    %147 = vector.load %arg10[%c0_102, %c201] : memref<4x768xbf16, #tpu.memory_space<vmem>>, vector<4x512xbf16>
    %c26 = arith.constant 26 : index
    %c0_103 = arith.constant 0 : index
    %148 = vector.load %arg4[%c26, %c0_103] : memref<27x512xbf16, #tpu.memory_space<vmem>>, vector<1x512xbf16>
    %149 = vector.broadcast %148 : vector<1x512xbf16> to vector<4x512xbf16>
    %150 = arith.mulf %147, %149 : vector<4x512xbf16>
    %c104 = arith.constant 104 : index
    %c0_104 = arith.constant 0 : index
    %151 = vector.load %arg11[%c104, %c0_104] : memref<108x512xbf16, #tpu.memory_space<vmem>>, vector<4x512xbf16>
    tpu.vector_store %arg11[%c104, %c0_104], %150 {strides = array<i32>} : memref<108x512xbf16, #tpu.memory_space<vmem>>, vector<4x512xbf16>,
    %c0_105 = arith.constant 0 : index
    %c0_106 = arith.constant 0 : index
    %152 = vector.load %arg5[%c0_105, %c0_106] : memref<4x108xbf16, #tpu.memory_space<vmem>>, vector<4x108xbf16>
    %c0_107 = arith.constant 0 : index
    %c0_108 = arith.constant 0 : index
    %153 = vector.load %arg11[%c0_107, %c0_108] : memref<108x512xbf16, #tpu.memory_space<vmem>>, vector<108x512xbf16>
    %cst_109 = arith.constant dense<0.000000e+00> : vector<4x512xf32>
    %154 = tpu.matmul %152, %153, %cst_109 {dimension_numbers = #tpu.dot_dimension_numbers<[1], [0], [0], [1], [0, 0, 1, 1], [], []>} : vector<4x108xbf16>, vector<108x512xbf16>, vector<4x512xf32> -> vector<4x512xf32>
    %c0_110 = arith.constant 0 : index
    %c0_111 = arith.constant 0 : index
    %155 = vector.load %arg6[%c0_110, %c0_111] : memref<4x1xf32, #tpu.memory_space<vmem>>, vector<4x1xf32>
    %156 = vector.broadcast %155 : vector<4x1xf32> to vector<4x512xf32>
    %157 = arith.addf %154, %156 : vector<4x512xf32>
    %cst_112 = arith.constant dense<0.000000e+00> : vector<4xf32>
    %158 = vector.multi_reduction <add>, %157, %cst_112 [1] : vector<4x512xf32> to vector<4xf32>
    %159 = vector.shape_cast %158 : vector<4xf32> to vector<4x1xf32>
    %160 = vector.shape_cast %159 : vector<4x1xf32> to vector<1x4x1xf32>
    %c0_113 = arith.constant 0 : index
    %c0_114 = arith.constant 0 : index
    %c0_115 = arith.constant 0 : index
    %161 = vector.load %arg8[%c0_113, %c0_114, %c0_115] : memref<1x4x1xf32, #tpu.memory_space<vmem>>, vector<1x4x1xf32>
    tpu.vector_store %arg8[%c0_113, %c0_114, %c0_115], %160 {strides = array<i32>} : memref<1x4x1xf32, #tpu.memory_space<vmem>>, vector<1x4x1xf32>,
    %162 = arith.mulf %157, %157 : vector<4x512xf32>
    %cst_116 = arith.constant dense<0.000000e+00> : vector<4xf32>
    %163 = vector.multi_reduction <add>, %162, %cst_116 [1] : vector<4x512xf32> to vector<4xf32>
    %164 = vector.shape_cast %163 : vector<4xf32> to vector<4x1xf32>
    %165 = vector.shape_cast %164 : vector<4x1xf32> to vector<1x4x1xf32>
    %c0_117 = arith.constant 0 : index
    %c0_118 = arith.constant 0 : index
    %c0_119 = arith.constant 0 : index
    %166 = vector.load %arg9[%c0_117, %c0_118, %c0_119] : memref<1x4x1xf32, #tpu.memory_space<vmem>>, vector<1x4x1xf32>
    tpu.vector_store %arg9[%c0_117, %c0_118, %c0_119], %165 {strides = array<i32>} : memref<1x4x1xf32, #tpu.memory_space<vmem>>, vector<1x4x1xf32>,
    %167 = vector.shape_cast %157 : vector<4x512xf32> to vector<1x4x512xf32>
    %c0_120 = arith.constant 0 : index
    %c0_121 = arith.constant 0 : index
    %c0_122 = arith.constant 0 : index
    %168 = vector.load %arg7[%c0_120, %c0_121, %c0_122] : memref<1x4x512xf32, #tpu.memory_space<vmem>>, vector<1x4x512xf32>
    tpu.vector_store %arg7[%c0_120, %c0_121, %c0_122], %167 {strides = array<i32>} : memref<1x4x512xf32, #tpu.memory_space<vmem>>, vector<1x4x512xf32>,
    return
  }
  func.func @transform_0(%arg0: i32) -> (i32, i32, i32) {
    %c0_i32 = arith.constant 0 : i32
    %c0_i32_0 = arith.constant 0 : i32
    %c0_i32_1 = arith.constant 0 : i32
    return %arg0, %c0_i32, %c0_i32_0 : i32, i32, i32
  }
  func.func @transform_1(%arg0: i32) -> (i32, i32) {
    %c0_i32 = arith.constant 0 : i32
    %c0_i32_0 = arith.constant 0 : i32
    %c0_i32_1 = arith.constant 0 : i32
    return %c0_i32, %c0_i32_0 : i32, i32
  }
  func.func @transform_2(%arg0: i32) -> (i32, i32) {
    %c0_i32 = arith.constant 0 : i32
    %c0_i32_0 = arith.constant 0 : i32
    %c0_i32_1 = arith.constant 0 : i32
    return %c0_i32, %c0_i32_0 : i32, i32
  }
  func.func @transform_3(%arg0: i32) -> (i32, i32) {
    %c0_i32 = arith.constant 0 : i32
    %c0_i32_0 = arith.constant 0 : i32
    %c0_i32_1 = arith.constant 0 : i32
    return %c0_i32, %c0_i32_0 : i32, i32
  }
  func.func @transform_4(%arg0: i32) -> (i32, i32) {
    %c0_i32 = arith.constant 0 : i32
    %c0_i32_0 = arith.constant 0 : i32
    %c0_i32_1 = arith.constant 0 : i32
    return %c0_i32, %c0_i32_0 : i32, i32
  }
  func.func @transform_5(%arg0: i32) -> (i32, i32) {
    %c0_i32 = arith.constant 0 : i32
    %c0_i32_0 = arith.constant 0 : i32
    %c0_i32_1 = arith.constant 0 : i32
    return %c0_i32, %c0_i32_0 : i32, i32
  }
  func.func @transform_6(%arg0: i32) -> (i32, i32, i32) {
    %c0_i32 = arith.constant 0 : i32
    %c0_i32_0 = arith.constant 0 : i32
    %c0_i32_1 = arith.constant 0 : i32
    return %arg0, %c0_i32, %c0_i32_0 : i32, i32, i32
  }
  func.func @transform_7(%arg0: i32) -> (i32, i32, i32) {
    %c0_i32 = arith.constant 0 : i32
    %c0_i32_0 = arith.constant 0 : i32
    %c0_i32_1 = arith.constant 0 : i32
    return %arg0, %c0_i32, %c0_i32_0 : i32, i32, i32
  }
  func.func @transform_8(%arg0: i32) -> (i32, i32, i32) {
    %c0_i32 = arith.constant 0 : i32
    %c0_i32_0 = arith.constant 0 : i32
    %c0_i32_1 = arith.constant 0 : i32
    return %arg0, %c0_i32, %c0_i32_0 : i32, i32, i32
  }
}

module attributes {stable_mosaic.version = 11 : i64} {
  func.func @_bn_relu_kernel(%arg0: i32, %arg1: memref<1x4x512xf32, #tpu.memory_space<vmem>>, %arg2: memref<4x1xf32, #tpu.memory_space<vmem>>, %arg3: memref<4x1xf32, #tpu.memory_space<vmem>>, %arg4: memref<1x4x512xf32, #tpu.memory_space<vmem>>) attributes {dimension_semantics = [#tpu.dimension_semantics<parallel>], iteration_bounds = array<i64: 2>, scalar_prefetch = 0 : i64, scratch_operands = 0 : i64, tpu.core_type = #tpu.core_type<tc>, window_params = [{transform_indices = @transform_0, window_bounds = array<i64: 1, 4, 512>}, {pipeline_mode = #tpu.pipeline_mode<synchronous>, transform_indices = @transform_1, window_bounds = array<i64: 4, 1>}, {pipeline_mode = #tpu.pipeline_mode<synchronous>, transform_indices = @transform_2, window_bounds = array<i64: 4, 1>}, {transform_indices = @transform_3, window_bounds = array<i64: 1, 4, 512>}]} {
    %c0 = arith.constant 0 : index
    %c0_0 = arith.constant 0 : index
    %c0_1 = arith.constant 0 : index
    %0 = vector.load %arg1[%c0, %c0_0, %c0_1] : memref<1x4x512xf32, #tpu.memory_space<vmem>>, vector<1x4x512xf32>
    %1 = vector.shape_cast %0 : vector<1x4x512xf32> to vector<4x512xf32>
    %c0_2 = arith.constant 0 : index
    %c0_3 = arith.constant 0 : index
    %2 = vector.load %arg2[%c0_2, %c0_3] : memref<4x1xf32, #tpu.memory_space<vmem>>, vector<4x1xf32>
    %3 = vector.broadcast %2 : vector<4x1xf32> to vector<4x512xf32>
    %4 = arith.mulf %1, %3 : vector<4x512xf32>
    %c0_4 = arith.constant 0 : index
    %c0_5 = arith.constant 0 : index
    %5 = vector.load %arg3[%c0_4, %c0_5] : memref<4x1xf32, #tpu.memory_space<vmem>>, vector<4x1xf32>
    %6 = vector.broadcast %5 : vector<4x1xf32> to vector<4x512xf32>
    %7 = arith.addf %4, %6 : vector<4x512xf32>
    %cst = arith.constant 0.000000e+00 : f32
    %8 = vector.broadcast %cst : f32 to vector<4x512xf32>
    %9 = arith.maximumf %7, %8 : vector<4x512xf32>
    %10 = vector.shape_cast %9 : vector<4x512xf32> to vector<1x4x512xf32>
    %c0_6 = arith.constant 0 : index
    %c0_7 = arith.constant 0 : index
    %c0_8 = arith.constant 0 : index
    %11 = vector.load %arg4[%c0_6, %c0_7, %c0_8] : memref<1x4x512xf32, #tpu.memory_space<vmem>>, vector<1x4x512xf32>
    tpu.vector_store %arg4[%c0_6, %c0_7, %c0_8], %10 {strides = array<i32>} : memref<1x4x512xf32, #tpu.memory_space<vmem>>, vector<1x4x512xf32>,
    return
  }
  func.func @transform_0(%arg0: i32) -> (i32, i32, i32) {
    %c0_i32 = arith.constant 0 : i32
    %c0_i32_0 = arith.constant 0 : i32
    %c0_i32_1 = arith.constant 0 : i32
    return %arg0, %c0_i32, %c0_i32_0 : i32, i32, i32
  }
  func.func @transform_1(%arg0: i32) -> (i32, i32) {
    %c0_i32 = arith.constant 0 : i32
    %c0_i32_0 = arith.constant 0 : i32
    %c0_i32_1 = arith.constant 0 : i32
    return %c0_i32, %c0_i32_0 : i32, i32
  }
  func.func @transform_2(%arg0: i32) -> (i32, i32) {
    %c0_i32 = arith.constant 0 : i32
    %c0_i32_0 = arith.constant 0 : i32
    %c0_i32_1 = arith.constant 0 : i32
    return %c0_i32, %c0_i32_0 : i32, i32
  }
  func.func @transform_3(%arg0: i32) -> (i32, i32, i32) {
    %c0_i32 = arith.constant 0 : i32
    %c0_i32_0 = arith.constant 0 : i32
    %c0_i32_1 = arith.constant 0 : i32
    return %arg0, %c0_i32, %c0_i32_0 : i32, i32, i32
  }
}

</mosaic_0001>

<bundles_post_ra>
// kernel: up_forward.5
= control target key start
LH: loop header
LB: loop body
LE: loop exit
PB: predicated region body
PF: predicated region fallthrough
CT: control target
= control target key end

     0   :  { %s316_s12 = smov 0   ;;  %s339_s0 = inlined_call_operand.vmem [shape: f32[2,4,512], index: 0, kind: input, shape index: {}, may-alias: {0,3}]   ;;  %s340_s1 = inlined_call_operand.vmem [shape: f32[4,1], index: 1, kind: input, shape index: {}]   ;;  %s341_s2 = inlined_call_operand.vmem [shape: f32[4,1], index: 2, kind: input, shape index: {}]   ;;  %s342_s3 = inlined_call_operand.vmem [shape: f32[2,4,512], index: 3, kind: output, shape index: {}, may-alias: {0,3}]  }
   0x1 LB: > { %s262_s13 = sadd.s32 4294967295, %s292_s12   ;;  %p266_p0 = scmp.ge.s32.totalorder %s292_s12, 1  ;;  %s292_s12 = sphi %s316_s12, %s13_s12  }
   0x2   : > { %p137_p1 = scmp.lt.s32.totalorder %s292_s12, 3 }
   0x4   : > { %p138_p2 = pnand %p266_p0, %p137_p1 }
   0x5   : > { %v173_v0 = vld [vmem:[%s340_s1] sm:$0xf] (!%p138_p2)  ;;  %v294_v1 = vmov (!%p138_p2), 0   ;;  %p161_p3 = scmp.lt.s32.totalorder (!%p138_p2), %s262_s13, 1  ;;  %v295_v3 = vmov (!%p138_p2), 839922192   ;;  %v181_v5 = vlaneseq (!%p138_p2) }
   0x6   : > { %141 = sbr.rel (%p138_p2) target bundleno = 146 (0x92), region = 32  ;;  %285 = vset.pattern.permute.xlu0 (!%p138_p2), %v294_v1  ;;  %v188_v2 = vld [vmem:[%s341_s2] sm:$0xf] (!%p138_p2)  ;;  %v179_v4 = vunpack.c.l.s4 (!%p138_p2), %v295_v3 }
   0x7   : > { %176 = vperm.xlu0 (!%p138_p2), %285, %v173_v0   ;;  %v182_v7 = vshrl.u32 (!%p138_p2), %v181_v5, 7 }
   0x8   : > { %v180_v6 = vunpack.c.0.s8 (!%p138_p2), %v179_v4 }
   0xa   : > { %v183_v8 = vsub.s32 (!%p138_p2), %v180_v6, %v182_v7 }
   0xb   : > { %191 = vperm.xlu0 (!%p138_p2), %285, %v188_v2  }
   0xd   : > { %s344_s13 = smov (!%p161_p3, %s262_s13), 1 }
   0xe   : > { %s273_s18 = sshll.u32 %s344_s13, 4 }
   0xf   : > { %s165_s21 = scalar_lea.vmem %s339_s0, %s273_s18  ;;  %s170_s24 = scalar_lea.vmem %s342_s3, %s273_s18 }
  0x10   : > { %v171_v11 = vld [vmem:[%s165_s21] sm:$0xff]  ;;  %v172_v12 = vld [vmem:[%s165_s21 + $0x8] sm:$0xff] }
  0x86   : > { %v177_v9 = vpop.permute.xlu0 %176 }
  0x87   : > { %v184_v10 = vrot.slane %v177_v9, %v183_v8 }
  0x89   : > { %v186_v14 = vmul.f32 %v184_v10, %v171_v11  ;;  %v187_v15 = vmul.f32 %v184_v10, %v172_v12 }
  0x8a   : > { %v192_v13 = vpop.permute.xlu0 %191 }
  0x8b   : > { %v199_v16 = vrot.slane %v192_v13, %v183_v8 }
  0x8d   : > { %v201_v17 = vadd.f32 %v199_v16, %v186_v14  ;;  %v202_v18 = vadd.f32 %v199_v16, %v187_v15 }
  0x8f   : > { %v203_v19 = vmax.f32 %v201_v17, 0.0  ;;  %v204_v20 = vmax.f32 %v202_v18, 0.0 }
  0x91   : > { %205 = vst [vmem:[%s170_s24] sm:$0xff] %v203_v19  ;;  %206 = vst [vmem:[%s170_s24 + $0x8] sm:$0xff] %v204_v20 }
  0x92 PF: > { %s13_s12 = sadd.s32 1, %s292_s12  }
  0x93   : > { %p10_p4 = scmp.ge.s32.totalorder %s13_s12, 4  }
  0x95   :  { %12 = sbr.rel (!%p10_p4) target bundleno = 1 (0x1), region = 62 }

// kernel: up_forward.4
= control target key start
LH: loop header
LB: loop body
LE: loop exit
PB: predicated region body
PF: predicated region fallthrough
CT: control target
= control target key end

     0   :  { %s4310_s27 = smov 0   ;;  %s5417_s0 = inlined_call_operand.vmem [shape: bf16[2,4,512], index: 0, kind: input, shape index: {}]   ;;  %s5418_s1 = inlined_call_operand.vmem [shape: f32[4,1], index: 1, kind: input, shape index: {}]   ;;  %s5419_s2 = inlined_call_operand.vmem [shape: f32[4,1], index: 2, kind: input, shape index: {}]   ;;  %s5420_s3 = inlined_call_operand.vmem [shape: bf16[27,512], index: 3, kind: input, shape index: {}]   ;;  %s5421_s4 = inlined_call_operand.vmem [shape: bf16[4,108], index: 4, kind: input, shape index: {}]   ;;  %s5422_s5 = inlined_call_operand.vmem [shape: f32[4,1], index: 5, kind: input, shape index: {}]   ;;  %s5423_s6 = inlined_call_operand.vmem [shape: f32[2,4,512], index: 6, kind: output, shape index: {0}]   ;;  %s5424_s7 = inlined_call_operand.vmem [shape: f32[2,4,1], index: 7, kind: output, shape index: {1}]   ;;  %s5425_s8 = inlined_call_operand.vmem [shape: f32[2,4,1], index: 8, kind: output, shape index: {2}]  }
   0x1 LB: > { %s3899_s28 = sadd.s32 4294967295, %s4243_s27   ;;  %p3903_p0 = scmp.ge.s32.totalorder %s4243_s27, 1  ;;  %s4243_s27 = sphi %s4310_s27, %s19_s27  }
   0x2   : > { %p267_p1 = scmp.lt.s32.totalorder %s4243_s27, 3 }
   0x4   : > { %p268_p2 = pnand %p3903_p0, %p267_p1 }
   0x5   : > { %v333_v0 = vld [vmem:[%s5418_s1] sm:$0xf] (!%p268_p2)  ;;  %v341_v1 = vlaneseq (!%p268_p2)  ;;  %v4245_v2 = vmov (!%p268_p2), 0   ;;  %v401_v4 = vld [vmem:[%s5420_s3 + $0x8] sm:$0x11] (!%p268_p2)  ;;  %s4247_s29 = smov (!%p268_p2), 55  }
   0x6   : > { %271 = sbr.rel (%p268_p2) target bundleno = 862 (0x35e), region = 44  ;;  %4086 = vset.pattern.permute.xlu0 (!%p268_p2), %v4245_v2  ;;  %328 = vst [vmem:[#allocation2] sm:$0x3] (!%p268_p2), %v4245_v2  ;;  %329 = vst [vmem:[#allocation2 + $0xa] sm:$0x3] (!%p268_p2), %v4245_v2  ;;  %3696 = vmatprep.mubr.bf16.mxu0 (!%p268_p2), %v4245_v2  ;;  %v3914_v13 = vcombine.low (!%p268_p2), %v401_v4, %v401_v4  ;;  %v3915_v14 = vcombine.high (!%p268_p2), %v401_v4, %v401_v4  ;;  %s4248_s14 = smov (!%p268_p2), 56  }
   0x7   : > { %v400_v3 = vld [vmem:[%s5420_s3] sm:$0x11] (!%p268_p2)  ;;  %336 = vperm.xlu0 (!%p268_p2), %4086, %v333_v0   ;;  %v4327_v5 = vshrl.u32 (!%p268_p2), %v341_v1, 7  ;;  %v4246_v6 = vmov (!%p268_p2), 1983009808   ;;  %3737 = vmatprep.mubr.bf16.mxu1 (!%p268_p2), %v4245_v2  ;;  %s4249_s17 = smov (!%p268_p2), 63  }
   0x8   : > { %v382_v7 = vunpack.c.l.s4 (!%p268_p2), %v4246_v6  ;;  %v3912_v8 = vcombine.low (!%p268_p2), %v400_v3, %v400_v3  ;;  %v3913_v9 = vcombine.high (!%p268_p2), %v400_v3, %v400_v3  ;;  %v515_v10 = vld [vmem:[%s5420_s3] sm:$0x11] (!%p268_p2)  ;;  %v516_v11 = vld [vmem:[%s5420_s3 + $0x8] sm:$0x11] (!%p268_p2)  ;;  %v427_v21 = vpack.i.b16 (!%p268_p2), %v3914_v13, %v3914_v13  ;;  %v748_v29 = vld [vmem:[%s5420_s3] sm:$0x22] (!%p268_p2) }
   0x9   : > { %v348_v12 = vld [vmem:[%s5419_s2] sm:$0xf] (!%p268_p2)  ;;  %v3916_v15 = vcombine.low (!%p268_p2), %v515_v10, %v515_v10  ;;  %v3917_v16 = vcombine.high (!%p268_p2), %v515_v10, %v515_v10  ;;  %v4339_v19 = vsub.s32 (!%p268_p2), 0, %v4327_v5  ;;  %v434_v22 = vpack.i.b16 (!%p268_p2), %v3915_v14, %v3915_v14  ;;  %v749_v38 = vld [vmem:[%s5420_s3 + $0x8] sm:$0x22] (!%p268_p2)  ;;  %s4250_s22 = smov (!%p268_p2), 57  }
   0xa   : > { %v383_v17 = vunpack.c.0.s8 (!%p268_p2), %v382_v7  ;;  %v413_v18 = vpack.i.b16 (!%p268_p2), %v3912_v8, %v3912_v8  ;;  %v420_v20 = vpack.i.b16 (!%p268_p2), %v3913_v9, %v3913_v9  ;;  %v3918_v23 = vcombine.low (!%p268_p2), %v516_v11, %v516_v11  ;;  %v634_v47 = vld [vmem:[%s5420_s3] sm:$0x22] (!%p268_p2)  ;;  %v635_v56 = vld [vmem:[%s5420_s3 + $0x8] sm:$0x22] (!%p268_p2)  ;;  %v980_v14 = vld [vmem:[%s5420_s3] sm:$0x44] (!%p268_p2) }
   0xb   : > { %v3919_v24 = vcombine.high (!%p268_p2), %v516_v11, %v516_v11  ;;  %351 = vperm.xlu0 (!%p268_p2), %4086, %v348_v12   ;;  %v528_v28 = vshrl.u32 (!%p268_p2), %v3916_v15, 16  ;;  %v432_v30 = vrot.slane (!%p268_p2), %v427_v21, %v4339_v19  ;;  %v439_v31 = vrot.slane (!%p268_p2), %v434_v22, %v4339_v19  ;;  %s4251_s10 = smov (!%p268_p2), 65   ;;  %s4252_s13 = smov (!%p268_p2), 64  }
   0xc   : > { %v4342_v25 = vsub.s32 (!%p268_p2), %v383_v17, %v4327_v5  ;;  %v418_v26 = vrot.slane (!%p268_p2), %v413_v18, %v4339_v19  ;;  %v425_v27 = vrot.slane (!%p268_p2), %v420_v20, %v4339_v19  ;;  %v536_v32 = vshrl.u32 (!%p268_p2), %v3917_v16, 16  ;;  %v981_v20 = vld [vmem:[%s5420_s3 + $0x8] sm:$0x44] (!%p268_p2)  ;;  %s4253_s20 = smov (!%p268_p2), 72   ;;  %s4254_s26 = smov (!%p268_p2), 71  }
   0xd   : > { %v544_v33 = vshrl.u32 %v3918_v23, 16  ;;  %v529_v35 = vpack.i.b16 %v528_v28, %v528_v28  ;;  %v552_v36 = vshrl.u32 %v3919_v24, 16  ;;  %v4352_v37 = vsub.s32 1, %v4327_v5  ;;  %s5426_s18 = smov 119   ;;  %s4256_s23 = smov 73  }
   0xe   : > { %v444_v34 = vcombine.low %v418_v26, %v425_v27  ;;  %v445_v39 = vcombine.low %v432_v30, %v439_v31  ;;  %v537_v40 = vpack.i.b16 %v536_v32, %v536_v32  ;;  %v3924_v42 = vcombine.low %v748_v29, %v748_v29  ;;  %v867_v26 = vld [vmem:[%s5420_s3] sm:$0x44]  ;;  %s4257_s15 = smov 121   ;;  %s4258_s21 = smov 120  }
   0xf   : > { %v545_v41 = vpack.i.b16 %v544_v33, %v544_v33  ;;  %v534_v44 = vrot.slane %v529_v35, %v4339_v19  ;;  %v553_v45 = vpack.i.b16 %v552_v36, %v552_v36  ;;  %v3925_v46 = vcombine.high %v748_v29, %v748_v29  ;;  %s5428_s16 = smov 1   ;;  %s4260_s25 = smov 127  }
  0x10   : > { %v452_v43 = vrot.slane %v444_v34, %v4342_v25  ;;  %v459_v48 = vrot.slane %v445_v39, %v4342_v25  ;;  %v542_v49 = vrot.slane %v537_v40, %v4339_v19  ;;  %v3926_v51 = vcombine.low %v749_v38, %v749_v38  ;;  %v868_v39 = vld [vmem:[%s5420_s3 + $0x8] sm:$0x44]  ;;  %s4261_s19 = smov 8   ;;  %s4262_s30 = smov 7  }
  0x11   : > { %v550_v50 = vrot.slane %v545_v41, %v4339_v19  ;;  %v558_v52 = vrot.slane %v553_v45, %v4339_v19  ;;  %v3927_v53 = vcombine.high %v749_v38, %v749_v38  ;;  %v761_v54 = vshrl.u32 %v3924_v42, 16  ;;  %s4263_s12 = smov 9   ;;  %p4651_p3 = scmp.lt.s32.totalorder %s3899_s28, 1 }
  0x12   : > { %v769_v55 = vshrl.u32 %v3925_v46, 16  ;;  %v460_v57 = vcombine.low %v452_v43, %v459_v48  ;;  %v563_v58 = vcombine.low %v534_v44, %v542_v49  ;;  %v777_v59 = vshrl.u32 %v3926_v51, 16  ;;  %s5434_s11 = smov 119  }
  0x13   : > { %v3920_v60 = vcombine.low %v634_v47, %v634_v47  ;;  %v564_v61 = vcombine.low %v550_v50, %v558_v52  ;;  %v762_v62 = vpack.i.b16 %v761_v54, %v761_v54  ;;  %v785_v0 = vshrl.u32 %v3927_v53, 16  ;;  %s5440_s28 = smov (!%p4651_p3, %s3899_s28), 1 }
  0x14   : > { %v770_v63 = vpack.i.b16 %v769_v55, %v769_v55  ;;  %461 = vrot.lane.b32.xlu1 %v460_v57, %s4247_s29  ;;  %v571_v1 = vrot.slane %v563_v58, %v4342_v25  ;;  %v778_v2 = vpack.i.b16 %v777_v59, %v777_v59  ;;  %v3921_v3 = vcombine.high %v634_v47, %v634_v47  ;;  %v1209_v57 = vld [vmem:[%s5420_s3] sm:$0x88] }
  0x15   : > { %v3922_v4 = vcombine.low %v635_v56, %v635_v56  ;;  %v578_v6 = vrot.slane %v564_v61, %v4342_v25  ;;  %v767_v7 = vrot.slane %v762_v62, %v4352_v37  ;;  %v786_v9 = vpack.i.b16 %v785_v0, %v785_v0 }
  0x16   : > { %v775_v8 = vrot.slane %v770_v63, %v4352_v37  ;;  %v783_v10 = vrot.slane %v778_v2, %v4352_v37  ;;  %v3923_v11 = vcombine.high %v635_v56, %v635_v56  ;;  %v647_v12 = vpack.i.b16 %v3920_v60, %v3920_v60  ;;  %v1210_v2 = vld [vmem:[%s5420_s3 + $0x8] sm:$0x88] }
  0x17   : > { %v654_v13 = vpack.i.b16 %v3921_v3, %v3921_v3  ;;  %v579_v15 = vcombine.low %v571_v1, %v578_v6  ;;  %v791_v16 = vrot.slane %v786_v9, %v4352_v37  ;;  %v661_v18 = vpack.i.b16 %v3922_v4, %v3922_v4 }
  0x18   : > { %v796_v17 = vcombine.low %v767_v7, %v775_v8  ;;  %v652_v21 = vrot.slane %v647_v12, %v4352_v37  ;;  %v668_v23 = vpack.i.b16 %v3923_v11, %v3923_v11  ;;  %v4385_v24 = vsub.s32 2, %v4327_v5  ;;  %v1097_v12 = vld [vmem:[%s5420_s3] sm:$0x88] }
  0x19   : > { %v659_v22 = vrot.slane %v654_v13, %v4352_v37  ;;  %580 = vrot.lane.b32.xlu1 %v579_v15, %s4248_s14  ;;  %v797_v27 = vcombine.low %v783_v10, %v791_v16  ;;  %v666_v29 = vrot.slane %v661_v18, %v4352_v37  ;;  %v3932_v30 = vcombine.low %v980_v14, %v980_v14 }
  0x1a   : > { %v804_v28 = vrot.slane %v796_v17, %v4342_v25  ;;  %v673_v31 = vrot.slane %v668_v23, %v4352_v37  ;;  %v3933_v33 = vcombine.high %v980_v14, %v980_v14  ;;  %v3934_v34 = vcombine.low %v981_v20, %v981_v20 }
  0x1b   : > { %v678_v32 = vcombine.low %v652_v21, %v659_v22  ;;  %v811_v35 = vrot.slane %v797_v27, %v4342_v25  ;;  %v3935_v36 = vcombine.high %v981_v20, %v981_v20  ;;  %v993_v38 = vshrl.u32 %v3932_v30, 16  ;;  %v1098_v22 = vld [vmem:[%s5420_s3 + $0x8] sm:$0x88] }
  0x1c   : > { %v3928_v40 = vcombine.low %v867_v26, %v867_v26  ;;  %v679_v41 = vcombine.low %v666_v29, %v673_v31  ;;  %v1001_v43 = vshrl.u32 %v3933_v33, 16  ;;  %v1009_v44 = vshrl.u32 %v3934_v34, 16 }
  0x1d   : > { %v686_v42 = vrot.slane %v678_v32, %v4342_v25  ;;  %v812_v45 = vcombine.low %v804_v28, %v811_v35  ;;  %v994_v46 = vpack.i.b16 %v993_v38, %v993_v38  ;;  %v1017_v47 = vshrl.u32 %v3935_v36, 16  ;;  %v1438_v38 = vld [vmem:[%s5420_s3 + $0x10] sm:$0x11] }
  0x1e   : > { %v3929_v48 = vcombine.high %v867_v26, %v867_v26  ;;  %v693_v49 = vrot.slane %v679_v41, %v4342_v25  ;;  %v1002_v50 = vpack.i.b16 %v1001_v43, %v1001_v43  ;;  %v1010_v51 = vpack.i.b16 %v1009_v44, %v1009_v44 }
  0x1f   : > { %v3930_v52 = vcombine.low %v868_v39, %v868_v39  ;;  %813 = vrot.lane.b32.xlu1 %v812_v45, %s4249_s17  ;;  %v999_v53 = vrot.slane %v994_v46, %v4385_v24  ;;  %v1018_v54 = vpack.i.b16 %v1017_v47, %v1017_v47  ;;  %v3931_v55 = vcombine.high %v868_v39, %v868_v39  ;;  %v1439_v47 = vld [vmem:[%s5420_s3 + $0x18] sm:$0x11] }
  0x20   : > { %v880_v56 = vpack.i.b16 %v3928_v40, %v3928_v40  ;;  %v694_v58 = vcombine.low %v686_v42, %v693_v49  ;;  %v1007_v59 = vrot.slane %v1002_v50, %v4385_v24  ;;  %v1015_v60 = vrot.slane %v1010_v51, %v4385_v24 }
  0x21   : > { %v887_v61 = vpack.i.b16 %v3929_v48, %v3929_v48  ;;  %v1023_v62 = vrot.slane %v1018_v54, %v4385_v24  ;;  %v894_v0 = vpack.i.b16 %v3930_v52, %v3930_v52  ;;  %v901_v1 = vpack.i.b16 %v3931_v55, %v3931_v55 }
  0x22   : > { %v885_v63 = vrot.slane %v880_v56, %v4385_v24  ;;  %695 = vrot.lane.b32.xlu0 %v694_v58, %s4250_s22  ;;  %v1028_v3 = vcombine.low %v999_v53, %v1007_v59  ;;  %v4415_v6 = vsub.s32 3, %v4327_v5  ;;  %v3940_v7 = vcombine.low %v1209_v57, %v1209_v57  ;;  %v1326_v56 = vld [vmem:[%s5420_s3 + $0x10] sm:$0x11] }
  0x23   : > { %v892_v4 = vrot.slane %v887_v61, %v4385_v24  ;;  %v1029_v8 = vcombine.low %v1015_v60, %v1023_v62  ;;  %v899_v9 = vrot.slane %v894_v0, %v4385_v24  ;;  %v906_v10 = vrot.slane %v901_v1, %v4385_v24 }
  0x24   : > { %v3941_v11 = vcombine.high %v1209_v57, %v1209_v57  ;;  %v1036_v13 = vrot.slane %v1028_v3, %v4342_v25  ;;  %v3942_v15 = vcombine.low %v1210_v2, %v1210_v2  ;;  %v3943_v16 = vcombine.high %v1210_v2, %v1210_v2 }
  0x25   : > { %v911_v14 = vcombine.low %v885_v63, %v892_v4  ;;  %v1043_v17 = vrot.slane %v1029_v8, %v4342_v25  ;;  %v912_v18 = vcombine.low %v899_v9, %v906_v10  ;;  %v1222_v20 = vshrl.u32 %v3940_v7, 16  ;;  %v1327_v4 = vld [vmem:[%s5420_s3 + $0x18] sm:$0x11] }
  0x26   : > { %v1230_v21 = vshrl.u32 %v3941_v11, 16  ;;  %v1238_v26 = vshrl.u32 %v3942_v15, 16  ;;  %v1246_v27 = vshrl.u32 %v3943_v16, 16  ;;  %v3936_v28 = vcombine.low %v1097_v12, %v1097_v12 }
  0x27   : > { %v919_v23 = vrot.slane %v911_v14, %v4342_v25  ;;  %v1044_v29 = vcombine.low %v1036_v13, %v1043_v17  ;;  %v926_v30 = vrot.slane %v912_v18, %v4342_v25  ;;  %v1223_v31 = vpack.i.b16 %v1222_v20, %v1222_v20 }
  0x28   : > { %v1231_v32 = vpack.i.b16 %v1230_v21, %v1230_v21  ;;  %v1239_v33 = vpack.i.b16 %v1238_v26, %v1238_v26  ;;  %v1247_v34 = vpack.i.b16 %v1246_v27, %v1246_v27  ;;  %v3937_v35 = vcombine.high %v1097_v12, %v1097_v12  ;;  %v1671_v21 = vld [vmem:[%s5420_s3 + $0x10] sm:$0x22] }
  0x29   : > { %v3938_v36 = vcombine.low %v1098_v22, %v1098_v22  ;;  %1045 = vrot.lane.b32.xlu1 %v1044_v29, %s4251_s10  ;;  %v927_v39 = vcombine.low %v919_v23, %v926_v30  ;;  %v1228_v40 = vrot.slane %v1223_v31, %v4415_v6  ;;  %v3939_v42 = vcombine.high %v1098_v22, %v1098_v22 }
  0x2a   : > { %v1236_v41 = vrot.slane %v1231_v32, %v4415_v6  ;;  %v1244_v43 = vrot.slane %v1239_v33, %v4415_v6  ;;  %v1252_v44 = vrot.slane %v1247_v34, %v4415_v6  ;;  %v1110_v45 = vpack.i.b16 %v3936_v28, %v3936_v28  ;;  %v1672_v32 = vld [vmem:[%s5420_s3 + $0x18] sm:$0x22] }
  0x2b   : > { %v1117_v46 = vpack.i.b16 %v3937_v35, %v3937_v35  ;;  %928 = vrot.lane.b32.xlu0 %v927_v39, %s4252_s13  ;;  %v1124_v49 = vpack.i.b16 %v3938_v36, %v3938_v36  ;;  %v1131_v50 = vpack.i.b16 %v3939_v42, %v3939_v42  ;;  %v3948_v51 = vcombine.low %v1438_v38, %v1438_v38  ;;  %v1557_v42 = vld [vmem:[%s5420_s3 + $0x10] sm:$0x22] }
  0x2c   : > { %v1257_v48 = vcombine.low %v1228_v40, %v1236_v41  ;;  %v1258_v52 = vcombine.low %v1244_v43, %v1252_v44  ;;  %v1115_v53 = vrot.slane %v1110_v45, %v4415_v6  ;;  %v3949_v55 = vcombine.high %v1438_v38, %v1438_v38 }
  0x2d   : > { %v1122_v54 = vrot.slane %v1117_v46, %v4415_v6  ;;  %v1129_v58 = vrot.slane %v1124_v49, %v4415_v6  ;;  %v1136_v59 = vrot.slane %v1131_v50, %v4415_v6  ;;  %v3950_v60 = vcombine.low %v1439_v47, %v1439_v47 }
  0x2e   : > { %v1265_v57 = vrot.slane %v1257_v48, %v4342_v25  ;;  %v1272_v61 = vrot.slane %v1258_v52, %v4342_v25  ;;  %v3951_v63 = vcombine.high %v1439_v47, %v1439_v47  ;;  %v1451_v0 = vshrl.u32 %v3948_v51, 16 }
  0x2f   : > { %v1141_v62 = vcombine.low %v1115_v53, %v1122_v54  ;;  %v1142_v1 = vcombine.low %v1129_v58, %v1136_v59  ;;  %v1459_v2 = vshrl.u32 %v3949_v55, 16  ;;  %v1467_v3 = vshrl.u32 %v3950_v60, 16  ;;  %v1558_v54 = vld [vmem:[%s5420_s3 + $0x18] sm:$0x22] }
  0x30   : > { %v3944_v7 = vcombine.low %v1326_v56, %v1326_v56  ;;  %v1273_v8 = vcombine.low %v1265_v57, %v1272_v61  ;;  %v1452_v10 = vpack.i.b16 %v1451_v0, %v1451_v0  ;;  %v1475_v11 = vshrl.u32 %v3951_v63, 16  ;;  %v1992_v0 = vld [vmem:[%s5420_s3 + $0x10] sm:$0x88] }
  0x31   : > { %v1149_v9 = vrot.slane %v1141_v62, %v4342_v25  ;;  %v1156_v12 = vrot.slane %v1142_v1, %v4342_v25  ;;  %v1460_v13 = vpack.i.b16 %v1459_v2, %v1459_v2  ;;  %v1468_v14 = vpack.i.b16 %v1467_v3, %v1467_v3 }
  0x32   : > { %v3945_v15 = vcombine.high %v1326_v56, %v1326_v56  ;;  %1274 = vrot.lane.b32.xlu1 %v1273_v8, %s4253_s20  ;;  %v1457_v16 = vrot.slane %v1452_v10, %v4339_v19  ;;  %v1476_v17 = vpack.i.b16 %v1475_v11, %v1475_v11  ;;  %v3946_v18 = vcombine.low %v1327_v4, %v1327_v4  ;;  %v1993_v11 = vld [vmem:[%s5420_s3 + $0x18] sm:$0x88] }
  0x33   : > { %v3947_v20 = vcombine.high %v1327_v4, %v1327_v4  ;;  %v1157_v22 = vcombine.low %v1149_v9, %v1156_v12  ;;  %v1465_v23 = vrot.slane %v1460_v13, %v4339_v19  ;;  %v1473_v26 = vrot.slane %v1468_v14, %v4339_v19 }
  0x34   : > { %v1339_v27 = vpack.i.b16 %v3944_v7, %v3944_v7  ;;  %v1481_v28 = vrot.slane %v1476_v17, %v4339_v19  ;;  %v1346_v29 = vpack.i.b16 %v3945_v15, %v3945_v15  ;;  %v1353_v30 = vpack.i.b16 %v3946_v18, %v3946_v18 }
  0x35   : > { %v1360_v31 = vpack.i.b16 %v3947_v20, %v3947_v20  ;;  %1158 = vrot.lane.b32.xlu0 %v1157_v22, %s4254_s26  ;;  %v1486_v33 = vcombine.low %v1457_v16, %v1465_v23  ;;  %v3956_v35 = vcombine.low %v1671_v21, %v1671_v21  ;;  %v3957_v36 = vcombine.high %v1671_v21, %v1671_v21  ;;  %v1790_v21 = vld [vmem:[%s5420_s3 + $0x10] sm:$0x44] }
  0x36   : > { %v1344_v34 = vrot.slane %v1339_v27, %v4339_v19  ;;  %v1487_v38 = vcombine.low %v1473_v26, %v1481_v28  ;;  %v1351_v39 = vrot.slane %v1346_v29, %v4339_v19  ;;  %v1358_v40 = vrot.slane %v1353_v30, %v4339_v19 }
  0x37   : > { %v1365_v41 = vrot.slane %v1360_v31, %v4339_v19  ;;  %v1494_v43 = vrot.slane %v1486_v33, %v4342_v25  ;;  %v3958_v44 = vcombine.low %v1672_v32, %v1672_v32  ;;  %v3959_v45 = vcombine.high %v1672_v32, %v1672_v32 }
  0x38   : > { %v1684_v46 = vshrl.u32 %v3956_v35, 16  ;;  %v1501_v47 = vrot.slane %v1487_v38, %v4342_v25  ;;  %v1370_v48 = vcombine.low %v1344_v34, %v1351_v39  ;;  %v1692_v50 = vshrl.u32 %v3957_v36, 16  ;;  %v1791_v35 = vld [vmem:[%s5420_s3 + $0x18] sm:$0x44] }
  0x39   : > { %v1371_v49 = vcombine.low %v1358_v40, %v1365_v41  ;;  %v1700_v52 = vshrl.u32 %v3958_v44, 16  ;;  %v1708_v53 = vshrl.u32 %v3959_v45, 16  ;;  %v3952_v55 = vcombine.low %v1557_v42, %v1557_v42 }
  0x3a   : > { %v1685_v51 = vpack.i.b16 %v1684_v46, %v1684_v46  ;;  %v1502_v56 = vcombine.low %v1494_v43, %v1501_v47  ;;  %v1378_v57 = vrot.slane %v1370_v48, %v4342_v25  ;;  %v1693_v59 = vpack.i.b16 %v1692_v50, %v1692_v50 }
  0x3b   : > { %v1385_v58 = vrot.slane %v1371_v49, %v4342_v25  ;;  %v1701_v61 = vpack.i.b16 %v1700_v52, %v1700_v52  ;;  %v1709_v62 = vpack.i.b16 %v1708_v53, %v1708_v53  ;;  %v3953_v63 = vcombine.high %v1557_v42, %v1557_v42  ;;  %v2221_v42 = vld [vmem:[%s5420_s3 + $0x20] sm:$0x11] }
  0x3c   : > { %v1690_v60 = vrot.slane %v1685_v51, %v4352_v37  ;;  %1503 = vrot.lane.b32.xlu1 %v1502_v56, %s5426_s18  ;;  %v1698_v2 = vrot.slane %v1693_v59, %v4352_v37  ;;  %v3954_v3 = vcombine.low %v1558_v54, %v1558_v54  ;;  %v3955_v4 = vcombine.high %v1558_v54, %v1558_v54  ;;  %v2222_v51 = vld [vmem:[%s5420_s3 + $0x28] sm:$0x11] }
  0x3d   : > { %v1386_v1 = vcombine.low %v1378_v57, %v1385_v58  ;;  %v1706_v7 = vrot.slane %v1701_v61, %v4352_v37  ;;  %v1714_v8 = vrot.slane %v1709_v62, %v4352_v37  ;;  %v1570_v9 = vpack.i.b16 %v3952_v55, %v3952_v55 }
  0x3e   : > { %v1577_v10 = vpack.i.b16 %v3953_v63, %v3953_v63  ;;  %v1719_v12 = vcombine.low %v1690_v60, %v1698_v2  ;;  %v1584_v13 = vpack.i.b16 %v3954_v3, %v3954_v3  ;;  %v1591_v14 = vpack.i.b16 %v3955_v4, %v3955_v4 }
  0x3f   : > { %1387 = vrot.lane.b32.xlu0 %v1386_v1, %s4256_s23  ;;  %v3970_v15 = vcombine.low %v1992_v0, %v1992_v0  ;;  %v1720_v16 = vcombine.low %v1706_v7, %v1714_v8  ;;  %v1575_v17 = vrot.slane %v1570_v9, %v4352_v37  ;;  %v3971_v20 = vcombine.high %v1992_v0, %v1992_v0  ;;  %v2104_v0 = vld [vmem:[%s5420_s3 + $0x10] sm:$0x88] }
  0x40   : > { %v1582_v18 = vrot.slane %v1577_v10, %v4352_v37  ;;  %v1727_v22 = vrot.slane %v1719_v12, %v4342_v25  ;;  %v1589_v23 = vrot.slane %v1584_v13, %v4352_v37  ;;  %v1596_v26 = vrot.slane %v1591_v14, %v4352_v37 }
  0x41   : > { %v3972_v27 = vcombine.low %v1993_v11, %v1993_v11  ;;  %v1734_v28 = vrot.slane %v1720_v16, %v4342_v25  ;;  %v3973_v30 = vcombine.high %v1993_v11, %v1993_v11  ;;  %v2005_v31 = vpack.i.b16 %v3970_v15, %v3970_v15  ;;  %v2105_v11 = vld [vmem:[%s5420_s3 + $0x18] sm:$0x88]  ;;  %v2450_v16 = vld [vmem:[%s5420_s3 + $0x20] sm:$0x22] }
  0x42   : > { %v1601_v29 = vcombine.low %v1575_v17, %v1582_v18  ;;  %v1602_v32 = vcombine.low %v1589_v23, %v1596_v26  ;;  %v2012_v33 = vpack.i.b16 %v3971_v20, %v3971_v20  ;;  %v3960_v36 = vcombine.low %v1790_v21, %v1790_v21 }
  0x43   : > { %v2019_v34 = vpack.i.b16 %v3972_v27, %v3972_v27  ;;  %v1735_v38 = vcombine.low %v1727_v22, %v1734_v28  ;;  %v2010_v40 = vrot.slane %v2005_v31, %v4415_v6  ;;  %v2026_v41 = vpack.i.b16 %v3973_v30, %v3973_v30  ;;  %v2451_v31 = vld [vmem:[%s5420_s3 + $0x28] sm:$0x22] }
  0x44   : > { %v1609_v39 = vrot.slane %v1601_v29, %v4342_v25  ;;  %v1616_v43 = vrot.slane %v1602_v32, %v4342_v25  ;;  %v2017_v44 = vrot.slane %v2012_v33, %v4415_v6  ;;  %v3961_v46 = vcombine.high %v1790_v21, %v1790_v21 }
  0x45   : > { %v2024_v45 = vrot.slane %v2019_v34, %v4415_v6  ;;  %1736 = vrot.lane.b32.xlu1 %v1735_v38, %s4257_s15  ;;  %v2031_v47 = vrot.slane %v2026_v41, %v4415_v6  ;;  %v3962_v48 = vcombine.low %v1791_v35, %v1791_v35  ;;  %v3963_v49 = vcombine.high %v1791_v35, %v1791_v35 }
  0x46   : > { %v1803_v50 = vpack.i.b16 %v3960_v36, %v3960_v36  ;;  %v1617_v52 = vcombine.low %v1609_v39, %v1616_v43  ;;  %v2036_v53 = vcombine.low %v2010_v40, %v2017_v44  ;;  %v1810_v54 = vpack.i.b16 %v3961_v46, %v3961_v46 }
  0x47   : > { %v3978_v55 = vcombine.low %v2221_v42, %v2221_v42  ;;  %v2037_v56 = vcombine.low %v2024_v45, %v2031_v47  ;;  %v1817_v58 = vpack.i.b16 %v3962_v48, %v3962_v48  ;;  %v1824_v59 = vpack.i.b16 %v3963_v49, %v3963_v49 }
  0x48   : > { %v1808_v57 = vrot.slane %v1803_v50, %v4385_v24  ;;  %1618 = vrot.lane.b32.xlu0 %v1617_v52, %s4258_s21  ;;  %v2044_v60 = vrot.slane %v2036_v53, %v4342_v25  ;;  %v1815_v61 = vrot.slane %v1810_v54, %v4385_v24  ;;  %v3979_v62 = vcombine.high %v2221_v42, %v2221_v42  ;;  %v2333_v50 = vld [vmem:[%s5420_s3 + $0x20] sm:$0x11] }
  0x49   : > { %v3980_v63 = vcombine.low %v2222_v51, %v2222_v51  ;;  %v2051_v1 = vrot.slane %v2037_v56, %v4342_v25  ;;  %v1822_v2 = vrot.slane %v1817_v58, %v4385_v24  ;;  %v1829_v3 = vrot.slane %v1824_v59, %v4385_v24 }
  0x4a   : > { %v3981_v4 = vcombine.high %v2222_v51, %v2222_v51  ;;  %v1834_v7 = vcombine.low %v1808_v57, %v1815_v61  ;;  %v2234_v8 = vpack.i.b16 %v3978_v55, %v3978_v55  ;;  %v2241_v9 = vpack.i.b16 %v3979_v62, %v3979_v62  ;;  %v2334_v55 = vld [vmem:[%s5420_s3 + $0x28] sm:$0x11] }
  0x4b   : > { %v2248_v10 = vpack.i.b16 %v3980_v63, %v3980_v63  ;;  %v2052_v12 = vcombine.low %v2044_v60, %v2051_v1  ;;  %v1835_v13 = vcombine.low %v1822_v2, %v1829_v3  ;;  %v3974_v15 = vcombine.low %v2104_v0, %v2104_v0 }
  0x4c   : > { %v2255_v14 = vpack.i.b16 %v3981_v4, %v3981_v4  ;;  %v1842_v17 = vrot.slane %v1834_v7, %v4342_v25  ;;  %v2239_v18 = vrot.slane %v2234_v8, %v4339_v19  ;;  %v2246_v20 = vrot.slane %v2241_v9, %v4339_v19  ;;  %v2679_v4 = vld [vmem:[%s5420_s3 + $0x20] sm:$0x44] }
  0x4d   : > { %v2253_v21 = vrot.slane %v2248_v10, %v4339_v19  ;;  %2053 = vrot.lane.b32.xlu1 %v2052_v12, %s5428_s16  ;;  %v1849_v22 = vrot.slane %v1835_v13, %v4342_v25  ;;  %v3975_v26 = vcombine.high %v2104_v0, %v2104_v0  ;;  %v3976_v27 = vcombine.low %v2105_v11, %v2105_v11  ;;  %s4056_s16 = sshll.u32 %s5440_s28, 3 }
  0x4e   : > { %v2260_v23 = vrot.slane %v2255_v14, %v4339_v19  ;;  %v2265_v28 = vcombine.low %v2239_v18, %v2246_v20  ;;  %v3977_v29 = vcombine.high %v2105_v11, %v2105_v11  ;;  %v2117_v30 = vshrl.u32 %v3974_v15, 16  ;;  %v2680_v15 = vld [vmem:[%s5420_s3 + $0x28] sm:$0x44]  ;;  %s313_s18 = scalar_lea.vmem %s5417_s0, %s4056_s16 }
  0x4f   : > { %v3986_v32 = vcombine.low %v2450_v16, %v2450_v16  ;;  %v1850_v33 = vcombine.low %v1842_v17, %v1849_v22  ;;  %v2125_v35 = vshrl.u32 %v3975_v26, 16  ;;  %v2133_v36 = vshrl.u32 %v3976_v27, 16 }
  0x50   : > { %v2266_v34 = vcombine.low %v2253_v21, %v2260_v23  ;;  %v2273_v38 = vrot.slane %v2265_v28, %v4342_v25  ;;  %v2118_v39 = vpack.i.b16 %v2117_v30, %v2117_v30  ;;  %v2141_v40 = vshrl.u32 %v3977_v29, 16 }
  0x51   : > { %v3987_v41 = vcombine.high %v2450_v16, %v2450_v16  ;;  %1851 = vrot.lane.b32.xlu0 %v1850_v33, %s4260_s25  ;;  %v2126_v43 = vpack.i.b16 %v2125_v35, %v2125_v35  ;;  %v2134_v44 = vpack.i.b16 %v2133_v36, %v2133_v36  ;;  %v3988_v45 = vcombine.low %v2451_v31, %v2451_v31 }
  0x52   : > { %v2280_v42 = vrot.slane %v2266_v34, %v4342_v25  ;;  %v2123_v46 = vrot.slane %v2118_v39, %v4415_v6  ;;  %v2142_v47 = vpack.i.b16 %v2141_v40, %v2141_v40  ;;  %v3989_v48 = vcombine.high %v2451_v31, %v2451_v31  ;;  %v2562_v31 = vld [vmem:[%s5420_s3 + $0x20] sm:$0x22] }
  0x53   : > { %v2463_v49 = vpack.i.b16 %v3986_v32, %v3986_v32  ;;  %v2131_v52 = vrot.slane %v2126_v43, %v4415_v6  ;;  %v2139_v53 = vrot.slane %v2134_v44, %v4415_v6  ;;  %v2470_v54 = vpack.i.b16 %v3987_v41, %v3987_v41  ;;  %v2563_v41 = vld [vmem:[%s5420_s3 + $0x28] sm:$0x22] }
  0x54   : > { %v2281_v51 = vcombine.low %v2273_v38, %v2280_v42  ;;  %v2147_v56 = vrot.slane %v2142_v47, %v4415_v6  ;;  %v2477_v58 = vpack.i.b16 %v3988_v45, %v3988_v45  ;;  %v2484_v59 = vpack.i.b16 %v3989_v48, %v3989_v48 }
  0x55   : > { %v2468_v57 = vrot.slane %v2463_v49, %v4352_v37  ;;  %v2152_v60 = vcombine.low %v2123_v46, %v2131_v52  ;;  %v2475_v61 = vrot.slane %v2470_v54, %v4352_v37  ;;  %v3982_v62 = vcombine.low %v2333_v50, %v2333_v50 }
  0x56   : > { %2282 = vrot.lane.b32.xlu1 %v2281_v51, %s4261_s19  ;;  %v3983_v63 = vcombine.high %v2333_v50, %v2333_v50  ;;  %v2153_v0 = vcombine.low %v2139_v53, %v2147_v56  ;;  %v2482_v1 = vrot.slane %v2477_v58, %v4352_v37  ;;  %v2489_v2 = vrot.slane %v2484_v59, %v4352_v37  ;;  %v2908_v50 = vld [vmem:[%s5420_s3 + $0x20] sm:$0x88] }
  0x57   : > { %v3984_v3 = vcombine.low %v2334_v55, %v2334_v55  ;;  %v2160_v7 = vrot.slane %v2152_v60, %v4342_v25  ;;  %v2494_v8 = vcombine.low %v2468_v57, %v2475_v61  ;;  %v3985_v9 = vcombine.high %v2334_v55, %v2334_v55 }
  0x58   : > { %v2346_v10 = vshrl.u32 %v3982_v62, 16  ;;  %v2167_v11 = vrot.slane %v2153_v0, %v4342_v25  ;;  %v2495_v12 = vcombine.low %v2482_v1, %v2489_v2  ;;  %v2354_v13 = vshrl.u32 %v3983_v63, 16  ;;  %v2909_v62 = vld [vmem:[%s5420_s3 + $0x28] sm:$0x88] }
  0x59   : > { %v2362_v14 = vshrl.u32 %v3984_v3, 16  ;;  %v2502_v16 = vrot.slane %v2494_v8, %v4342_v25  ;;  %v2370_v18 = vshrl.u32 %v3985_v9, 16  ;;  %v3994_v20 = vcombine.low %v2679_v4, %v2679_v4 }
  0x5a   : > { %v2347_v17 = vpack.i.b16 %v2346_v10, %v2346_v10  ;;  %v2168_v21 = vcombine.low %v2160_v7, %v2167_v11  ;;  %v2509_v22 = vrot.slane %v2495_v12, %v4342_v25  ;;  %v2355_v23 = vpack.i.b16 %v2354_v13, %v2354_v13 }
  0x5b   : > { %v2363_v26 = vpack.i.b16 %v2362_v14, %v2362_v14  ;;  %v2371_v28 = vpack.i.b16 %v2370_v18, %v2370_v18  ;;  %v3995_v29 = vcombine.high %v2679_v4, %v2679_v4  ;;  %v3996_v30 = vcombine.low %v2680_v15, %v2680_v15  ;;  %v2791_v14 = vld [vmem:[%s5420_s3 + $0x20] sm:$0x44] }
  0x5c   : > { %v2352_v27 = vrot.slane %v2347_v17, %v4339_v19  ;;  %2169 = vrot.lane.b32.xlu0 %v2168_v21, %s4262_s30  ;;  %v2510_v32 = vcombine.low %v2502_v16, %v2509_v22  ;;  %v2360_v33 = vrot.slane %v2355_v23, %v4339_v19  ;;  %v3997_v35 = vcombine.high %v2680_v15, %v2680_v15 }
  0x5d   : > { %v2368_v34 = vrot.slane %v2363_v26, %v4339_v19  ;;  %v2376_v36 = vrot.slane %v2371_v28, %v4339_v19  ;;  %v2692_v38 = vpack.i.b16 %v3994_v20, %v3994_v20  ;;  %v2699_v39 = vpack.i.b16 %v3995_v29, %v3995_v29  ;;  %v2792_v26 = vld [vmem:[%s5420_s3 + $0x28] sm:$0x44] }
  0x5e   : > { %v2706_v40 = vpack.i.b16 %v3996_v30, %v3996_v30  ;;  %2511 = vrot.lane.b32.xlu1 %v2510_v32, %s4247_s29  ;;  %v2381_v42 = vcombine.low %v2352_v27, %v2360_v33  ;;  %v2713_v43 = vpack.i.b16 %v3997_v35, %v3997_v35  ;;  %v3990_v44 = vcombine.low %v2562_v31, %v2562_v31 }
  0x5f   : > { %v3991_v45 = vcombine.high %v2562_v31, %v2562_v31  ;;  %v2382_v46 = vcombine.low %v2368_v34, %v2376_v36  ;;  %v2697_v47 = vrot.slane %v2692_v38, %v4385_v24  ;;  %v2704_v48 = vrot.slane %v2699_v39, %v4385_v24  ;;  %v3137_v31 = vld [vmem:[%s5420_s3 + $0x30] sm:$0x11] }
  0x60   : > { %v2711_v49 = vrot.slane %v2706_v40, %v4385_v24  ;;  %v2389_v51 = vrot.slane %v2381_v42, %v4342_v25  ;;  %v2718_v52 = vrot.slane %v2713_v43, %v4385_v24  ;;  %v3992_v53 = vcombine.low %v2563_v41, %v2563_v41 }
  0x61   : > { %v3993_v54 = vcombine.high %v2563_v41, %v2563_v41  ;;  %v2396_v55 = vrot.slane %v2382_v46, %v4342_v25  ;;  %v2723_v56 = vcombine.low %v2697_v47, %v2704_v48  ;;  %v2575_v57 = vshrl.u32 %v3990_v44, 16  ;;  %v3138_v44 = vld [vmem:[%s5420_s3 + $0x38] sm:$0x11] }
  0x62   : > { %v2583_v58 = vshrl.u32 %v3991_v45, 16  ;;  %v2724_v59 = vcombine.low %v2711_v49, %v2718_v52  ;;  %v2591_v60 = vshrl.u32 %v3992_v53, 16  ;;  %v4002_v63 = vcombine.low %v2908_v50, %v2908_v50 }
  0x63   : > { %v2599_v61 = vshrl.u32 %v3993_v54, 16  ;;  %v2397_v0 = vcombine.low %v2389_v51, %v2396_v55  ;;  %v2731_v1 = vrot.slane %v2723_v56, %v4342_v25  ;;  %v2576_v2 = vpack.i.b16 %v2575_v57, %v2575_v57 }
  0x64   : > { %v2584_v3 = vpack.i.b16 %v2583_v58, %v2583_v58  ;;  %v2738_v4 = vrot.slane %v2724_v59, %v4342_v25  ;;  %v2592_v7 = vpack.i.b16 %v2591_v60, %v2591_v60  ;;  %v4003_v9 = vcombine.high %v2908_v50, %v2908_v50  ;;  %v3020_v58 = vld [vmem:[%s5420_s3 + $0x20] sm:$0x88] }
  0x65   : > { %v2600_v8 = vpack.i.b16 %v2599_v61, %v2599_v61  ;;  %2398 = vrot.lane.b32.xlu0 %v2397_v0, %s4263_s12  ;;  %v2581_v10 = vrot.slane %v2576_v2, %v4352_v37  ;;  %v4004_v12 = vcombine.low %v2909_v62, %v2909_v62  ;;  %v4005_v13 = vcombine.high %v2909_v62, %v2909_v62 }
  0x66   : > { %v2589_v11 = vrot.slane %v2584_v3, %v4352_v37  ;;  %v2739_v15 = vcombine.low %v2731_v1, %v2738_v4  ;;  %v2597_v16 = vrot.slane %v2592_v7, %v4352_v37  ;;  %v2921_v18 = vpack.i.b16 %v4002_v63, %v4002_v63  ;;  %v3021_v3 = vld [vmem:[%s5420_s3 + $0x28] sm:$0x88] }
  0x67   : > { %v2605_v17 = vrot.slane %v2600_v8, %v4352_v37  ;;  %v2928_v21 = vpack.i.b16 %v4003_v9, %v4003_v9  ;;  %v2935_v22 = vpack.i.b16 %v4004_v12, %v4004_v12  ;;  %v2942_v23 = vpack.i.b16 %v4005_v13, %v4005_v13 }
  0x68   : > { %v2610_v20 = vcombine.low %v2581_v10, %v2589_v11  ;;  %2740 = vrot.lane.b32.xlu1 %v2739_v15, %s4250_s22  ;;  %v2926_v28 = vrot.slane %v2921_v18, %v4415_v6  ;;  %v3998_v29 = vcombine.low %v2791_v14, %v2791_v14  ;;  %v3999_v30 = vcombine.high %v2791_v14, %v2791_v14  ;;  %v3366_v14 = vld [vmem:[%s5420_s3 + $0x30] sm:$0x22] }
  0x69   : > { %v2611_v27 = vcombine.low %v2597_v16, %v2605_v17  ;;  %v2933_v33 = vrot.slane %v2928_v21, %v4415_v6  ;;  %v2940_v34 = vrot.slane %v2935_v22, %v4415_v6  ;;  %v2947_v35 = vrot.slane %v2942_v23, %v4415_v6 }
  0x6a   : > { %v2618_v32 = vrot.slane %v2610_v20, %v4342_v25  ;;  %v4000_v38 = vcombine.low %v2792_v26, %v2792_v26  ;;  %v4001_v39 = vcombine.high %v2792_v26, %v2792_v26  ;;  %v2804_v40 = vshrl.u32 %v3998_v29, 16  ;;  %v3367_v29 = vld [vmem:[%s5420_s3 + $0x38] sm:$0x22] }
  0x6b   : > { %v2625_v36 = vrot.slane %v2611_v27, %v4342_v25  ;;  %v2952_v41 = vcombine.low %v2926_v28, %v2933_v33  ;;  %v2953_v42 = vcombine.low %v2940_v34, %v2947_v35  ;;  %v2812_v43 = vshrl.u32 %v3999_v30, 16 }
  0x6c   : > { %v4010_v45 = vcombine.low %v3137_v31, %v3137_v31  ;;  %v2805_v47 = vpack.i.b16 %v2804_v40, %v2804_v40  ;;  %v2820_v48 = vshrl.u32 %v4000_v38, 16  ;;  %v2828_v49 = vshrl.u32 %v4001_v39, 16 }
  0x6d   : > { %v2626_v46 = vcombine.low %v2618_v32, %v2625_v36  ;;  %v2960_v50 = vrot.slane %v2952_v41, %v4342_v25  ;;  %v2967_v51 = vrot.slane %v2953_v42, %v4342_v25  ;;  %v2813_v52 = vpack.i.b16 %v2812_v43, %v2812_v43 }
  0x6e   : > { %v4011_v53 = vcombine.high %v3137_v31, %v3137_v31  ;;  %v2810_v54 = vrot.slane %v2805_v47, %v4385_v24  ;;  %v2821_v55 = vpack.i.b16 %v2820_v48, %v2820_v48  ;;  %v2829_v56 = vpack.i.b16 %v2828_v49, %v2828_v49 }
  0x6f   : > { %2627 = vrot.lane.b32.xlu0 %v2626_v46, %s4248_s14  ;;  %v4012_v57 = vcombine.low %v3138_v44, %v3138_v44  ;;  %v2968_v59 = vcombine.low %v2960_v50, %v2967_v51  ;;  %v2818_v60 = vrot.slane %v2813_v52, %v4385_v24  ;;  %v4013_v61 = vcombine.high %v3138_v44, %v3138_v44  ;;  %v3249_v44 = vld [vmem:[%s5420_s3 + $0x30] sm:$0x11] }
  0x70   : > { %v3150_v62 = vpack.i.b16 %v4010_v45, %v4010_v45  ;;  %v2826_v63 = vrot.slane %v2821_v55, %v4385_v24  ;;  %v2834_v0 = vrot.slane %v2829_v56, %v4385_v24  ;;  %v3157_v1 = vpack.i.b16 %v4011_v53, %v4011_v53  ;;  %v3250_v53 = vld [vmem:[%s5420_s3 + $0x38] sm:$0x11] }
  0x71   : > { %v3164_v2 = vpack.i.b16 %v4012_v57, %v4012_v57  ;;  %2969 = vrot.lane.b32.xlu1 %v2968_v59, %s4252_s13  ;;  %v2839_v4 = vcombine.low %v2810_v54, %v2818_v60  ;;  %v3171_v8 = vpack.i.b16 %v4013_v61, %v4013_v61  ;;  %v4006_v9 = vcombine.low %v3020_v58, %v3020_v58 }
  0x72   : > { %v3155_v7 = vrot.slane %v3150_v62, %v4339_v19  ;;  %v2840_v10 = vcombine.low %v2826_v63, %v2834_v0  ;;  %v3162_v11 = vrot.slane %v3157_v1, %v4339_v19  ;;  %v4007_v13 = vcombine.high %v3020_v58, %v3020_v58 }
  0x73   : > { %v3169_v12 = vrot.slane %v3164_v2, %v4339_v19  ;;  %v2847_v15 = vrot.slane %v2839_v4, %v4342_v25  ;;  %v3176_v16 = vrot.slane %v3171_v8, %v4339_v19  ;;  %v4008_v17 = vcombine.low %v3021_v3, %v3021_v3 }
  0x74   : > { %v4009_v18 = vcombine.high %v3021_v3, %v3021_v3  ;;  %v2854_v20 = vrot.slane %v2840_v10, %v4342_v25  ;;  %v3181_v21 = vcombine.low %v3155_v7, %v3162_v11  ;;  %v3033_v22 = vshrl.u32 %v4006_v9, 16 }
  0x75   : > { %v3041_v23 = vshrl.u32 %v4007_v13, 16  ;;  %v3182_v26 = vcombine.low %v3169_v12, %v3176_v16  ;;  %v3049_v27 = vshrl.u32 %v4008_v17, 16  ;;  %v4018_v30 = vcombine.low %v3366_v14, %v3366_v14 }
  0x76   : > { %v3057_v28 = vshrl.u32 %v4009_v18, 16  ;;  %v2855_v31 = vcombine.low %v2847_v15, %v2854_v20  ;;  %v3189_v32 = vrot.slane %v3181_v21, %v4342_v25  ;;  %v3034_v33 = vpack.i.b16 %v3033_v22, %v3033_v22 }
  0x77   : > { %v3042_v34 = vpack.i.b16 %v3041_v23, %v3041_v23  ;;  %v3196_v35 = vrot.slane %v3182_v26, %v4342_v25  ;;  %v3050_v36 = vpack.i.b16 %v3049_v27, %v3049_v27  ;;  %v4019_v39 = vcombine.high %v3366_v14, %v3366_v14  ;;  %v330_v26 = vld [vmem:[%s313_s18] sm:$0xff]  ;;  %s5433_s18 = smov 1  }
  0x78   : > { %v3058_v38 = vpack.i.b16 %v3057_v28, %v3057_v28  ;;  %2856 = vrot.lane.b32.xlu0 %v2855_v31, %s4249_s17  ;;  %v3039_v40 = vrot.slane %v3034_v33, %v4415_v6  ;;  %v4020_v42 = vcombine.low %v3367_v29, %v3367_v29  ;;  %v4021_v43 = vcombine.high %v3367_v29, %v3367_v29 }
  0x79   : > { %v3047_v41 = vrot.slane %v3042_v34, %v4415_v6  ;;  %v3197_v45 = vcombine.low %v3189_v32, %v3196_v35  ;;  %v3055_v46 = vrot.slane %v3050_v36, %v4415_v6  ;;  %v3379_v48 = vpack.i.b16 %v4018_v30, %v4018_v30 }
  0x7a   : > { %v3063_v47 = vrot.slane %v3058_v38, %v4415_v6  ;;  %v3386_v50 = vpack.i.b16 %v4019_v39, %v4019_v39  ;;  %v3393_v51 = vpack.i.b16 %v4020_v42, %v4020_v42  ;;  %v3400_v52 = vpack.i.b16 %v4021_v43, %v4021_v43 }
  0x7b   : > { %v3068_v49 = vcombine.low %v3039_v40, %v3047_v41  ;;  %3198 = vrot.lane.b32.xlu1 %v3197_v45, %s4254_s26  ;;  %v3384_v55 = vrot.slane %v3379_v48, %v4352_v37  ;;  %v4014_v6 = vcombine.low %v3249_v44, %v3249_v44  ;;  %v4015_v56 = vcombine.high %v3249_v44, %v3249_v44  ;;  %v1904_v44 = vld [vmem:[%s5420_s3 + $0x18] sm:$0x44] }
  0x7c   : > { %v3069_v54 = vcombine.low %v3055_v46, %v3063_v47  ;;  %v3391_v58 = vrot.slane %v3386_v50, %v4352_v37  ;;  %v3398_v59 = vrot.slane %v3393_v51, %v4352_v37  ;;  %v3405_v60 = vrot.slane %v3400_v52, %v4352_v37 }
  0x7d   : > { %v3076_v57 = vrot.slane %v3068_v49, %v4342_v25  ;;  %v4016_v62 = vcombine.low %v3250_v53, %v3250_v53  ;;  %v4017_v63 = vcombine.high %v3250_v53, %v3250_v53  ;;  %v3262_v0 = vshrl.u32 %v4014_v6, 16 }
  0x7e   : > { %v3083_v61 = vrot.slane %v3069_v54, %v4342_v25  ;;  %v3410_v1 = vcombine.low %v3384_v55, %v3391_v58  ;;  %v3411_v2 = vcombine.low %v3398_v59, %v3405_v60  ;;  %v3270_v3 = vshrl.u32 %v4015_v56, 16 }
  0x7f   : > { %v3263_v7 = vpack.i.b16 %v3262_v0, %v3262_v0  ;;  %v3278_v8 = vshrl.u32 %v4016_v62, 16  ;;  %v3286_v9 = vshrl.u32 %v4017_v63, 16  ;;  %v4264_v15 = vmov 839922192  }
  0x80   : > { %v3084_v4 = vcombine.low %v3076_v57, %v3083_v61  ;;  %v3418_v10 = vrot.slane %v3410_v1, %v4342_v25  ;;  %v3425_v11 = vrot.slane %v3411_v2, %v4342_v25  ;;  %v3271_v12 = vpack.i.b16 %v3270_v3, %v3270_v3 }
  0x81   : > { %v3268_v37 = vrot.slane %v3263_v7, %v4339_v19  ;;  %v3279_v13 = vpack.i.b16 %v3278_v8, %v3278_v8  ;;  %v3287_v14 = vpack.i.b16 %v3286_v9, %v3286_v9  ;;  %v339_v16 = vunpack.c.l.s4 %v4264_v15 }
  0x82   : > { %3085 = vrot.lane.b32.xlu0 %v3084_v4, %s4251_s10  ;;  %v3426_v17 = vcombine.low %v3418_v10, %v3425_v11  ;;  %v3276_v18 = vrot.slane %v3271_v12, %v4339_v19  ;;  %v331_v32 = vunpack.c.l.bf16 %v330_v26  ;;  %v332_v33 = vunpack.c.h.bf16 %v330_v26  ;;  %v1991_v26 = vld [vmem:[#allocation2 + $0xa] sm:$0x3] }
  0x83   : > { %v3284_v20 = vrot.slane %v3279_v13, %v4339_v19  ;;  %v3292_v21 = vrot.slane %v3287_v14, %v4339_v19  ;;  %v340_v22 = vunpack.c.0.s8 %v339_v16  ;;  %v3966_v49 = vcombine.low %v1904_v44, %v1904_v44 }
  0x84   : > { %3427 = vrot.lane.b32.xlu1 %v3426_v17, %s4256_s23  ;;  %v3297_v23 = vcombine.low %v3268_v37, %v3276_v18  ;;  %v3967_v50 = vcombine.high %v1904_v44, %v1904_v44  ;;  %vm1894_vm0 = vcmask 7168   ;;  %vm583_vm1 = vcmask 457728  }
  0x85   : > { %v3298_v27 = vcombine.low %v3284_v20, %v3292_v21  ;;  %v343_v28 = vsub.s32 %v340_v22, %v4327_v5  ;;  %v1903_v5 = vld [vmem:[%s5420_s3 + $0x10] sm:$0x44]  ;;  %v1932_v57 = vshrl.u32 %v3966_v49, 16  ;;  %vm816_vm2 = vcmask 515072  }
  0x86   : > { %v3305_v29 = vrot.slane %v3297_v23, %v4342_v25  ;;  %v337_v30 = vpop.permute.xlu0 %336  ;;  %v3964_v47 = vcombine.low %v1903_v5, %v1903_v5  ;;  %v3965_v48 = vcombine.high %v1903_v5, %v1903_v5  ;;  %v4702_v53 = vpop.permute.xlu1 %461  ;;  %v1940_v58 = vshrl.u32 %v3967_v50, 16  ;;  %v2103_v5 = vld [vmem:[#allocation2 + $0xa] sm:$0x3] }
  0x87   : > { %v3312_v31 = vrot.slane %v3298_v27, %v4342_v25  ;;  %v344_v34 = vrot.slane %v337_v30, %v343_v28  ;;  %v1933_v62 = vpack.i.b16 %v1932_v57, %v1932_v57  ;;  %vm857_vm3 = vcmask 531456  }
  0x88   : > { %v1916_v6 = vshrl.u32 %v3964_v47, 16  ;;  %v1924_v56 = vshrl.u32 %v3965_v48, 16  ;;  %v1941_v63 = vpack.i.b16 %v1940_v58, %v1940_v58  ;;  %v463_v47 = vrot.slane %v4702_v53, 6 }
  0x89   : > { %v3313_v35 = vcombine.low %v3305_v29, %v3312_v31  ;;  %v346_v19 = vmul.f32 %v344_v34, %v331_v32  ;;  %v347_v38 = vmul.f32 %v344_v34, %v332_v33  ;;  %v1938_v3 = vrot.slane %v1933_v62, %v4385_v24  ;;  %v2220_v34 = vld [vmem:[#allocation2 + $0xa] sm:$0x3] }
  0x8a   : > { %v352_v36 = vpop.permute.xlu0 %351  ;;  %v1917_v60 = vpack.i.b16 %v1916_v6, %v1916_v6  ;;  %v1925_v61 = vpack.i.b16 %v1924_v56, %v1924_v56  ;;  %v1946_v4 = vrot.slane %v1941_v63, %v4385_v24  ;;  %vm464_vm4 = vcmask 449536  }
  0x8b   : > { %3314 = vrot.lane.b32.xlu0 %v3313_v35, %s4253_s20  ;;  %v359_v39 = vrot.slane %v352_v36, %v343_v28  ;;  %v4709_v0 = vpop.permute.xlu1 %580  ;;  %vm624_vm5 = vcmask 588800   ;;  %vm698_vm6 = vcmask 465920   ;;  %vm5431_vm7 = vcmask 973824  }
  0x8c   : > { %v1922_v1 = vrot.slane %v1917_v60, %v4385_v24  ;;  %v1930_v2 = vrot.slane %v1925_v61, %v4385_v24  ;;  %v1952_v9 = vcombine.low %v1938_v3, %v1946_v4  ;;  %v582_v32 = vrot.slane %v4709_v0, 6 }
  0x8d   : > { %v361_v40 = vadd.f32 %v359_v39, %v346_v19  ;;  %v362_v41 = vadd.f32 %v359_v39, %v347_v38  ;;  %vm1739_vm8 = vcmask 990208   ;;  %vm1780_vm9 = vcmask 56320  }
  0x8e   : > { %v1951_v8 = vcombine.low %v1922_v1, %v1930_v2  ;;  %v1966_v11 = vrot.slane %v1952_v9, %v4342_v25  ;;  %v584_v39 = vsel %vm583_vm1, %v582_v32, %v4709_v0  ;;  %vm931_vm10 = vcmask 523264  }
  0x8f   : > { %v363_v42 = vmax.f32 %v361_v40, 0.0  ;;  %v364_v43 = vmax.f32 %v362_v41, 0.0  ;;  %vm1661_vm11 = vcmask 64512   ;;  %vm738_vm12 = vcmask 580608  }
  0x90   : > { %v1959_v10 = vrot.slane %v1951_v8, %v4342_v25  ;;  %vm505_vm13 = vcmask 596992   ;;  %vm5430_vm14 = vcmask 982016   ;;  %vm1854_vm15 = vcmask 1039360  }
  0x91   : > { %v367_v45 = vcombine.high %v363_v42, %v363_v42  ;;  %v368_v46 = vcombine.high %v364_v43, %v364_v43  ;;  %v4715_v7 = vpop.permute.xlu1 %813 }
  0x92   : > { %v1967_v13 = vcombine.low %v1959_v10, %v1966_v11  ;;  %v815_v40 = vrot.slane %v4715_v7, 6 }
  0x93   : > { %v3910_v51 = vpack.c.bf16 %v367_v45, %v363_v42  ;;  %v3911_v52 = vpack.c.bf16 %v368_v46, %v364_v43 }
  0x94   : > { %v4721_v37 = vpop.permute.xlu0 %695  ;;  %v817_v44 = vsel %vm816_vm2, %v815_v40, %v4715_v7 }
  0x95   : > { %v387_v54 = vrot.slane %v3910_v51, %v4342_v25  ;;  %v394_v55 = vrot.slane %v3911_v52, %v4342_v25  ;;  %v697_v6 = vrot.slane %v4721_v37, 6 }
  0x97   : > { %v4706_v59 = vcombine.low %v387_v54, %v394_v55  ;;  %v465_v55 = vsel %vm464_vm4, %v463_v47, %v4702_v53  ;;  %v699_v62 = vsel %vm698_vm6, %v697_v6, %v4721_v37 }
  0x99   : > { %397 = vst [vmem:[#allocation2 + $0x2] sm:$0xff] %v4706_v59 }
  0x9b   : > { %v4719_v12 = vpop.permute.xlu1 %1045 }
  0x9c   : > { %v1047_v45 = vrot.slane %v4719_v12, 6 }
  0x9d   : > { %v4725_v17 = vpop.permute.xlu0 %928 }
  0x9e   : > { %v1048_v51 = vsel %vm857_vm3, %v1047_v45, %v4719_v12 }
  0xa0   : > { %v1902_v14 = vld [vmem:[#allocation2 + $0x2] sm:$0xff] }
  0xa1   : > { %v1969_v16 = vmul.bf16 %v1967_v13, %v1902_v14  ;;  %v4748_v19 = vld [vmem:[#allocation2] sm:$0xff]  ;;  %v399_v9 = vld [vmem:[#allocation2 + $0x8] sm:$0x3] }
  0xa2   : > { %v4758_v41 = vmul.bf16 %v584_v39, %v4748_v19  ;;  %v4769_v48 = vmul.bf16 %v817_v44, %v4748_v19  ;;  %v4783_v56 = vmul.bf16 %v1048_v51, %v4748_v19  ;;  %v4788_v58 = vmul.bf16 %v465_v55, %v4748_v19 }
  0xa3   : > { %3969 = vst.sshfl [vmem:[#allocation3 + $0x68] sm:$0xf0 pattern:$0x76325410] %v1969_v16  ;;  %v1971_v24 = vcombine.low %v1969_v16, %v1969_v16  ;;  %v4806_v2 = vmul.bf16 %v699_v62, %v4748_v19  ;;  %v469_v37 = vmul.bf16 %v463_v47, %v399_v9  ;;  %v633_v16 = vld [vmem:[#allocation2 + $0x8] sm:$0x3] }
  0xa4   : > { %v4723_v15 = vpop.permute.xlu1 %1274  ;;  %v605_v49 = vrot.slane %v4758_v41, %v4342_v25  ;;  %v838_v57 = vrot.slane %v4769_v48, %v4342_v25  ;;  %v1069_v1 = vrot.slane %v4783_v56, %v4342_v25  ;;  %v479_v8 = vrot.slane %v4788_v58, %v4342_v25 }
  0xa5   : > { %3968 = vst.sshfl [vmem:[#allocation3 + $0x60] sm:$0xf0 pattern:$0x76325410] %v1971_v24  ;;  %v1276_v52 = vrot.slane %v4723_v15, 6  ;;  %v713_v14 = vrot.slane %v4806_v2, %v4342_v25  ;;  %v930_v24 = vrot.slane %v4725_v17, 6 }
  0xa7   : > { %v4729_v20 = vpop.permute.xlu0 %1158  ;;  %v1277_v53 = vsel %vm624_vm5, %v1276_v52, %v4723_v15 }
  0xa8   : > { %v4801_v63 = vmul.bf16 %v1277_v53, %v4748_v19  ;;  %v1160_v39 = vrot.slane %v4729_v20, 6 }
  0xaa   : > { %v1298_v11 = vrot.slane %v4801_v63, %v4342_v25  ;;  %v1161_v47 = vsel %vm738_vm12, %v1160_v39, %v4729_v20 }
  0xab   : > { %v4869_v51 = vmul.bf16 %v1161_v47, %v4748_v19  ;;  %v979_v47 = vld [vmem:[#allocation2 + $0x8] sm:$0x3] }
  0xae   : > { %v4727_v18 = vpop.permute.xlu1 %1503 }
  0xaf   : > { %v1505_v60 = vrot.slane %v4727_v18, 6 }
  0xb1   : > { %v4733_v22 = vpop.permute.xlu0 %1387  ;;  %v1507_v3 = vsel %vm5431_vm7, %v1505_v60, %v4727_v18  ;;  %vm503_vm7 = vcmask 1043456  }
  0xb2   : > { %v4818_v10 = vmul.bf16 %v1507_v3, %v4748_v19  ;;  %v1389_v53 = vrot.slane %v4733_v22, 6  ;;  %v514_v3 = vld [vmem:[#allocation2 + $0x8] sm:$0x3] }
  0xb7   : > { %v4731_v21 = vpop.permute.xlu1 %1736 }
  0xb8   : > { %v1738_v4 = vrot.slane %v4731_v21, 6 }
  0xba   : > { %v4735_v28 = vpop.permute.xlu0 %1618  ;;  %v1740_v13 = vsel %vm1739_vm8, %v1738_v4, %v4731_v21  ;;  %v824_v21 = vcombine.low %v4769_v48, %v4769_v48 }
  0xbf   : > { %v2054_v23 = vpop.permute.xlu1 %2053 }
  0xc0   : > { %v2055_v27 = vrot.slane %v2054_v23, 6 }
  0xc2   : > { %v4738_v29 = vsel %vm1894_vm0, %v2055_v27, %v2054_v23  ;;  %v2060_v30 = vmul.bf16 %v2055_v27, %v1991_v26  ;;  %v4832_v23 = vmul.bf16 %v1740_v13, %v4748_v19  ;;  %v1528_v26 = vrot.slane %v4818_v10, %v4342_v25 }
  0xc3   : > { %v4745_v35 = vpop.permute.xlu0 %1851  ;;  %v703_v27 = vmul.bf16 %v697_v6, %v633_v16  ;;  %v1390_v13 = vsel %vm505_vm13, %v1389_v53, %v4733_v22  ;;  %v747_v16 = vld [vmem:[#allocation2 + $0x8] sm:$0x3] }
  0xc4   : > { %v2084_v31 = vrot.slane %v2060_v30, %v4342_v25  ;;  %v821_v0 = vmul.bf16 %v815_v40, %v747_v16  ;;  %v1556_v40 = vld [vmem:[#allocation2 + $0x8] sm:$0x3] }
  0xc6   : > { %2089 = vrot.lane.b32.xlu1 %v2084_v31, %s4260_s25  ;;  %v493_v31 = vrot.slane %v469_v37, %v4342_v25  ;;  %v588_v37 = vmul.bf16 %v582_v32, %v514_v3  ;;  %v1789_v3 = vld [vmem:[#allocation2 + $0x8] sm:$0x3] }
  0xc8   : > { %v4743_v33 = vpop.permute.xlu1 %2282  ;;  %v606_v32 = vcombine.low %v588_v37, %v588_v37 }
  0xc9   : > { %v2284_v36 = vrot.slane %v4743_v33, 6 }
  0xcb   : > { %v2289_v38 = vmul.bf16 %v2284_v36, %v2220_v34  ;;  %v2285_v44 = vsel %vm1661_vm11, %v2284_v36, %v4743_v33 }
  0xcd   : > { %v2313_v42 = vrot.slane %v2289_v38, %v4342_v25  ;;  %v932_v38 = vsel %vm931_vm10, %v930_v24, %v4725_v17  ;;  %v727_v17 = vrot.slane %v703_v27, %v4342_v25 }
  0xce   : > { %v2170_v43 = vpop.permute.xlu0 %2169 }
  0xcf   : > { %2318 = vrot.lane.b32.xlu1 %v2313_v42, %s4258_s21  ;;  %v2171_v46 = vrot.slane %v2170_v43, 6 }
  0xd0   : > { %v4838_v34 = vpop.permute.xlu1 %2511 }
  0xd1   : > { %v2176_v50 = vmul.bf16 %v2171_v46, %v2103_v5  ;;  %v2172_v30 = vsel %vm1780_vm9, %v2171_v46, %v2170_v43  ;;  %v1761_v43 = vrot.slane %v4832_v23, %v4342_v25  ;;  %v4851_v5 = vmul.bf16 %v932_v38, %v4748_v19 }
  0xd2   : > { %v4846_v42 = vmul.bf16 %v2172_v30, %v4706_v59  ;;  %v2513_v46 = vrot.slane %v4838_v34, 6  ;;  %v839_v38 = vcombine.low %v821_v0, %v821_v0 }
  0xd3   : > { %616 = vrot.lane.b32.xlu1 %v605_v49, %s4253_s20  ;;  %v2194_v54 = vcombine.low %v2176_v50, %v2176_v50  ;;  %v4864_v49 = vmul.bf16 %v2285_v44, %v4706_v59  ;;  %v946_v36 = vrot.slane %v4851_v5, %v4342_v25 }
  0xd4   : > { %v2193_v50 = vrot.slane %v4846_v42, %v4342_v25  ;;  %v2514_v33 = vsel %vm464_vm4, %v2513_v46, %v4838_v34  ;;  %v846_v44 = vrot.slane %v839_v38, %v4342_v25 }
  0xd5   : > { %v2201_v61 = vrot.slane %v2194_v54, %v4342_v25  ;;  %v866_v54 = vld [vmem:[#allocation2 + $0x8] sm:$0x3]  ;;  %v4880_v20 = vmul.bf16 %v2514_v33, %v4706_v59  ;;  %v2299_v55 = vrot.slane %v4864_v49, %v4342_v25  ;;  %v2292_v34 = vcombine.high %v4864_v49, %v4864_v49 }
  0xd6   : > { %v936_v6 = vmul.bf16 %v930_v24, %v866_v54  ;;  %v4905_v24 = vmul.bf16 %v1390_v13, %v4748_v19  ;;  %v1052_v54 = vmul.bf16 %v1047_v45, %v979_v47 }
  0xd7   : > { %849 = vrot.lane.b32.xlu1 %v838_v57, %s4251_s10  ;;  %2206 = vrot.lane.b32.xlu0 %v2201_v61, %s4257_s15  ;;  %v1175_v57 = vrot.slane %v4869_v51, %v4342_v25  ;;  %v1096_v61 = vld [vmem:[#allocation2 + $0x8] sm:$0x3]  ;;  %v2528_v62 = vrot.slane %v4880_v20, %v4342_v25 }
  0xd8   : > { %v960_v9 = vrot.slane %v936_v6, %v4342_v25  ;;  %v1404_v30 = vrot.slane %v4905_v24, %v4342_v25  ;;  %v1168_v6 = vcombine.high %v4869_v51, %v4869_v51  ;;  %v1070_v45 = vcombine.low %v1052_v54, %v1052_v54 }
  0xd9   : > { %v2059_v51 = vmul.bf16 %v4738_v29, %v4706_v59  ;;  %v1397_v13 = vcombine.high %v4905_v24, %v4905_v24 }
  0xda   : > { %v1077_v15 = vrot.slane %v1070_v45, %v4342_v25 }
  0xdb   : > { %1080 = vrot.lane.b32.xlu1 %v1069_v1, %s4249_s17  ;;  %494 = vrot.lane.b32.xlu0 %v479_v8, %s4256_s23  ;;  %v472_v1 = vcombine.high %v4788_v58, %v4788_v58  ;;  %v1165_v8 = vmul.bf16 %v1160_v39, %v1096_v61  ;;  %v4942_v61 = vpop.permute.xlu0 %2398  ;;  %v1411_v0 = vrot.slane %v1397_v13, %v4342_v25 }
  0xdd   : > { %v486_v58 = vrot.slane %v472_v1, %v4342_v25 }
  0xdf   : > { %1309 = vrot.lane.b32.xlu1 %v1298_v11, %s4248_s14  ;;  %728 = vrot.lane.b32.xlu0 %v713_v14, %s4254_s26  ;;  %v1620_v11 = vrot.slane %v4735_v28, 6  ;;  %v706_v14 = vcombine.high %v4806_v2, %v4806_v2 }
  0xe1   : > { %v1622_v27 = vsel %vm5430_vm14, %v1620_v11, %v4735_v28  ;;  %v720_v22 = vrot.slane %v706_v14, %v4342_v25  ;;  %v613_v28 = vrot.slane %v606_v32, %v4342_v25  ;;  %vm1547_vm14 = vcmask 72704   ;;  %v4955_v1 = vpop.permute.xlu0 %2627 }
  0xe2   : > { %v4916_v2 = vmul.bf16 %v1622_v27, %v4748_v19 }
  0xe3   : > { %1539 = vrot.lane.b32.xlu1 %v1528_v26, %s4263_s12  ;;  %498 = vrot.lane.b32.xlu0 %v493_v31, %s4256_s23  ;;  %v1189_v26 = vrot.slane %v1165_v8, %v4342_v25  ;;  %v1325_v31 = vld [vmem:[#allocation2 + $0x8] sm:$0x3] }
  0xe4   : > { %v1394_v39 = vmul.bf16 %v1389_v53, %v1325_v31  ;;  %v1636_v7 = vrot.slane %v4916_v2, %v4342_v25  ;;  %v1629_v24 = vcombine.high %v4916_v2, %v4916_v2  ;;  %v591_v2 = vcombine.low %v4758_v41, %v4758_v41 }
  0xe5   : > { %v831_v41 = vrot.slane %v824_v21, %v4342_v25 }
  0xe6   : > { %v1418_v33 = vrot.slane %v1394_v39, %v4342_v25  ;;  %v1643_v18 = vrot.slane %v1629_v24, %v4342_v25 }
  0xe7   : > { %1772 = vrot.lane.b32.xlu1 %v1761_v43, %s4262_s30  ;;  %732 = vrot.lane.b32.xlu0 %v727_v17, %s4254_s26  ;;  %v1853_v43 = vrot.slane %v4745_v35, 6  ;;  %v939_v17 = vcombine.high %v4851_v5, %v4851_v5  ;;  %v1208_v5 = vld [vmem:[#allocation2 + $0x8] sm:$0x3] }
  0xe8   : > { %v1281_v12 = vmul.bf16 %v1276_v52, %v1208_v5 }
  0xe9   : > { %v1859_v8 = vmul.bf16 %v1853_v43, %v1789_v3 }
  0xea   : > { %v1299_v52 = vcombine.low %v1281_v12, %v1281_v12 }
  0xeb   : > { %2204 = vrot.lane.b32.xlu1 %v2193_v50, %s4257_s15  ;;  %961 = vrot.lane.b32.xlu0 %v946_v36, %s4252_s13  ;;  %v1626_v50 = vmul.bf16 %v1620_v11, %v1556_v40  ;;  %v1855_v36 = vsel %vm1854_vm15, %v1853_v43, %v4745_v35  ;;  %v1182_v35 = vrot.slane %v1168_v6, %v4342_v25  ;;  %v2629_v11 = vrot.slane %v4955_v1, 6  ;;  %v5021_v6 = vpop.permute.xlu0 %2856 }
  0xec   : > { %v1306_v37 = vrot.slane %v1299_v52, %v4342_v25  ;;  %v1883_v16 = vrot.slane %v1859_v8, %v4342_v25  ;;  %v1055_v43 = vcombine.low %v4783_v56, %v4783_v56 }
  0xed   : > { %v1650_v53 = vrot.slane %v1626_v50, %v4342_v25  ;;  %v1284_v50 = vcombine.low %v4801_v63, %v4801_v63 }
  0xee   : > { %v1062_v47 = vrot.slane %v1055_v43, %v4342_v25  ;;  %v2907_v43 = vld [vmem:[#allocation2 + $0xa] sm:$0x3] }
  0xef   : > { %2314 = vrot.lane.b32.xlu1 %v2299_v55, %s4258_s21  ;;  %1190 = vrot.lane.b32.xlu0 %v1175_v57, %s4250_s22  ;;  %v953_v55 = vrot.slane %v939_v17, %v4342_v25  ;;  %v1858_v57 = vmul.bf16 %v1855_v36, %v4748_v19  ;;  %v2400_v19 = vrot.slane %v4942_v61, 6  ;;  %v5007_v17 = vpop.permute.xlu1 %2740  ;;  %v1514_v36 = vcombine.low %v4818_v10, %v4818_v10 }
  0xf0   : > { %v1291_v54 = vrot.slane %v1284_v50, %v4342_v25  ;;  %v2742_v12 = vrot.slane %v5007_v17, 6  ;;  %v2858_v10 = vrot.slane %v5021_v6, 6 }
  0xf1   : > { %v2401_v29 = vsel %vm1547_vm14, %v2400_v19, %v4942_v61 }
  0xf2   : > { %v2404_v14 = vmul.bf16 %v2401_v29, %v4706_v59  ;;  %v2743_v3 = vsel %vm698_vm6, %v2742_v12, %v5007_v17 }
  0xf3   : > { %2543 = vrot.lane.b32.xlu1 %v2528_v62, %s4256_s23  ;;  %965 = vrot.lane.b32.xlu0 %v960_v9, %s4252_s13  ;;  %v1869_v62 = vrot.slane %v1858_v57, %v4342_v25  ;;  %v2070_v9 = vrot.slane %v2059_v51, %v4342_v25 }
  0xf4   : > { %v5047_v8 = vpop.permute.xlu0 %3085 }
  0xf7   : > { %496 = vrot.lane.b32.xlu1 %v486_v58, %s4256_s23  ;;  %1194 = vrot.lane.b32.xlu0 %v1189_v26, %s4250_s22  ;;  %v1437_v58 = vld [vmem:[#allocation2 + $0x8] sm:$0x3]  ;;  %v2630_v26 = vsel %vm583_vm1, %v2629_v11, %v4955_v1 }
  0xf8   : > { %v1511_v27 = vmul.bf16 %v1505_v60, %v1437_v58  ;;  %v2633_v32 = vmul.bf16 %v2630_v26, %v4706_v59  ;;  %v2332_v58 = vld [vmem:[#allocation2 + $0xa] sm:$0x3] }
  0xf9   : > { %v2405_v24 = vmul.bf16 %v2400_v19, %v2332_v58 }
  0xfa   : > { %v1529_v31 = vcombine.low %v1511_v27, %v1511_v27  ;;  %v2651_v60 = vrot.slane %v2633_v32, %v4342_v25  ;;  %v2637_v63 = vcombine.low %v2633_v32, %v2633_v32  ;;  %v2521_v27 = vcombine.high %v4880_v20, %v4880_v20  ;;  %v2561_v32 = vld [vmem:[#allocation2 + $0xa] sm:$0x3] }
  0xfb   : > { %730 = vrot.lane.b32.xlu1 %v720_v22, %s4254_s26  ;;  %1419 = vrot.lane.b32.xlu0 %v1404_v30, %s4247_s29  ;;  %v1670_v22 = vld [vmem:[#allocation2 + $0x8] sm:$0x3]  ;;  %v2422_v30 = vrot.slane %v2404_v14, %v4342_v25 }
  0xfc   : > { %v1536_v39 = vrot.slane %v1529_v31, %v4342_v25  ;;  %v2423_v31 = vcombine.low %v2405_v24, %v2405_v24 }
  0xfe   : > { %v2430_v21 = vrot.slane %v2423_v31, %v4342_v25 }
  0xff   : > { %618 = vrot.lane.b32.xlu1 %v613_v28, %s4253_s20  ;;  %1651 = vrot.lane.b32.xlu0 %v1636_v7, %s4261_s19  ;;  %v1744_v28 = vmul.bf16 %v1738_v4, %v1670_v22  ;;  %v598_v7 = vrot.slane %v591_v2, %v4342_v25  ;;  %v1862_v4 = vcombine.high %v1858_v57, %v1858_v57 }
 0x100   : > { %v1747_v57 = vcombine.low %v4832_v23, %v4832_v23  ;;  %v2179_v23 = vcombine.low %v4846_v42, %v4846_v42  ;;  %v2746_v42 = vmul.bf16 %v2743_v3, %v4706_v59 }
 0x101   : > { %v1762_v38 = vcombine.low %v1744_v28, %v1744_v28  ;;  %v1876_v48 = vrot.slane %v1862_v4, %v4342_v25  ;;  %v2634_v28 = vmul.bf16 %v2629_v11, %v2561_v32  ;;  %v5099_v4 = vpop.permute.xlu0 %3314 }
 0x102   : > { %v1754_v52 = vrot.slane %v1747_v57, %v4342_v25  ;;  %v2186_v13 = vrot.slane %v2179_v23, %v4342_v25  ;;  %v2757_v26 = vrot.slane %v2746_v42, %v4342_v25  ;;  %v3316_v17 = vrot.slane %v5099_v4, 6 }
 0x103   : > { %851 = vrot.lane.b32.xlu1 %v846_v44, %s4251_s10  ;;  %1423 = vrot.lane.b32.xlu0 %v1418_v33, %s4247_s29  ;;  %v1769_v40 = vrot.slane %v1762_v38, %v4342_v25  ;;  %v2063_v44 = vcombine.high %v2059_v51, %v2059_v51  ;;  %v2408_v33 = vcombine.low %v2404_v14, %v2404_v14 }
 0x105   : > { %v2077_v56 = vrot.slane %v2063_v44, %v4342_v25  ;;  %v2415_v5 = vrot.slane %v2408_v33, %v4342_v25 }
 0x107   : > { %963 = vrot.lane.b32.xlu1 %v953_v55, %s4252_s13  ;;  %1655 = vrot.lane.b32.xlu0 %v1650_v53, %s4261_s19  ;;  %v5019_v55 = vpop.permute.xlu1 %2969  ;;  %v2449_v53 = vld [vmem:[#allocation2 + $0xa] sm:$0x3] }
 0x108   : > { %v2518_v45 = vmul.bf16 %v2513_v46, %v2449_v53  ;;  %v2971_v29 = vrot.slane %v5019_v55, 6 }
 0x10b   : > { %1192 = vrot.lane.b32.xlu1 %v1182_v35, %s4250_s22  ;;  %1884 = vrot.lane.b32.xlu0 %v1869_v62, %s5433_s18  ;;  %v1521_v35 = vrot.slane %v1514_v36, %v4342_v25  ;;  %v5035_v51 = vpop.permute.xlu1 %3198  ;;  %v2644_v62 = vrot.slane %v2637_v63, %v4342_v25  ;;  %v3317_v36 = vsel %vm624_vm5, %v3316_v17, %v5099_v4 }
 0x10c   : > { %v3200_v44 = vrot.slane %v5035_v51, 6 }
 0x10f   : > { %1082 = vrot.lane.b32.xlu1 %v1077_v15, %s4249_s17  ;;  %2085 = vrot.lane.b32.xlu0 %v2070_v9, %s4260_s25  ;;  %v2859_v15 = vsel %vm816_vm2, %v2858_v10, %v5021_v6  ;;  %v2542_v9 = vrot.slane %v2518_v45, %v4342_v25  ;;  %v5061_v14 = vpop.permute.xlu1 %3427 }
 0x110   : > { %v5055_v46 = vmul.bf16 %v2859_v15, %v4706_v59 }
 0x112   : > { %v2866_v49 = vcombine.low %v5055_v46, %v5055_v46 }
 0x113   : > { %1311 = vrot.lane.b32.xlu1 %v1306_v37, %s4248_s14  ;;  %1888 = vrot.lane.b32.xlu0 %v1883_v16, %s5433_s18  ;;  %v3087_v37 = vrot.slane %v5047_v8, 6  ;;  %v2306_v16 = vrot.slane %v2292_v34, %v4342_v25 }
 0x114   : > { %v2873_v19 = vrot.slane %v2866_v49, %v4342_v25 }
 0x115   : > { %v3088_v22 = vsel %vm857_vm3, %v3087_v37, %v5047_v8 }
 0x116   : > { %v5085_v61 = vmul.bf16 %v3088_v22, %v4706_v59 }
 0x117   : > { %1421 = vrot.lane.b32.xlu1 %v1411_v0, %s4247_s29  ;;  %2433 = vrot.lane.b32.xlu0 %v2422_v30, %s5434_s11  ;;  %v2972_v0 = vsel %vm931_vm10, %v2971_v29, %v5019_v55 }
 0x118   : > { %v2975_v20 = vmul.bf16 %v2972_v0, %v4706_v59  ;;  %v3365_v0 = vld [vmem:[#allocation2 + $0xa] sm:$0x3] }
 0x11a   : > { %v2986_v38 = vrot.slane %v2975_v20, %v4342_v25 }
 0x11b   : > { %1653 = vrot.lane.b32.xlu1 %v1643_v18, %s4261_s19  ;;  %2662 = vrot.lane.b32.xlu0 %v2651_v60, %s4253_s20  ;;  %v2535_v18 = vrot.slane %v2521_v27, %v4342_v25  ;;  %v3095_v60 = vcombine.low %v5085_v61, %v5085_v61 }
 0x11f   : > { %1541 = vrot.lane.b32.xlu1 %v1536_v39, %s4263_s12  ;;  %614 = vrot.lane.b32.xlu0 %v598_v7, %s4253_s20  ;;  %v2678_v39 = vld [vmem:[#allocation2 + $0xa] sm:$0x3]  ;;  %v2652_v7 = vcombine.low %v2634_v28, %v2634_v28 }
 0x120   : > { %v2747_v1 = vmul.bf16 %v2742_v12, %v2678_v39  ;;  %v2979_v12 = vcombine.high %v2975_v20, %v2975_v20 }
 0x122   : > { %v2771_v33 = vrot.slane %v2747_v1, %v4342_v25 }
 0x123   : > { %1774 = vrot.lane.b32.xlu1 %v1769_v40, %s4262_s30  ;;  %847 = vrot.lane.b32.xlu0 %v831_v41, %s4251_s10  ;;  %v3102_v40 = vrot.slane %v3095_v60, %v4342_v25  ;;  %v2750_v41 = vcombine.high %v2746_v42, %v2746_v42 }
 0x125   : > { %v2764_v55 = vrot.slane %v2750_v41, %v4342_v25 }
 0x127   : > { %1886 = vrot.lane.b32.xlu1 %v1876_v48, %s5433_s18  ;;  %1078 = vrot.lane.b32.xlu0 %v1062_v47, %s4249_s17  ;;  %v2659_v48 = vrot.slane %v2652_v7, %v4342_v25  ;;  %v2976_v47 = vmul.bf16 %v2971_v29, %v2907_v43 }
 0x129   : > { %v3000_v53 = vrot.slane %v2976_v47, %v4342_v25 }
 0x12b   : > { %2087 = vrot.lane.b32.xlu1 %v2077_v56, %s4260_s25  ;;  %1307 = vrot.lane.b32.xlu0 %v1291_v54, %s4248_s14  ;;  %v3201_v56 = vsel %vm738_vm12, %v3200_v44, %v5035_v51  ;;  %v2880_v51 = vrot.slane %v5055_v46, %v4342_v25  ;;  %v2993_v46 = vrot.slane %v2979_v12, %v4342_v25 }
 0x12c   : > { %v3204_v63 = vmul.bf16 %v3201_v56, %v4706_v59 }
 0x12e   : > { %v3215_v15 = vrot.slane %v3204_v63, %v4342_v25 }
 0x12f   : > { %2431 = vrot.lane.b32.xlu1 %v2415_v5, %s5434_s11  ;;  %1537 = vrot.lane.b32.xlu0 %v1521_v35, %s4263_s12  ;;  %v5125_v5 = vmul.bf16 %v3317_v36, %v4706_v59  ;;  %v3429_v35 = vrot.slane %v5061_v14, 6 }
 0x131   : > { %v3324_v23 = vcombine.low %v5125_v5, %v5125_v5  ;;  %v3430_v34 = vsel %vm505_vm13, %v3429_v35, %v5061_v14 }
 0x132   : > { %v3433_v29 = vmul.bf16 %v3430_v34, %v4706_v59 }
 0x133   : > { %2660 = vrot.lane.b32.xlu1 %v2644_v62, %s4253_s20  ;;  %1770 = vrot.lane.b32.xlu0 %v1754_v52, %s4262_s30  ;;  %v2790_v62 = vld [vmem:[#allocation2 + $0xa] sm:$0x3] }
 0x134   : > { %v2863_v52 = vmul.bf16 %v2858_v10, %v2790_v62  ;;  %v3136_v10 = vld [vmem:[#allocation2 + $0xa] sm:$0x3]  ;;  %v3444_v59 = vrot.slane %v3433_v29, %v4342_v25  ;;  %v3437_v41 = vcombine.high %v3433_v29, %v3433_v29 }
 0x136   : > { %v2881_v6 = vcombine.low %v2863_v52, %v2863_v52 }
 0x137   : > { %2547 = vrot.lane.b32.xlu1 %v2542_v9, %s4256_s23  ;;  %2202 = vrot.lane.b32.xlu0 %v2186_v13, %s4257_s15  ;;  %v3019_v9 = vld [vmem:[#allocation2 + $0xa] sm:$0x3]  ;;  %v3331_v13 = vrot.slane %v3324_v23, %v4342_v25 }
 0x138   : > { %v5080_v30 = vpop.permute.xlu1 %2089  ;;  %v3092_v14 = vmul.bf16 %v3087_v37, %v3019_v9  ;;  %v2888_v32 = vrot.slane %v2881_v6, %v4342_v25  ;;  %v3434_v37 = vmul.bf16 %v3429_v35, %v3365_v0 }
 0x13a   : > { %v3110_v24 = vcombine.low %v3092_v14, %v3092_v14 }
 0x13b   : > { %2772 = vrot.lane.b32.xlu1 %v2757_v26, %s4254_s26  ;;  %2316 = vrot.lane.b32.xlu0 %v2306_v16, %s4258_s21  ;;  %v3109_v16 = vrot.slane %v5085_v61, %v4342_v25  ;;  %v3205_v26 = vmul.bf16 %v3200_v44, %v3136_v10  ;;  %v3208_v61 = vcombine.high %v3204_v63, %v3204_v63 }
 0x13c   : > { %v3117_v28 = vrot.slane %v3110_v24, %v4342_v25 }
 0x13d   : > { %v3229_v8 = vrot.slane %v3205_v26, %v4342_v25 }
 0x13f   : > { %2889 = vrot.lane.b32.xlu1 %v2873_v19, %s4251_s10  ;;  %2545 = vrot.lane.b32.xlu0 %v2535_v18, %s4256_s23  ;;  %s3908_s23 = sshll.u32 %s5440_s28, 2 }
 0x140   : > { %s322_s25 = scalar_lea.vmem %s5424_s7, %s3908_s23  ;;  %s326_s12 = scalar_lea.vmem %s5425_s8, %s3908_s23 }
 0x141   : > { %v5095_v2 = vpop.permute.xlu1 %2318 }
 0x143   : > { %3001 = vrot.lane.b32.xlu1 %v2986_v38, %s4252_s13  ;;  %2435 = vrot.lane.b32.xlu0 %v2430_v21, %s5434_s11  ;;  %v3458_v38 = vrot.slane %v3434_v37, %v4342_v25  ;;  %v3222_v21 = vrot.slane %v3208_v61, %v4342_v25 }
 0x145   : > { %v5103_v11 = vpop.permute.xlu1 %616 }
 0x147   : > { %3118 = vrot.lane.b32.xlu1 %v3102_v40, %s4249_s17  ;;  %2664 = vrot.lane.b32.xlu0 %v2659_v48, %s4253_s20  ;;  %v3248_v40 = vld [vmem:[#allocation2 + $0xa] sm:$0x3]  ;;  %v3338_v48 = vrot.slane %v5125_v5, %v4342_v25 }
 0x148   : > { %v3321_v44 = vmul.bf16 %v3316_v17, %v3248_v40 }
 0x149   : > { %v5111_v50 = vpop.permute.xlu1 %849  ;;  %v2207_v54 = vpop.permute.xlu0 %2206 }
 0x14a   : > { %v2210_v19 = vrot.slane %v2207_v54, 4  ;;  %v3339_v36 = vcombine.low %v3321_v44, %v3321_v44 }
 0x14b   : > { %2776 = vrot.lane.b32.xlu1 %v2771_v33, %s4254_s26  ;;  %2774 = vrot.lane.b32.xlu0 %v2764_v55, %s4254_s26  ;;  %v3451_v33 = vrot.slane %v3437_v41, %v4342_v25 }
 0x14d   : > { %v5127_v57 = vpop.permute.xlu1 %1080  ;;  %v5131_v45 = vpop.permute.xlu0 %494 }
 0x14e   : > { %v500_v54 = vrot.slane %v5131_v45, 4 }
 0x14f   : > { %3005 = vrot.lane.b32.xlu1 %v3000_v53, %s4252_s13  ;;  %2891 = vrot.lane.b32.xlu0 %v2880_v51, %s4251_s10  ;;  %v3346_v51 = vrot.slane %v3339_v36, %v4342_v25  ;;  %v3505_v25 = vld [vmem:[%s5422_s5] sm:$0xf] }
 0x151   : > { %v5139_v3 = vpop.permute.xlu1 %1309  ;;  %v5146_v42 = vpop.permute.xlu0 %728 }
 0x152   : > { %v734_v62 = vrot.slane %v5146_v42, 4 }
 0x153   : > { %3230 = vrot.lane.b32.xlu1 %v3215_v15, %s4250_s22  ;;  %3003 = vrot.lane.b32.xlu0 %v2993_v46, %s4252_s13 }
 0x155   : > { %v5153_v58 = vpop.permute.xlu1 %1539  ;;  %v499_v49 = vpop.permute.xlu0 %498 }
 0x156   : > { %v502_v55 = vrot.slane %v499_v49, 4 }
 0x157   : > { %3347 = vrot.lane.b32.xlu1 %v3331_v13, %s4248_s14  ;;  %3120 = vrot.lane.b32.xlu0 %v3109_v16, %s4249_s17  ;;  %v621_v13 = vrot.slane %v5103_v11, 4  ;;  %v854_v16 = vrot.slane %v5111_v50, 4 }
 0x159   : > { %v5162_v27 = vpop.permute.xlu1 %1772  ;;  %v733_v22 = vpop.permute.xlu0 %732 }
 0x15a   : > { %v736_v23 = vrot.slane %v733_v22, 4 }
 0x15b   : > { %3459 = vrot.lane.b32.xlu1 %v3444_v59, %s4247_s29  ;;  %2893 = vrot.lane.b32.xlu0 %v2888_v32, %s4251_s10  ;;  %s4057_s10 = sshll.u32 %s5440_s28, 4 }
 0x15c   : > { %s318_s26 = scalar_lea.vmem %s5423_s6, %s4057_s10 }
 0x15d   : > { %v5168_v20 = vpop.permute.xlu1 %2204  ;;  %v5170_v31 = vpop.permute.xlu0 %961 }
 0x15e   : > { %v2209_v18 = vrot.slane %v5168_v20, 4  ;;  %v967_v32 = vrot.slane %v5170_v31, 4 }
 0x15f   : > { %3234 = vrot.lane.b32.xlu1 %v3229_v8, %s4250_s22  ;;  %3122 = vrot.lane.b32.xlu0 %v3117_v28, %s4249_s17 }
 0x160   : > { %v2213_v60 = vsel %vm503_vm7, %v2209_v18, %v2210_v19 }
 0x161   : > { %v2214_v39 = vsel %vm1739_vm8, %v5168_v20, %v2213_v60  ;;  %v5182_v7 = vpop.permute.xlu1 %2314  ;;  %v5185_v1 = vpop.permute.xlu0 %1190 }
 0x162   : > { %2218 = vst [vmem:[#allocation3 + $0x78] sm:$0xcc] %v2214_v39 }
 0x163   : > { %3463 = vrot.lane.b32.xlu1 %v3458_v38, %s4247_s29  ;;  %3232 = vrot.lane.b32.xlu0 %v3222_v21, %s4250_s22  ;;  %v1196_v21 = vrot.slane %v5185_v1, 4 }
 0x165   : > { %v5189_v43 = vpop.permute.xlu1 %2543  ;;  %v966_v47 = vpop.permute.xlu0 %965 }
 0x166   : > { %v969_v8 = vrot.slane %v966_v47, 4 }
 0x167   : > { %3349 = vrot.lane.b32.xlu0 %v3338_v48, %s4248_s14 }
 0x169   : > { %v497_v56 = vpop.permute.xlu1 %496  ;;  %v1195_v63 = vpop.permute.xlu0 %1194 }
 0x16a   : > { %v501_v53 = vrot.slane %v497_v56, 4  ;;  %v1198_v40 = vrot.slane %v1195_v63, 4 }
 0x16b   : > { %3461 = vrot.lane.b32.xlu0 %v3451_v33, %s4247_s29 }
 0x16c   : > { %v504_v4 = vsel %vm503_vm7, %v500_v54, %v501_v53  ;;  %v507_v17 = vsel %vm503_vm7, %v501_v53, %v502_v55  ;;  %v1085_v55 = vrot.slane %v5127_v57, 4 }
 0x16d   : > { %v506_v5 = vsel %vm505_vm13, %v5131_v45, %v504_v4  ;;  %v508_v12 = vsel %vm505_vm13, %v497_v56, %v507_v17  ;;  %v731_v35 = vpop.permute.xlu1 %730  ;;  %v5206_v15 = vpop.permute.xlu0 %1419 }
 0x16e   : > { %511 = vst [vmem:[#allocation3] sm:$0x33] %v506_v5  ;;  %512 = vst [vmem:[#allocation3 + $0x8] sm:$0x33] %v508_v12  ;;  %v735_v52 = vrot.slane %v731_v35, 4  ;;  %v1314_v5 = vrot.slane %v5139_v3, 4 }
 0x16f   : > { %3351 = vrot.lane.b32.xlu0 %v3346_v51, %s4248_s14 }
 0x170   : > { %v737_v34 = vsel %vm503_vm7, %v734_v62, %v735_v52  ;;  %v740_v46 = vsel %vm503_vm7, %v735_v52, %v736_v23  ;;  %v1425_v52 = vrot.slane %v5206_v15, 4 }
 0x171   : > { %v739_v45 = vsel %vm738_vm12, %v5146_v42, %v737_v34  ;;  %v741_v9 = vsel %vm738_vm12, %v731_v35, %v740_v46  ;;  %v619_v29 = vpop.permute.xlu1 %618  ;;  %v5218_v6 = vpop.permute.xlu0 %1651 }
 0x172   : > { %744 = vst [vmem:[#allocation3 + $0x10] sm:$0x33] %v739_v45  ;;  %745 = vst [vmem:[#allocation3 + $0x18] sm:$0x33] %v741_v9  ;;  %v622_v10 = vrot.slane %v619_v29, 4 }
 0x173   : > { %3508 = vperm.xlu0 %4086, %v3505_v25  }
 0x174   : > { %v626_v14 = vsel %vm503_vm7, %v621_v13, %v622_v10 }
 0x175   : > { %v627_v42 = vsel %vm624_vm5, %v5103_v11, %v626_v14  ;;  %v852_v49 = vpop.permute.xlu1 %851  ;;  %v1424_v26 = vpop.permute.xlu0 %1423 }
 0x176   : > { %631 = vst [vmem:[#allocation3 + $0x8] sm:$0xcc] %v627_v42  ;;  %v855_v59 = vrot.slane %v852_v49, 4  ;;  %v1427_v34 = vrot.slane %v1424_v26, 4  ;;  %v1657_v42 = vrot.slane %v5218_v6, 4 }
 0x178   : > { %v859_v24 = vsel %vm503_vm7, %v854_v16, %v855_v59 }
 0x179   : > { %v860_v0 = vsel %vm857_vm3, %v5111_v50, %v859_v24  ;;  %v964_v22 = vpop.permute.xlu1 %963  ;;  %v1656_v37 = vpop.permute.xlu0 %1655 }
 0x17a   : > { %864 = vst [vmem:[#allocation3 + $0x18] sm:$0xcc] %v860_v0  ;;  %v968_v61 = vrot.slane %v964_v22, 4  ;;  %v1659_v49 = vrot.slane %v1656_v37, 4 }
 0x17c   : > { %v970_v19 = vsel %vm503_vm7, %v967_v32, %v968_v61  ;;  %v972_v28 = vsel %vm503_vm7, %v968_v61, %v969_v8 }
 0x17d   : > { %v971_v60 = vsel %vm931_vm10, %v5170_v31, %v970_v19  ;;  %v973_v38 = vsel %vm931_vm10, %v964_v22, %v972_v28  ;;  %v1193_v39 = vpop.permute.xlu1 %1192  ;;  %v5238_v41 = vpop.permute.xlu0 %1884  ;;  %v1544_v19 = vrot.slane %v5153_v58, 4 }
 0x17e   : > { %976 = vst [vmem:[#allocation3 + $0x20] sm:$0x33] %v971_v60  ;;  %977 = vst [vmem:[#allocation3 + $0x28] sm:$0x33] %v973_v38  ;;  %v1197_v44 = vrot.slane %v1193_v39, 4 }
 0x180   : > { %v1199_v48 = vsel %vm503_vm7, %v1196_v21, %v1197_v44  ;;  %v1201_v47 = vsel %vm503_vm7, %v1197_v44, %v1198_v40  ;;  %v1777_v40 = vrot.slane %v5162_v27, 4 }
 0x181   : > { %v1200_v33 = vsel %vm698_vm6, %v5185_v1, %v1199_v48  ;;  %v1202_v31 = vsel %vm698_vm6, %v1193_v39, %v1201_v47  ;;  %v1083_v56 = vpop.permute.xlu1 %1082  ;;  %v4191_v36 = vld [vmem:[#allocation3 + $0xc] ss:$16 sps:$4 sm:$0xff]   ;;  %v4193_v54 = vld [vmem:[#allocation3 + $0x8] ss:$16 sps:$4 sm:$0xff]   ;;  %v5246_v63 = vpop.permute.xlu0 %2085 }
 0x182   : > { %1205 = vst [vmem:[#allocation3 + $0x30] sm:$0x33] %v1200_v33  ;;  %1206 = vst [vmem:[#allocation3 + $0x38] sm:$0x33] %v1202_v31  ;;  %v1086_v53 = vrot.slane %v1083_v56, 4  ;;  %3705 = vmatprep.subr.bf16.mxu1 %v4191_v36  ;;  %v1890_v36 = vrot.slane %v5238_v41, 4 }
 0x183   : > { %3706 = vmatpush1.bf16.msra.mxu1 %v4193_v54 }
 0x184   : > { %v1089_v4 = vsel %vm503_vm7, %v1085_v55, %v1086_v53 }
 0x185   : > { %v1090_v1 = vsel %vm816_vm2, %v5127_v57, %v1089_v4  ;;  %v1312_v17 = vpop.permute.xlu1 %1311  ;;  %v5254_v12 = vpop.permute.xlu0 %1888 }
 0x186   : > { %1094 = vst [vmem:[#allocation3 + $0x28] sm:$0xcc] %v1090_v1  ;;  %v1315_v35 = vrot.slane %v1312_v17, 4  ;;  %v1892_v54 = vrot.slane %v5254_v12, 4 }
 0x188   : > { %v1318_v51 = vsel %vm503_vm7, %v1314_v5, %v1315_v35 }
 0x189   : > { %v1319_v62 = vsel %vm583_vm1, %v5139_v3, %v1318_v51  ;;  %v1422_v23 = vpop.permute.xlu1 %1421  ;;  %v5262_v46 = vpop.permute.xlu0 %2433 }
 0x18a   : > { %1323 = vst [vmem:[#allocation3 + $0x38] sm:$0xcc] %v1319_v62  ;;  %v1426_v45 = vrot.slane %v1422_v23, 4 }
 0x18c   : > { %v1428_v9 = vsel %vm503_vm7, %v1425_v52, %v1426_v45  ;;  %v1430_v25 = vsel %vm503_vm7, %v1426_v45, %v1427_v34  ;;  %v2091_v52 = vrot.slane %v5246_v63, 4 }
 0x18d   : > { %v1429_v29 = vsel %vm464_vm4, %v5206_v15, %v1428_v9  ;;  %v1431_v10 = vsel %vm464_vm4, %v1422_v23, %v1430_v25  ;;  %v1654_v14 = vpop.permute.xlu1 %1653  ;;  %v5270_v59 = vpop.permute.xlu0 %2662  ;;  %v2093_v23 = vrot.slane %v5080_v30, 4 }
 0x18e   : > { %1434 = vst [vmem:[#allocation3 + $0x40] sm:$0x33] %v1429_v29  ;;  %1435 = vst [vmem:[#allocation3 + $0x48] sm:$0x33] %v1431_v10  ;;  %v1658_v26 = vrot.slane %v1654_v14, 4 }
 0x190   : > { %v1660_v24 = vsel %vm503_vm7, %v1657_v42, %v1658_v26  ;;  %v1663_v0 = vsel %vm503_vm7, %v1658_v26, %v1659_v49 }
 0x191   : > { %v1662_v22 = vsel %vm1661_vm11, %v5218_v6, %v1660_v24  ;;  %v1664_v15 = vsel %vm1661_vm11, %v1654_v14, %v1663_v0  ;;  %v1542_v32 = vpop.permute.xlu1 %1541  ;;  %v4194_v8 = vld [vmem:[#allocation3 + $0x2c] ss:$16 sps:$4 sm:$0xff]   ;;  %v4196_v61 = vld [vmem:[#allocation3 + $0x28] ss:$16 sps:$4 sm:$0xff]   ;;  %v615_v37 = vpop.permute.xlu0 %614 }
 0x192   : > { %1667 = vst [vmem:[#allocation3 + $0x50] sm:$0x33] %v1662_v22  ;;  %1668 = vst [vmem:[#allocation3 + $0x58] sm:$0x33] %v1664_v15  ;;  %v1545_v28 = vrot.slane %v1542_v32, 4  ;;  %v620_v60 = vrot.slane %v615_v37, 4  ;;  %3707 = vmatprep.subr.bf16.mxu1 %v4194_v8 }
 0x193   : > { %3708 = vmatpush1.bf16.msra.mxu1 %v4196_v61  ;;  %v2667_v61 = vrot.slane %v5270_v59, 4 }
 0x194   : > { %v1549_v38 = vsel %vm503_vm7, %v1544_v19, %v1545_v28  ;;  %v623_v6 = vsel %vm503_vm7, %v620_v60, %v621_v13 }
 0x195   : > { %v1550_v39 = vsel %vm1547_vm14, %v5153_v58, %v1549_v38  ;;  %v1775_v21 = vpop.permute.xlu1 %1774  ;;  %v625_v44 = vsel %vm624_vm5, %v615_v37, %v623_v6  ;;  %v848_v48 = vpop.permute.xlu0 %847 }
 0x196   : > { %1554 = vst [vmem:[#allocation3 + $0x48] sm:$0xcc] %v1550_v39  ;;  %v1778_v47 = vrot.slane %v1775_v21, 4  ;;  %630 = vst [vmem:[#allocation3] sm:$0xcc] %v625_v44  ;;  %v853_v33 = vrot.slane %v848_v48, 4 }
 0x198   : > { %v1782_v31 = vsel %vm503_vm7, %v1777_v40, %v1778_v47  ;;  %v856_v11 = vsel %vm503_vm7, %v853_v33, %v854_v16 }
 0x199   : > { %v1783_v13 = vsel %vm1780_vm9, %v5162_v27, %v1782_v31  ;;  %v1887_v56 = vpop.permute.xlu1 %1886  ;;  %v858_v53 = vsel %vm857_vm3, %v848_v48, %v856_v11  ;;  %v1079_v4 = vpop.permute.xlu0 %1078 }
 0x19a   : > { %1787 = vst [vmem:[#allocation3 + $0x58] sm:$0xcc] %v1783_v13  ;;  %v1891_v1 = vrot.slane %v1887_v56, 4  ;;  %863 = vst [vmem:[#allocation3 + $0x10] sm:$0xcc] %v858_v53  ;;  %v1084_v17 = vrot.slane %v1079_v4, 4 }
 0x19c   : > { %v1893_v35 = vsel %vm503_vm7, %v1890_v36, %v1891_v1  ;;  %v1896_v50 = vsel %vm503_vm7, %v1891_v1, %v1892_v54  ;;  %v1087_v16 = vsel %vm503_vm7, %v1084_v17, %v1085_v55  ;;  %v2322_v36 = vrot.slane %v5095_v2, 4 }
 0x19d   : > { %v1895_v51 = vsel %vm1894_vm0, %v5238_v41, %v1893_v35  ;;  %v1897_v12 = vsel %vm1894_vm0, %v1887_v56, %v1896_v50  ;;  %v2088_v62 = vpop.permute.xlu1 %2087  ;;  %v1088_v34 = vsel %vm816_vm2, %v1079_v4, %v1087_v16  ;;  %v1308_v45 = vpop.permute.xlu0 %1307  ;;  %v2438_v41 = vrot.slane %v5262_v46, 4 }
 0x19e   : > { %1900 = vst [vmem:[#allocation3 + $0x60] sm:$0x33] %v1895_v51  ;;  %1901 = vst [vmem:[#allocation3 + $0x68] sm:$0x33] %v1897_v12  ;;  %v2092_v9 = vrot.slane %v2088_v62, 4  ;;  %v1313_v57 = vrot.slane %v1308_v45, 4 }
 0x19f   : > { %1093 = vst [vmem:[#allocation3 + $0x20] sm:$0xcc] %v1088_v34  ;;  %vm5435_vm0 = vcmask 973824   ;;  %v2320_v54 = vrot.slane %v5182_v7, 4  ;;  %v2549_v51 = vrot.slane %v5189_v43, 4 }
 0x1a0   : > { %v2094_v55 = vsel %vm503_vm7, %v2091_v52, %v2092_v9  ;;  %v2096_v25 = vsel %vm503_vm7, %v2092_v9, %v2093_v23  ;;  %v1316_v30 = vsel %vm503_vm7, %v1313_v57, %v1314_v5 }
 0x1a1   : > { %v2095_v29 = vsel %vm1854_vm15, %v5246_v63, %v2094_v55  ;;  %v2097_v10 = vsel %vm1854_vm15, %v2088_v62, %v2096_v25  ;;  %v2432_v14 = vpop.permute.xlu1 %2431  ;;  %v4200_v42 = vld [vmem:[#allocation3 + $0x4c] ss:$16 sps:$4 sm:$0xff]   ;;  %v4202_v49 = vld [vmem:[#allocation3 + $0x48] ss:$16 sps:$4 sm:$0xff]   ;;  %v1317_v26 = vsel %vm583_vm1, %v1308_v45, %v1316_v30  ;;  %v1538_v24 = vpop.permute.xlu0 %1537  ;;  %v4197_v0 = vld [vmem:[#allocation3 + $0x4] ss:$16 sps:$4 sm:$0xff]  }
 0x1a2   : > { %2100 = vst [vmem:[#allocation3 + $0x70] sm:$0x33] %v2095_v29  ;;  %2101 = vst [vmem:[#allocation3 + $0x78] sm:$0x33] %v2097_v10  ;;  %v4199_v22 = vld [vmem:[#allocation3] ss:$16 sps:$4 sm:$0xff]   ;;  %3709 = vmatprep.subr.bf16.mxu1 %v4200_v42  ;;  %3664 = vmatprep.subr.bf16.mxu0 %v4197_v0 }
 0x1a3   : > { %v2437_v15 = vrot.slane %v2432_v14, 4  ;;  %1322 = vst [vmem:[#allocation3 + $0x30] sm:$0xcc] %v1317_v26  ;;  %v1543_v3 = vrot.slane %v1538_v24, 4  ;;  %3710 = vmatpush1.bf16.msra.mxu1 %v4202_v49  ;;  %3665 = vmatpush1.bf16.msra.mxu0 %v4199_v22 }
 0x1a5   : > { %v2440_v63 = vsel %vm503_vm7, %v2437_v15, %v2438_v41  ;;  %v1546_v5 = vsel %vm503_vm7, %v1543_v3, %v1544_v19  ;;  %v2661_v8 = vpop.permute.xlu1 %2660  ;;  %v1771_v28 = vpop.permute.xlu0 %1770 }
 0x1a6   : > { %v2441_v32 = vsel %vm5435_vm0, %v2432_v14, %v2440_v63  ;;  %v1548_v37 = vsel %vm1547_vm14, %v1538_v24, %v1546_v5  ;;  %v2666_v60 = vrot.slane %v2661_v8, 4  ;;  %v1776_v38 = vrot.slane %v1771_v28, 4 }
 0x1a7   : > { %2446 = vst [vmem:[#allocation3 + $0x80] sm:$0xcc] %v2441_v32  ;;  %1553 = vst [vmem:[#allocation3 + $0x40] sm:$0xcc] %v1548_v37 }
 0x1a8   : > { %v2669_v6 = vsel %vm503_vm7, %v2666_v60, %v2667_v61  ;;  %v1779_v58 = vsel %vm503_vm7, %v1776_v38, %v1777_v40 }
 0x1a9   : > { %v2670_v19 = vsel %vm624_vm5, %v2661_v8, %v2669_v6  ;;  %v2548_v39 = vpop.permute.xlu1 %2547  ;;  %v4210_v21 = vld [vmem:[#allocation3 + $0x6c] ss:$16 sps:$4 sm:$0xff]   ;;  %v4212_v44 = vld [vmem:[#allocation3 + $0x68] ss:$16 sps:$4 sm:$0xff]   ;;  %v1781_v48 = vsel %vm1780_vm9, %v1771_v28, %v1779_v58  ;;  %v2203_v47 = vpop.permute.xlu0 %2202  ;;  %vm5436_vm9 = vcmask 982016  }
 0x1aa   : > { %2675 = vst [vmem:[#allocation3 + $0x90] sm:$0xcc] %v2670_v19  ;;  %v4203_v33 = vld [vmem:[#allocation3 + $0x24] ss:$16 sps:$4 sm:$0xff]   ;;  %v4205_v31 = vld [vmem:[#allocation3 + $0x20] ss:$16 sps:$4 sm:$0xff]   ;;  %3711 = vmatprep.subr.bf16.mxu1 %v4210_v21  ;;  %vm5437_vm11 = vmmov %vm5436_vm9 }
 0x1ab   : > { %1786 = vst [vmem:[#allocation3 + $0x50] sm:$0xcc] %v1781_v48  ;;  %v2208_v11 = vrot.slane %v2203_v47, 4  ;;  %3666 = vmatprep.subr.bf16.mxu0 %v4203_v33  ;;  %3712 = vmatpush1.bf16.msra.mxu1 %v4212_v44  ;;  %v2551_v2 = vrot.slane %v2548_v39, 4 }
 0x1ac   : > { %3667 = vmatpush1.bf16.msra.mxu0 %v4205_v31 }
 0x1ad   : > { %v2211_v27 = vsel %vm503_vm7, %v2208_v11, %v2209_v18  ;;  %v2773_v40 = vpop.permute.xlu1 %2772  ;;  %v2317_v56 = vpop.permute.xlu0 %2316 }
 0x1ae   : > { %v2212_v13 = vsel %vm1739_vm8, %v2203_v47, %v2211_v27  ;;  %v2321_v53 = vrot.slane %v2317_v56, 4  ;;  %vm5438_vm8 = vmmov %vm5435_vm0  ;;  %v2778_v22 = vrot.slane %v2773_v40, 4 }
 0x1af   : > { %2217 = vst [vmem:[#allocation3 + $0x70] sm:$0xcc] %v2212_v13 }
 0x1b0   : > { %v2323_v4 = vsel %vm503_vm7, %v2320_v54, %v2321_v53  ;;  %v2325_v1 = vsel %vm503_vm7, %v2321_v53, %v2322_v36 }
 0x1b1   : > { %v2890_v17 = vpop.permute.xlu1 %2889  ;;  %v2324_v20 = vsel %vm5436_vm9, %v5182_v7, %v2323_v4  ;;  %v2326_v18 = vsel %vm5437_vm11, %v2317_v56, %v2325_v1  ;;  %v2546_v35 = vpop.permute.xlu0 %2545 }
 0x1b2   : > { %v4213_v50 = vld [vmem:[#allocation3 + $0x44] ss:$16 sps:$4 sm:$0xff]   ;;  %v4215_v16 = vld [vmem:[#allocation3 + $0x40] ss:$16 sps:$4 sm:$0xff]   ;;  %2329 = vst [vmem:[#allocation3 + $0x80] sm:$0x33] %v2324_v20 }
 0x1b3   : > { %2330 = vst [vmem:[#allocation3 + $0x88] sm:$0x33] %v2326_v18  ;;  %v2550_v12 = vrot.slane %v2546_v35, 4  ;;  %3668 = vmatprep.subr.bf16.mxu0 %v4213_v50 }
 0x1b4   : > { %3669 = vmatpush1.bf16.msra.mxu0 %v4215_v16 }
 0x1b5   : > { %v2552_v62 = vsel %vm503_vm7, %v2549_v51, %v2550_v12  ;;  %v2554_v23 = vsel %vm503_vm7, %v2550_v12, %v2551_v2  ;;  %v3002_v52 = vpop.permute.xlu1 %3001  ;;  %v2436_v45 = vpop.permute.xlu0 %2435 }
 0x1b6   : > { %v2553_v7 = vsel %vm505_vm13, %v5189_v43, %v2552_v62  ;;  %v2555_v34 = vsel %vm505_vm13, %v2546_v35, %v2554_v23  ;;  %v4216_v9 = vld [vmem:[#allocation3 + $0x64] ss:$16 sps:$4 sm:$0xff]   ;;  %v4218_v57 = vld [vmem:[#allocation3 + $0x60] ss:$16 sps:$4 sm:$0xff]   ;;  %v2439_v55 = vrot.slane %v2436_v45, 4  ;;  %v3007_v39 = vrot.slane %v3002_v52, 4 }
 0x1b7   : > { %2558 = vst [vmem:[#allocation3 + $0x90] sm:$0x33] %v2553_v7  ;;  %2559 = vst [vmem:[#allocation3 + $0x98] sm:$0x33] %v2555_v34  ;;  %3670 = vmatprep.subr.bf16.mxu0 %v4216_v9 }
 0x1b8   : > { %v2442_v25 = vsel %vm503_vm7, %v2438_v41, %v2439_v55  ;;  %3671 = vmatpush1.bf16.msra.mxu0 %v4218_v57 }
 0x1b9   : > { %v3119_v30 = vpop.permute.xlu1 %3118  ;;  %v2443_v29 = vsel %vm5438_vm8, %v5262_v46, %v2442_v25  ;;  %v2665_v10 = vpop.permute.xlu0 %2664 }
 0x1ba   : > { %2447 = vst [vmem:[#allocation3 + $0x88] sm:$0xcc] %v2443_v29  ;;  %v2668_v43 = vrot.slane %v2665_v10, 4  ;;  %v3124_v27 = vrot.slane %v3119_v30, 4 }
 0x1bc   : > { %v2671_v14 = vsel %vm503_vm7, %v2667_v61, %v2668_v43 }
 0x1bd   : > { %v2777_v42 = vpop.permute.xlu1 %2776  ;;  %v2672_v49 = vsel %vm624_vm5, %v5270_v59, %v2671_v14  ;;  %v2775_v26 = vpop.permute.xlu0 %2774  ;;  %v2895_v59 = vrot.slane %v2890_v17, 4 }
 0x1be   : > { %v4219_v24 = vld [vmem:[#allocation3 + $0x84] ss:$16 sps:$4 sm:$0xff]   ;;  %v4221_v0 = vld [vmem:[#allocation3 + $0x80] ss:$16 sps:$4 sm:$0xff]   ;;  %v2780_v41 = vrot.slane %v2777_v42, 4  ;;  %v2779_v15 = vrot.slane %v2775_v26, 4 }
 0x1bf   : > { %2676 = vst [vmem:[#allocation3 + $0x98] sm:$0xcc] %v2672_v49  ;;  %3672 = vmatprep.subr.bf16.mxu0 %v4219_v24 }
 0x1c0   : > { %v2781_v46 = vsel %vm503_vm7, %v2778_v22, %v2779_v15  ;;  %3673 = vmatpush1.bf16.msra.mxu0 %v4221_v0  ;;  %v2783_v3 = vsel %vm503_vm7, %v2779_v15, %v2780_v41 }
 0x1c1   : > { %v3006_v63 = vpop.permute.xlu1 %3005  ;;  %v2782_v5 = vsel %vm738_vm12, %v2773_v40, %v2781_v46  ;;  %v2892_v32 = vpop.permute.xlu0 %2891  ;;  %v2784_v8 = vsel %vm738_vm12, %v2775_v26, %v2783_v3 }
 0x1c2   : > { %2787 = vst [vmem:[#allocation3 + $0xa0] sm:$0x33] %v2782_v5  ;;  %v2896_v61 = vrot.slane %v2892_v32, 4  ;;  %2788 = vst [vmem:[#allocation3 + $0xa8] sm:$0x33] %v2784_v8  ;;  %v3009_v28 = vrot.slane %v3006_v63, 4 }
 0x1c4   : > { %v2898_v37 = vsel %vm503_vm7, %v2895_v59, %v2896_v61  ;;  %v3476_v59 = vld [vmem:[%s5421_s4] sm:$0x3] }
 0x1c5   : > { %v3231_v60 = vpop.permute.xlu1 %3230  ;;  %v2899_v38 = vsel %vm857_vm3, %v2890_v17, %v2898_v37  ;;  %v3004_v6 = vpop.permute.xlu0 %3003 }
 0x1c6   : > { %v4222_v58 = vld [vmem:[#allocation3 + $0x8c] ss:$16 sps:$4 sm:$0xff]   ;;  %v4224_v19 = vld [vmem:[#allocation3 + $0x88] ss:$16 sps:$4 sm:$0xff]   ;;  %2904 = vst [vmem:[#allocation3 + $0xa0] sm:$0xcc] %v2899_v38 }
 0x1c7   : > { %v3008_v21 = vrot.slane %v3004_v6, 4  ;;  %3713 = vmatprep.subr.bf16.mxu1 %v4222_v58  ;;  %v3236_v62 = vrot.slane %v3231_v60, 4 }
 0x1c8   : > { %3714 = vmatpush1.bf16.msra.mxu1 %v4224_v19 }
 0x1c9   : > { %v3010_v44 = vsel %vm503_vm7, %v3007_v39, %v3008_v21  ;;  %v3012_v48 = vsel %vm503_vm7, %v3008_v21, %v3009_v28  ;;  %v3348_v47 = vpop.permute.xlu1 %3347  ;;  %v3121_v11 = vpop.permute.xlu0 %3120 }
 0x1ca   : > { %v3011_v33 = vsel %vm931_vm10, %v3002_v52, %v3010_v44  ;;  %v3013_v31 = vsel %vm931_vm10, %v3004_v6, %v3012_v48  ;;  %v3125_v40 = vrot.slane %v3121_v11, 4  ;;  %v3353_v57 = vrot.slane %v3348_v47, 4 }
 0x1cb   : > { %3016 = vst [vmem:[#allocation3 + $0xb0] sm:$0x33] %v3011_v33  ;;  %3017 = vst [vmem:[#allocation3 + $0xb8] sm:$0x33] %v3013_v31 }
 0x1cc   : > { %v3127_v13 = vsel %vm503_vm7, %v3124_v27, %v3125_v40 }
 0x1cd   : > { %v3460_v56 = vpop.permute.xlu1 %3459  ;;  %v3128_v36 = vsel %vm816_vm2, %v3119_v30, %v3127_v13  ;;  %v2894_v54 = vpop.permute.xlu0 %2893 }
 0x1ce   : > { %3133 = vst [vmem:[#allocation3 + $0xb0] sm:$0xcc] %v3128_v36  ;;  %v2897_v53 = vrot.slane %v2894_v54, 4  ;;  %v3465_v42 = vrot.slane %v3460_v56, 4 }
 0x1d0   : > { %v2900_v4 = vsel %vm503_vm7, %v2896_v61, %v2897_v53 }
 0x1d1   : > { %v2901_v1 = vsel %vm857_vm3, %v2892_v32, %v2900_v4  ;;  %v3123_v17 = vpop.permute.xlu0 %3122  ;;  %v3235_v20 = vpop.permute.xlu1 %3234  ;;  %vm3647_vm3 = vcmask 883712  }
 0x1d2   : > { %2905 = vst [vmem:[#allocation3 + $0xa8] sm:$0xcc] %v2901_v1  ;;  %v3126_v18 = vrot.slane %v3123_v17, 4  ;;  %v3238_v50 = vrot.slane %v3235_v20, 4 }
 0x1d4   : > { %v3129_v35 = vsel %vm503_vm7, %v3125_v40, %v3126_v18 }
 0x1d5   : > { %v3130_v16 = vsel %vm816_vm2, %v3121_v11, %v3129_v35  ;;  %v3233_v51 = vpop.permute.xlu0 %3232  ;;  %v4225_v2 = vld [vmem:[#allocation3 + $0xa4] ss:$16 sps:$4 sm:$0xff]   ;;  %v4227_v12 = vld [vmem:[#allocation3 + $0xa0] ss:$16 sps:$4 sm:$0xff]   ;;  %v3464_v25 = vpop.permute.xlu1 %3463  ;;  %vm3651_vm2 = vcmask 1045504  }
 0x1d6   : > { %3134 = vst [vmem:[#allocation3 + $0xb8] sm:$0xcc] %v3130_v16  ;;  %v3237_v23 = vrot.slane %v3233_v51, 4  ;;  %3674 = vmatprep.subr.bf16.mxu0 %v4225_v2  ;;  %v3467_v49 = vrot.slane %v3464_v25, 4 }
 0x1d7   : > { %3675 = vmatpush1.bf16.msra.mxu0 %v4227_v12 }
 0x1d8   : > { %v3239_v52 = vsel %vm503_vm7, %v3236_v62, %v3237_v23  ;;  %v3241_v7 = vsel %vm503_vm7, %v3237_v23, %v3238_v50 }
 0x1d9   : > { %v3240_v34 = vsel %vm698_vm6, %v3231_v60, %v3239_v52  ;;  %v3242_v45 = vsel %vm698_vm6, %v3233_v51, %v3241_v7  ;;  %v3350_v9 = vpop.permute.xlu0 %3349 }
 0x1da   : > { %3245 = vst [vmem:[#allocation3 + $0xc0] sm:$0x33] %v3240_v34  ;;  %3246 = vst [vmem:[#allocation3 + $0xc8] sm:$0x33] %v3242_v45  ;;  %v3354_v55 = vrot.slane %v3350_v9, 4 }
 0x1dc   : > { %v3356_v30 = vsel %vm503_vm7, %v3353_v57, %v3354_v55 }
 0x1dd   : > { %v3357_v29 = vsel %vm583_vm1, %v3348_v47, %v3356_v30  ;;  %v3462_v10 = vpop.permute.xlu0 %3461  ;;  %v4228_v43 = vld [vmem:[#allocation3 + $0xac] ss:$16 sps:$4 sm:$0xff]   ;;  %v4230_v14 = vld [vmem:[#allocation3 + $0xa8] ss:$16 sps:$4 sm:$0xff]  }
 0x1de   : > { %3362 = vst [vmem:[#allocation3 + $0xc0] sm:$0xcc] %v3357_v29  ;;  %v3466_v26 = vrot.slane %v3462_v10, 4  ;;  %3715 = vmatprep.subr.bf16.mxu1 %v4228_v43 }
 0x1df   : > { %3716 = vmatpush1.bf16.msra.mxu1 %v4230_v14 }
 0x1e0   : > { %v3468_v24 = vsel %vm503_vm7, %v3465_v42, %v3466_v26  ;;  %v3470_v0 = vsel %vm503_vm7, %v3466_v26, %v3467_v49 }
 0x1e1   : > { %v3469_v41 = vsel %vm464_vm4, %v3460_v56, %v3468_v24  ;;  %v3471_v22 = vsel %vm464_vm4, %v3462_v10, %v3470_v0  ;;  %v3352_v15 = vpop.permute.xlu0 %3351 }
 0x1e2   : > { %3474 = vst [vmem:[#allocation3 + $0xd0] sm:$0x33] %v3469_v41  ;;  %3475 = vst [vmem:[#allocation3 + $0xd8] sm:$0x33] %v3471_v22  ;;  %v3355_v46 = vrot.slane %v3352_v15, 4 }
 0x1e4   : > { %v3358_v3 = vsel %vm503_vm7, %v3354_v55, %v3355_v46 }
 0x1e5   : > { %v3359_v63 = vsel %vm583_vm1, %v3350_v9, %v3358_v3  ;;  %vm3756_vm1 = vcmask 3072  }
 0x1e6   : > { %3363 = vst [vmem:[#allocation3 + $0xc8] sm:$0xcc] %v3359_v63 }
 0x1e9   : > { %v4231_v5 = vld [vmem:[#allocation3 + $0xc4] ss:$16 sps:$4 sm:$0x3f]   ;;  %v4233_v32 = vld [vmem:[#allocation3 + $0xc0] ss:$16 sps:$4 sm:$0x3f]  }
 0x1ea   : > { %4050 = vmatprep.subr.msk.bf16.mxu0 %vm3651_vm2, %v4231_v5  ;;  %v3653_v8 = vsel %vm3651_vm2, %v4233_v32, 0 }
 0x1eb   : > { %3677 = vmatpush1.bf16.msra.mxu0 %v3653_v8 }
 0x1ed   : > { %v4234_v61 = vld [vmem:[#allocation3 + $0xcc] ss:$16 sps:$4 sm:$0x3f]   ;;  %v4236_v37 = vld [vmem:[#allocation3 + $0xc8] ss:$16 sps:$4 sm:$0x3f]  }
 0x1ee   : > { %4052 = vmatprep.subr.msk.bf16.mxu1 %vm3651_vm2, %v4234_v61  ;;  %4051 = vmatmul.mubr.msk.bf16.vlgmr.msra.gmra.mrb[0].mxu0 %vm3647_vm3, %v3476_v59  ;;  %v3659_v28 = vsel %vm3651_vm2, %v4236_v37, 0 }
 0x1ef   : > { %3718 = vmatpush1.bf16.msra.mxu1 %v3659_v28 }
 0x1f2   : > { %4053 = vmatmul.mubr.msk.bf16.vlgmr.msra.gmra.mrb[0].mxu1 %vm3647_vm3, %v3476_v59  ;;  %v3509_v60 = vpop.permute.xlu0 %3508 }
 0x2c1   : > { %v3698_v38 = vpop.f32.mrb[0].mxu0 }
 0x2c2   : > { %v3699_v6 = vadd.f32 %v3698_v38, %v3509_v60  ;;  %v3700_v58 = vpop.f32.mrb[1].mxu0 }
 0x2c3   : > { %v3701_v19 = vadd.f32 %v3700_v58, %v3509_v60  ;;  %v3702_v39 = vpop.f32.mrb[2].mxu0 }
 0x2c4   : > { %v3747_v21 = vsel %vm503_vm7, %v3699_v6, 0.0  ;;  %v3758_v44 = vmul.f32 %v3699_v6, %v3699_v6  ;;  %v3703_v48 = vpop.f32.mrb[3].mxu0 }
 0x2c5   : > { %v3748_v47 = vsel %vm503_vm7, %v3701_v19, 0.0  ;;  %v3759_v33 = vmul.f32 %v3701_v19, %v3701_v19  ;;  %v3776_v31 = vcombine.low %v3699_v6, %v3701_v19  ;;  %v3739_v11 = vpop.f32.mrb[0].mxu1 }
 0x2c6   : > { %v3762_v27 = vsel %vm503_vm7, %v3758_v44, 0.0  ;;  %v3749_v40 = vadd.f32 %v3748_v47, %v3747_v21  ;;  %v3740_v13 = vadd.f32 %v3739_v11, %v3509_v60  ;;  %v3741_v56 = vpop.f32.mrb[1].mxu1 }
 0x2c7   : > { %v3763_v36 = vsel %vm503_vm7, %v3759_v33, 0.0  ;;  %3780 = vst [vmem:[%s318_s26] sm:$0xff] %v3776_v31  ;;  %v3742_v54 = vadd.f32 %v3741_v56, %v3509_v60  ;;  %v3743_v53 = vpop.f32.mrb[2].mxu1 }
 0x2c8   : > { %v3750_v4 = vsel %vm503_vm7, %v3740_v13, 0.0  ;;  %v3760_v1 = vmul.f32 %v3740_v13, %v3740_v13  ;;  %v3744_v17 = vpop.f32.mrb[3].mxu1  ;;  %v3764_v20 = vadd.f32 %v3763_v36, %v3762_v27 }
 0x2c9   : > { %v3761_v18 = vmul.f32 %v3742_v54, %v3742_v54  ;;  %v3777_v35 = vcombine.low %v3740_v13, %v3742_v54  ;;  %v3751_v50 = vadd.f32 %v3750_v4, %v3749_v40  ;;  %v3752_v16 = vsel %vm503_vm7, %v3742_v54, 0.0 }
 0x2ca   : > { %v3765_v51 = vsel %vm503_vm7, %v3760_v1, 0.0 }
 0x2cb   : > { %3781 = vst [vmem:[%s318_s26 + $0x8] sm:$0xff] %v3777_v35  ;;  %v3753_v2 = vadd.f32 %v3752_v16, %v3751_v50  ;;  %v3766_v12 = vadd.f32 %v3765_v51, %v3764_v20  ;;  %v3767_v62 = vsel %vm503_vm7, %v3761_v18, 0.0 }
 0x2cd   : > { %3754 = vadd.xlane.f32.xlu1 %v3753_v2  ;;  %v3768_v23 = vadd.f32 %v3767_v62, %v3766_v12 }
 0x2cf   : > { %3769 = vadd.xlane.f32.xlu0 %v3768_v23 }
 0x35a   : > { %v3755_v52 = vpop.xlane.xlu1 %3754 }
 0x35b   : > { %3757 = vst.msk [vmem:[%s322_s25] sm:$0xf] %vm3756_vm1, %v3755_v52 }
 0x35c   : > { %v3770_v7 = vpop.xlane.xlu0 %3769 }
 0x35d   : > { %3771 = vst.msk [vmem:[%s326_s12] sm:$0xf] %vm3756_vm1, %v3770_v7 }
 0x35e PF: > { %s19_s27 = sadd.s32 1, %s4243_s27  }
 0x35f   : > { %p16_p4 = scmp.ge.s32.totalorder %s19_s27, 4  }
 0x361   :  { %18 = sbr.rel (!%p16_p4) target bundleno = 1 (0x1), region = 98 }

// kernel: up_forward.3
= control target key start
LH: loop header
LB: loop body
LE: loop exit
PB: predicated region body
PF: predicated region fallthrough
CT: control target
= control target key end

     0   :  { %s3872_s24 = smov 0   ;;  %s4776_s0 = inlined_call_operand.vmem [shape: f32[2,4,512], index: 0, kind: input, shape index: {}]   ;;  %s4777_s1 = inlined_call_operand.vmem [shape: f32[2,4,512], index: 1, kind: input, shape index: {}]   ;;  %s4778_s2 = inlined_call_operand.vmem [shape: bf16[27,512], index: 2, kind: input, shape index: {}]   ;;  %s4779_s3 = inlined_call_operand.vmem [shape: bf16[4,216], index: 3, kind: input, shape index: {}]   ;;  %s4780_s4 = inlined_call_operand.vmem [shape: f32[4,1], index: 4, kind: input, shape index: {}]   ;;  %s4781_s5 = inlined_call_operand.vmem [shape: bf16[2,4,512], index: 5, kind: output, shape index: {0}]   ;;  %s4782_s6 = inlined_call_operand.vmem [shape: f32[2,4,1], index: 6, kind: output, shape index: {1}]   ;;  %s4783_s7 = inlined_call_operand.vmem [shape: f32[2,4,1], index: 7, kind: output, shape index: {2}]  }
   0x1 LB: > { %s3414_s25 = sadd.s32 4294967295, %s3811_s24   ;;  %p3418_p0 = scmp.ge.s32.totalorder %s3811_s24, 1  ;;  %s3811_s24 = sphi %s3872_s24, %s18_s24  }
   0x2   : > { %p252_p1 = scmp.lt.s32.totalorder %s3811_s24, 3 }
   0x4   : > { %p253_p2 = pnand %p3418_p0, %p252_p1 }
   0x5   : > { %v395_v0 = vlaneseq (!%p253_p2)  ;;  %v566_v1 = vld [vmem:[%s4778_s2 + $0x8] sm:$0x22] (!%p253_p2)  ;;  %v380_v2 = vld [vmem:[%s4778_s2] sm:$0x11] (!%p253_p2)  ;;  %v381_v8 = vld [vmem:[%s4778_s2 + $0x8] sm:$0x11] (!%p253_p2) }
   0x6   : > { %256 = sbr.rel (%p253_p2) target bundleno = 783 (0x30f), region = 40  ;;  %v3445_v3 = vcombine.low (!%p253_p2), %v566_v1, %v566_v1  ;;  %v3446_v4 = vcombine.high (!%p253_p2), %v566_v1, %v566_v1  ;;  %v3431_v5 = vcombine.low (!%p253_p2), %v380_v2, %v380_v2  ;;  %v3432_v6 = vcombine.high (!%p253_p2), %v380_v2, %v380_v2  ;;  %v471_v7 = vld [vmem:[%s4778_s2] sm:$0x11] (!%p253_p2)  ;;  %v472_v13 = vld [vmem:[%s4778_s2 + $0x8] sm:$0x11] (!%p253_p2)  ;;  %s3813_s17 = smov (!%p253_p2), 57  }
   0x7   : > { %v3892_v9 = vshrl.u32 (!%p253_p2), %v395_v0, 7  ;;  %v3437_v10 = vcombine.low (!%p253_p2), %v471_v7, %v471_v7  ;;  %v3438_v11 = vcombine.high (!%p253_p2), %v471_v7, %v471_v7  ;;  %v3433_v12 = vcombine.low (!%p253_p2), %v381_v8, %v381_v8  ;;  %v565_v30 = vld [vmem:[%s4778_s2] sm:$0x22] (!%p253_p2)  ;;  %v656_v39 = vld [vmem:[%s4778_s2 + $0x8] sm:$0x22] (!%p253_p2)  ;;  %s3814_s18 = smov (!%p253_p2), 55  }
   0x8   : > { %v592_v14 = vpack.i.b16 (!%p253_p2), %v3445_v3, %v3445_v3  ;;  %v599_v15 = vpack.i.b16 (!%p253_p2), %v3446_v4, %v3446_v4  ;;  %v393_v16 = vpack.i.b16 (!%p253_p2), %v3431_v5, %v3431_v5  ;;  %v400_v17 = vpack.i.b16 (!%p253_p2), %v3432_v6, %v3432_v6  ;;  %v655_v47 = vld [vmem:[%s4778_s2] sm:$0x22] (!%p253_p2)  ;;  %v749_v53 = vld [vmem:[%s4778_s2] sm:$0x44] (!%p253_p2)  ;;  %v750_v62 = vld [vmem:[%s4778_s2 + $0x8] sm:$0x44] (!%p253_p2) }
   0x9   : > { %v3898_v18 = vsub.s32 (!%p253_p2), 1, %v3892_v9  ;;  %v3901_v19 = vsub.s32 (!%p253_p2), 0, %v3892_v9  ;;  %v484_v20 = vshrl.u32 (!%p253_p2), %v3437_v10, 16  ;;  %v492_v21 = vshrl.u32 (!%p253_p2), %v3438_v11, 16  ;;  %s3815_s27 = smov (!%p253_p2), 56   ;;  %s3816_s13 = smov (!%p253_p2), 63  }
   0xa   : > { %v3434_v22 = vcombine.high (!%p253_p2), %v381_v8, %v381_v8  ;;  %v407_v23 = vpack.i.b16 (!%p253_p2), %v3433_v12, %v3433_v12  ;;  %v3439_v24 = vcombine.low (!%p253_p2), %v472_v13, %v472_v13  ;;  %v3440_v25 = vcombine.high (!%p253_p2), %v472_v13, %v472_v13  ;;  %s3817_s16 = smov (!%p253_p2), 64   ;;  %s3818_s28 = smov (!%p253_p2), 65  }
   0xb   : > { %v597_v26 = vrot.slane (!%p253_p2), %v592_v14, %v3898_v18  ;;  %v604_v27 = vrot.slane (!%p253_p2), %v599_v15, %v3898_v18  ;;  %v398_v28 = vrot.slane (!%p253_p2), %v393_v16, %v3901_v19  ;;  %v405_v29 = vrot.slane (!%p253_p2), %v400_v17, %v3901_v19  ;;  %v838_v16 = vld [vmem:[%s4778_s2] sm:$0x44] (!%p253_p2)  ;;  %s3819_s10 = smov (!%p253_p2), 71   ;;  %s3820_s19 = smov (!%p253_p2), 72  }
   0xc   : > { %v485_v31 = vpack.i.b16 (!%p253_p2), %v484_v20, %v484_v20  ;;  %v493_v32 = vpack.i.b16 (!%p253_p2), %v492_v21, %v492_v21  ;;  %v412_v33 = vrot.slane (!%p253_p2), %v407_v23, %v3901_v19  ;;  %v414_v34 = vpack.i.b16 (!%p253_p2), %v3434_v22, %v3434_v22  ;;  %v839_v22 = vld [vmem:[%s4778_s2 + $0x8] sm:$0x44] (!%p253_p2)  ;;  %s3821_s26 = smov (!%p253_p2), 73   ;;  %s4784_s11 = smov (!%p253_p2), 119  }
   0xd   : > { %v3448_v35 = vcombine.low %v597_v26, %v604_v27  ;;  %v3435_v36 = vcombine.low %v398_v28, %v405_v29  ;;  %v500_v37 = vshrl.u32 %v3439_v24, 16  ;;  %v508_v38 = vshrl.u32 %v3440_v25, 16  ;;  %s4786_s21 = smov 120   ;;  %s4788_s8 = smov 121  }
   0xe   : > { %v490_v40 = vrot.slane %v485_v31, %v3901_v19  ;;  %v498_v41 = vrot.slane %v493_v32, %v3901_v19  ;;  %v419_v42 = vrot.slane %v414_v34, %v3901_v19  ;;  %v3443_v43 = vcombine.low %v565_v30, %v565_v30  ;;  %v930_v32 = vld [vmem:[%s4778_s2] sm:$0x88]  ;;  %s4790_s20 = smov 127   ;;  %s4792_s9 = smov 1  }
   0xf   : > { %617 = vrot.lane.b32.xlu1 %v3448_v35, %s3813_s17  ;;  %430 = vrot.lane.b32.xlu0 %v3435_v36, %s3814_s18  ;;  %v501_v44 = vpack.i.b16 %v500_v37, %v500_v37  ;;  %v509_v45 = vpack.i.b16 %v508_v38, %v508_v38  ;;  %v3444_v46 = vcombine.high %v565_v30, %v565_v30  ;;  %v3923_v48 = vsub.s32 2, %v3892_v9  ;;  %s3827_s23 = smov 7   ;;  %s3828_s15 = smov 8  }
  0x10   : > { %v3441_v49 = vcombine.low %v490_v40, %v498_v41  ;;  %v3436_v50 = vcombine.low %v412_v33, %v419_v42  ;;  %v578_v51 = vpack.i.b16 %v3443_v43, %v3443_v43  ;;  %v3451_v52 = vcombine.low %v656_v39, %v656_v39  ;;  %v931_v33 = vld [vmem:[%s4778_s2 + $0x8] sm:$0x88]  ;;  %s3829_s14 = smov 9   ;;  %p4167_p3 = scmp.lt.s32.totalorder %s3414_s25, 1 }
  0x11   : > { %v506_v54 = vrot.slane %v501_v44, %v3901_v19  ;;  %v514_v55 = vrot.slane %v509_v45, %v3901_v19  ;;  %v585_v56 = vpack.i.b16 %v3444_v46, %v3444_v46  ;;  %v3452_v57 = vcombine.high %v656_v39, %v656_v39 }
  0x12   : > { %v583_v58 = vrot.slane %v578_v51, %v3898_v18  ;;  %v684_v59 = vshrl.u32 %v3451_v52, 16  ;;  %v3449_v60 = vcombine.low %v655_v47, %v655_v47  ;;  %v3450_v61 = vcombine.high %v655_v47, %v655_v47  ;;  %s4810_s25 = smov (!%p4167_p3, %s3414_s25), 1 }
  0x13   : > { %525 = vrot.lane.b32.xlu1 %v3441_v49, %s3815_s27  ;;  %432 = vrot.lane.b32.xlu0 %v3436_v50, %s3814_s18  ;;  %v3442_v63 = vcombine.low %v506_v54, %v514_v55  ;;  %v590_v0 = vrot.slane %v585_v56, %v3898_v18  ;;  %v692_v1 = vshrl.u32 %v3452_v57, 16  ;;  %v3455_v2 = vcombine.low %v749_v53, %v749_v53  ;;  %v1018_v55 = vld [vmem:[%s4778_s2] sm:$0x88]  ;;  %s3658_s29 = sshll.u32 %s4810_s25, 4  ;;  %s3425_s30 = sshll.u32 %s4810_s25, 2 }
  0x14   : > { %v685_v3 = vpack.i.b16 %v684_v59, %v684_v59  ;;  %v668_v4 = vshrl.u32 %v3449_v60, 16  ;;  %v676_v5 = vshrl.u32 %v3450_v61, 16  ;;  %v3456_v6 = vcombine.high %v749_v53, %v749_v53  ;;  %v1019_v60 = vld [vmem:[%s4778_s2 + $0x8] sm:$0x88]  ;;  %s315_s22 = scalar_lea.vmem %s4782_s6, %s3425_s30 }
  0x15   : > { %v3447_v7 = vcombine.low %v583_v58, %v590_v0  ;;  %v693_v8 = vpack.i.b16 %v692_v1, %v692_v1  ;;  %v762_v10 = vpack.i.b16 %v3455_v2, %v3455_v2  ;;  %v3457_v11 = vcombine.low %v750_v62, %v750_v62  ;;  %v1110_v1 = vld [vmem:[%s4778_s2 + $0x10] sm:$0x11] }
  0x16   : > { %v690_v12 = vrot.slane %v685_v3, %v3898_v18  ;;  %v669_v13 = vpack.i.b16 %v668_v4, %v668_v4  ;;  %v677_v14 = vpack.i.b16 %v676_v5, %v676_v5  ;;  %v769_v15 = vpack.i.b16 %v3456_v6, %v3456_v6 }
  0x17   : > { %527 = vrot.lane.b32.xlu1 %v3442_v63, %s3815_s27  ;;  %615 = vrot.lane.b32.xlu0 %v3447_v7, %s3813_s17  ;;  %v698_v17 = vrot.slane %v693_v8, %v3898_v18  ;;  %v767_v20 = vrot.slane %v762_v10, %v3923_v48  ;;  %v3458_v21 = vcombine.high %v750_v62, %v750_v62  ;;  %v3949_v23 = vsub.s32 3, %v3892_v9 }
  0x18   : > { %v674_v24 = vrot.slane %v669_v13, %v3898_v18  ;;  %v682_v25 = vrot.slane %v677_v14, %v3898_v18  ;;  %v774_v26 = vrot.slane %v769_v15, %v3923_v48  ;;  %v776_v27 = vpack.i.b16 %v3457_v11, %v3457_v11  ;;  %v1111_v11 = vld [vmem:[%s4778_s2 + $0x18] sm:$0x11] }
  0x19   : > { %v3454_v28 = vcombine.low %v690_v12, %v698_v17  ;;  %v783_v29 = vpack.i.b16 %v3458_v21, %v3458_v21  ;;  %v3461_v30 = vcombine.low %v838_v16, %v838_v16  ;;  %v3462_v31 = vcombine.high %v838_v16, %v838_v16 }
  0x1a   : > { %v3453_v34 = vcombine.low %v674_v24, %v682_v25  ;;  %v3459_v35 = vcombine.low %v767_v20, %v774_v26  ;;  %v781_v36 = vrot.slane %v776_v27, %v3923_v48  ;;  %v3463_v37 = vcombine.low %v839_v22, %v839_v22 }
  0x1b   : > { %711 = vrot.lane.b32.xlu1 %v3454_v28, %s3816_s13  ;;  %v788_v38 = vrot.slane %v783_v29, %v3923_v48  ;;  %v851_v39 = vshrl.u32 %v3461_v30, 16  ;;  %v859_v40 = vshrl.u32 %v3462_v31, 16  ;;  %v3464_v41 = vcombine.high %v839_v22, %v839_v22  ;;  %v1198_v31 = vld [vmem:[%s4778_s2 + $0x10] sm:$0x11] }
  0x1c   : > { %709 = vrot.lane.b32.xlu0 %v3453_v34, %s3816_s13  ;;  %v867_v42 = vshrl.u32 %v3463_v37, 16  ;;  %v3467_v43 = vcombine.low %v930_v32, %v930_v32  ;;  %v3468_v44 = vcombine.high %v930_v32, %v930_v32  ;;  %v3469_v45 = vcombine.low %v931_v33, %v931_v33 }
  0x1d   : > { %v3460_v46 = vcombine.low %v781_v36, %v788_v38  ;;  %v852_v47 = vpack.i.b16 %v851_v39, %v851_v39  ;;  %v860_v49 = vpack.i.b16 %v859_v40, %v859_v40  ;;  %v875_v50 = vshrl.u32 %v3464_v41, 16  ;;  %v1199_v36 = vld [vmem:[%s4778_s2 + $0x18] sm:$0x11] }
  0x1e   : > { %v868_v51 = vpack.i.b16 %v867_v42, %v867_v42  ;;  %v943_v52 = vpack.i.b16 %v3467_v43, %v3467_v43  ;;  %v950_v53 = vpack.i.b16 %v3468_v44, %v3468_v44  ;;  %v3470_v54 = vcombine.high %v931_v33, %v931_v33 }
  0x1f   : > { %801 = vrot.lane.b32.xlu1 %v3460_v46, %s3817_s16  ;;  %v857_v56 = vrot.slane %v852_v47, %v3923_v48  ;;  %v865_v57 = vrot.slane %v860_v49, %v3923_v48  ;;  %v876_v58 = vpack.i.b16 %v875_v50, %v875_v50  ;;  %v957_v59 = vpack.i.b16 %v3469_v45, %v3469_v45  ;;  %v1292_v45 = vld [vmem:[%s4778_s2 + $0x10] sm:$0x22] }
  0x20   : > { %799 = vrot.lane.b32.xlu0 %v3459_v35, %s3817_s16  ;;  %v873_v61 = vrot.slane %v868_v51, %v3923_v48  ;;  %v948_v62 = vrot.slane %v943_v52, %v3949_v23  ;;  %v955_v63 = vrot.slane %v950_v53, %v3949_v23  ;;  %v964_v0 = vpack.i.b16 %v3470_v54, %v3470_v54  ;;  %v1293_v51 = vld [vmem:[%s4778_s2 + $0x18] sm:$0x22] }
  0x21   : > { %v3465_v2 = vcombine.low %v857_v56, %v865_v57  ;;  %v881_v3 = vrot.slane %v876_v58, %v3923_v48  ;;  %v962_v4 = vrot.slane %v957_v59, %v3949_v23  ;;  %v3473_v5 = vcombine.low %v1018_v55, %v1018_v55 }
  0x22   : > { %v3471_v6 = vcombine.low %v948_v62, %v955_v63  ;;  %v969_v7 = vrot.slane %v964_v0, %v3949_v23  ;;  %v3474_v8 = vcombine.high %v1018_v55, %v1018_v55  ;;  %v3475_v10 = vcombine.low %v1019_v60, %v1019_v60 }
  0x23   : > { %v3466_v12 = vcombine.low %v873_v61, %v881_v3  ;;  %v1031_v13 = vshrl.u32 %v3473_v5, 16  ;;  %v3476_v14 = vcombine.high %v1019_v60, %v1019_v60  ;;  %v3479_v15 = vcombine.low %v1110_v1, %v1110_v1 }
  0x24   : > { %892 = vrot.lane.b32.xlu0 %v3465_v2, %s3818_s28  ;;  %v3472_v16 = vcombine.low %v962_v4, %v969_v7  ;;  %v1039_v17 = vshrl.u32 %v3474_v8, 16  ;;  %v1047_v20 = vshrl.u32 %v3475_v10, 16  ;;  %v3480_v21 = vcombine.high %v1110_v1, %v1110_v1  ;;  %v1382_v4 = vld [vmem:[%s4778_s2 + $0x10] sm:$0x22]  ;;  %v1383_v10 = vld [vmem:[%s4778_s2 + $0x18] sm:$0x22] }
  0x25   : > { %894 = vrot.lane.b32.xlu1 %v3466_v12, %s3818_s28  ;;  %v1032_v22 = vpack.i.b16 %v1031_v13, %v1031_v13  ;;  %v1055_v24 = vshrl.u32 %v3476_v14, 16  ;;  %v1123_v25 = vpack.i.b16 %v3479_v15, %v3479_v15  ;;  %v3481_v26 = vcombine.low %v1111_v11, %v1111_v11  ;;  %v1476_v15 = vld [vmem:[%s4778_s2 + $0x10] sm:$0x44] }
  0x26   : > { %v1040_v27 = vpack.i.b16 %v1039_v17, %v1039_v17  ;;  %v1048_v28 = vpack.i.b16 %v1047_v20, %v1047_v20  ;;  %v1130_v29 = vpack.i.b16 %v3480_v21, %v3480_v21  ;;  %v3482_v30 = vcombine.high %v1111_v11, %v1111_v11 }
  0x27   : > { %v1037_v32 = vrot.slane %v1032_v22, %v3949_v23  ;;  %v1056_v33 = vpack.i.b16 %v1055_v24, %v1055_v24  ;;  %v1128_v34 = vrot.slane %v1123_v25, %v3901_v19  ;;  %v1137_v35 = vpack.i.b16 %v3481_v26, %v3481_v26 }
  0x28   : > { %980 = vrot.lane.b32.xlu0 %v3471_v6, %s3819_s10  ;;  %v1045_v37 = vrot.slane %v1040_v27, %v3949_v23  ;;  %v1053_v38 = vrot.slane %v1048_v28, %v3949_v23  ;;  %v1135_v39 = vrot.slane %v1130_v29, %v3901_v19  ;;  %v1144_v40 = vpack.i.b16 %v3482_v30, %v3482_v30  ;;  %v1477_v27 = vld [vmem:[%s4778_s2 + $0x18] sm:$0x44] }
  0x29   : > { %982 = vrot.lane.b32.xlu1 %v3472_v16, %s3819_s10  ;;  %v1061_v41 = vrot.slane %v1056_v33, %v3949_v23  ;;  %v1142_v42 = vrot.slane %v1137_v35, %v3901_v19  ;;  %v3485_v43 = vcombine.low %v1198_v31, %v1198_v31  ;;  %v3486_v44 = vcombine.high %v1198_v31, %v1198_v31 }
  0x2a   : > { %v3477_v46 = vcombine.low %v1037_v32, %v1045_v37  ;;  %v3483_v47 = vcombine.low %v1128_v34, %v1135_v39  ;;  %v1149_v49 = vrot.slane %v1144_v40, %v3901_v19  ;;  %v3487_v50 = vcombine.low %v1199_v36, %v1199_v36 }
  0x2b   : > { %v3478_v52 = vcombine.low %v1053_v38, %v1061_v41  ;;  %v1211_v53 = vshrl.u32 %v3485_v43, 16  ;;  %v1219_v54 = vshrl.u32 %v3486_v44, 16  ;;  %v3488_v55 = vcombine.high %v1199_v36, %v1199_v36  ;;  %v1628_v44 = vld [vmem:[%s4778_s2 + $0x10] sm:$0x88] }
  0x2c   : > { %1072 = vrot.lane.b32.xlu0 %v3477_v46, %s3820_s19  ;;  %v3484_v56 = vcombine.low %v1142_v42, %v1149_v49  ;;  %v1227_v57 = vshrl.u32 %v3487_v50, 16  ;;  %v3491_v58 = vcombine.low %v1292_v45, %v1292_v45  ;;  %v3492_v59 = vcombine.high %v1292_v45, %v1292_v45  ;;  %v1629_v50 = vld [vmem:[%s4778_s2 + $0x18] sm:$0x88] }
  0x2d   : > { %1074 = vrot.lane.b32.xlu1 %v3478_v52, %s3820_s19  ;;  %v1212_v60 = vpack.i.b16 %v1211_v53, %v1211_v53  ;;  %v1220_v61 = vpack.i.b16 %v1219_v54, %v1219_v54  ;;  %v1235_v62 = vshrl.u32 %v3488_v55, 16  ;;  %v3493_v63 = vcombine.low %v1293_v51, %v1293_v51 }
  0x2e   : > { %v1228_v0 = vpack.i.b16 %v1227_v57, %v1227_v57  ;;  %v1305_v1 = vpack.i.b16 %v3491_v58, %v3491_v58  ;;  %v1312_v2 = vpack.i.b16 %v3492_v59, %v3492_v59  ;;  %v3494_v3 = vcombine.high %v1293_v51, %v1293_v51  ;;  %v1716_v59 = vld [vmem:[%s4778_s2 + $0x10] sm:$0x88] }
  0x2f   : > { %v1217_v5 = vrot.slane %v1212_v60, %v3901_v19  ;;  %v1225_v6 = vrot.slane %v1220_v61, %v3901_v19  ;;  %v1236_v7 = vpack.i.b16 %v1235_v62, %v1235_v62  ;;  %v1319_v8 = vpack.i.b16 %v3493_v63, %v3493_v63 }
  0x30   : > { %1160 = vrot.lane.b32.xlu0 %v3483_v47, %s3821_s26  ;;  %v1233_v11 = vrot.slane %v1228_v0, %v3901_v19  ;;  %v1310_v12 = vrot.slane %v1305_v1, %v3898_v18  ;;  %v1317_v13 = vrot.slane %v1312_v2, %v3898_v18  ;;  %v1326_v14 = vpack.i.b16 %v3494_v3, %v3494_v3  ;;  %v1717_v0 = vld [vmem:[%s4778_s2 + $0x18] sm:$0x88] }
  0x31   : > { %1162 = vrot.lane.b32.xlu1 %v3484_v56, %s3821_s26  ;;  %v3489_v16 = vcombine.low %v1217_v5, %v1225_v6  ;;  %v1241_v17 = vrot.slane %v1236_v7, %v3901_v19  ;;  %v1324_v20 = vrot.slane %v1319_v8, %v3898_v18  ;;  %v3497_v21 = vcombine.low %v1382_v4, %v1382_v4 }
  0x32   : > { %v3495_v22 = vcombine.low %v1310_v12, %v1317_v13  ;;  %v1331_v24 = vrot.slane %v1326_v14, %v3898_v18  ;;  %v3498_v25 = vcombine.high %v1382_v4, %v1382_v4  ;;  %v3499_v26 = vcombine.low %v1383_v10, %v1383_v10 }
  0x33   : > { %v3490_v28 = vcombine.low %v1233_v11, %v1241_v17  ;;  %v1395_v29 = vshrl.u32 %v3497_v21, 16  ;;  %v3500_v30 = vcombine.high %v1383_v10, %v1383_v10  ;;  %v3503_v31 = vcombine.low %v1476_v15, %v1476_v15  ;;  %v1808_v10 = vld [vmem:[%s4778_s2 + $0x20] sm:$0x11]  ;;  %v1809_v21 = vld [vmem:[%s4778_s2 + $0x28] sm:$0x11] }
  0x34   : > { %1252 = vrot.lane.b32.xlu0 %v3489_v16, %s4784_s11  ;;  %v3496_v32 = vcombine.low %v1324_v20, %v1331_v24  ;;  %v1403_v33 = vshrl.u32 %v3498_v25, 16  ;;  %v1411_v34 = vshrl.u32 %v3499_v26, 16  ;;  %v3504_v35 = vcombine.high %v1476_v15, %v1476_v15 }
  0x35   : > { %1254 = vrot.lane.b32.xlu1 %v3490_v28, %s4784_s11  ;;  %v1396_v36 = vpack.i.b16 %v1395_v29, %v1395_v29  ;;  %v1419_v37 = vshrl.u32 %v3500_v30, 16  ;;  %v1489_v38 = vpack.i.b16 %v3503_v31, %v3503_v31  ;;  %v3505_v39 = vcombine.low %v1477_v27, %v1477_v27 }
  0x36   : > { %v1404_v40 = vpack.i.b16 %v1403_v33, %v1403_v33  ;;  %v1412_v41 = vpack.i.b16 %v1411_v34, %v1411_v34  ;;  %v1496_v42 = vpack.i.b16 %v3504_v35, %v3504_v35  ;;  %v3506_v43 = vcombine.high %v1477_v27, %v1477_v27  ;;  %v1896_v35 = vld [vmem:[%s4778_s2 + $0x20] sm:$0x11] }
  0x37   : > { %v1401_v45 = vrot.slane %v1396_v36, %v3898_v18  ;;  %v1420_v46 = vpack.i.b16 %v1419_v37, %v1419_v37  ;;  %v1494_v47 = vrot.slane %v1489_v38, %v3923_v48  ;;  %v1503_v49 = vpack.i.b16 %v3505_v39, %v3505_v39 }
  0x38   : > { %1342 = vrot.lane.b32.xlu0 %v3495_v22, %s4786_s21  ;;  %v1409_v51 = vrot.slane %v1404_v40, %v3898_v18  ;;  %v1417_v52 = vrot.slane %v1412_v41, %v3898_v18  ;;  %v1501_v53 = vrot.slane %v1496_v42, %v3923_v48  ;;  %v1510_v54 = vpack.i.b16 %v3506_v43, %v3506_v43  ;;  %v1897_v40 = vld [vmem:[%s4778_s2 + $0x28] sm:$0x11] }
  0x39   : > { %1344 = vrot.lane.b32.xlu1 %v3496_v32, %s4786_s21  ;;  %v1425_v55 = vrot.slane %v1420_v46, %v3898_v18  ;;  %v1508_v56 = vrot.slane %v1503_v49, %v3923_v48  ;;  %v3515_v57 = vcombine.low %v1628_v44, %v1628_v44  ;;  %v3516_v58 = vcombine.high %v1628_v44, %v1628_v44  ;;  %s301_s21 = scalar_lea.vmem %s4776_s0, %s3658_s29 }
  0x3a   : > { %v3501_v60 = vcombine.low %v1401_v45, %v1409_v51  ;;  %v3507_v61 = vcombine.low %v1494_v47, %v1501_v53  ;;  %v1515_v62 = vrot.slane %v1510_v54, %v3923_v48  ;;  %v3517_v63 = vcombine.low %v1629_v50, %v1629_v50 }
  0x3b   : > { %v3502_v1 = vcombine.low %v1417_v52, %v1425_v55  ;;  %v1641_v2 = vpack.i.b16 %v3515_v57, %v3515_v57  ;;  %v1648_v3 = vpack.i.b16 %v3516_v58, %v3516_v58  ;;  %v3518_v4 = vcombine.high %v1629_v50, %v1629_v50  ;;  %v1988_v50 = vld [vmem:[%s4778_s2 + $0x20] sm:$0x22]  ;;  %v1989_v55 = vld [vmem:[%s4778_s2 + $0x28] sm:$0x22] }
  0x3c   : > { %1436 = vrot.lane.b32.xlu0 %v3501_v60, %s4788_s8  ;;  %v3508_v5 = vcombine.low %v1508_v56, %v1515_v62  ;;  %v1655_v6 = vpack.i.b16 %v3517_v63, %v3517_v63  ;;  %v3521_v7 = vcombine.low %v1716_v59, %v1716_v59  ;;  %v3522_v8 = vcombine.high %v1716_v59, %v1716_v59 }
  0x3d   : > { %1438 = vrot.lane.b32.xlu1 %v3502_v1, %s4788_s8  ;;  %v1646_v11 = vrot.slane %v1641_v2, %v3949_v23  ;;  %v1653_v12 = vrot.slane %v1648_v3, %v3949_v23  ;;  %v1662_v13 = vpack.i.b16 %v3518_v4, %v3518_v4  ;;  %v3523_v14 = vcombine.low %v1717_v0, %v1717_v0  ;;  %s4799_s8 = smov 127  }
  0x3e   : > { %v1660_v15 = vrot.slane %v1655_v6, %v3949_v23  ;;  %v1729_v16 = vshrl.u32 %v3521_v7, 16  ;;  %v1737_v17 = vshrl.u32 %v3522_v8, 16  ;;  %v3524_v20 = vcombine.high %v1717_v0, %v1717_v0  ;;  %v2076_v8 = vld [vmem:[%s4778_s2 + $0x20] sm:$0x22] }
  0x3f   : > { %v3519_v22 = vcombine.low %v1646_v11, %v1653_v12  ;;  %v1667_v24 = vrot.slane %v1662_v13, %v3949_v23  ;;  %v1745_v25 = vshrl.u32 %v3523_v14, 16  ;;  %v3527_v26 = vcombine.low %v1808_v10, %v1808_v10  ;;  %v2077_v14 = vld [vmem:[%s4778_s2 + $0x28] sm:$0x22] }
  0x40   : > { %1526 = vrot.lane.b32.xlu0 %v3507_v61, %s4790_s20  ;;  %v1730_v27 = vpack.i.b16 %v1729_v16, %v1729_v16  ;;  %v1738_v28 = vpack.i.b16 %v1737_v17, %v1737_v17  ;;  %v1753_v29 = vshrl.u32 %v3524_v20, 16  ;;  %v3528_v30 = vcombine.high %v1808_v10, %v1808_v10 }
  0x41   : > { %1528 = vrot.lane.b32.xlu1 %v3508_v5, %s4790_s20  ;;  %v3520_v31 = vcombine.low %v1660_v15, %v1667_v24  ;;  %v1746_v32 = vpack.i.b16 %v1745_v25, %v1745_v25  ;;  %v1821_v33 = vpack.i.b16 %v3527_v26, %v3527_v26  ;;  %v3529_v34 = vcombine.low %v1809_v21, %v1809_v21  ;;  %v2168_v26 = vld [vmem:[%s4778_s2 + $0x20] sm:$0x44]  ;;  %s4800_s20 = smov 121  }
  0x42   : > { %v1735_v36 = vrot.slane %v1730_v27, %v3949_v23  ;;  %v1743_v37 = vrot.slane %v1738_v28, %v3949_v23  ;;  %v1754_v38 = vpack.i.b16 %v1753_v29, %v1753_v29  ;;  %v1828_v39 = vpack.i.b16 %v3528_v30, %v3528_v30 }
  0x43   : > { %v1751_v41 = vrot.slane %v1746_v32, %v3949_v23  ;;  %v1826_v42 = vrot.slane %v1821_v33, %v3901_v19  ;;  %v3530_v43 = vcombine.high %v1809_v21, %v1809_v21  ;;  %v1835_v44 = vpack.i.b16 %v3529_v34, %v3529_v34 }
  0x44   : > { %1678 = vrot.lane.b32.xlu0 %v3519_v22, %s4792_s9  ;;  %v3525_v45 = vcombine.low %v1735_v36, %v1743_v37  ;;  %v1759_v46 = vrot.slane %v1754_v38, %v3949_v23  ;;  %v1833_v47 = vrot.slane %v1828_v39, %v3901_v19  ;;  %v3533_v49 = vcombine.low %v1896_v35, %v1896_v35 }
  0x45   : > { %1680 = vrot.lane.b32.xlu1 %v3520_v31, %s4792_s9  ;;  %v1840_v51 = vrot.slane %v1835_v44, %v3901_v19  ;;  %v1842_v52 = vpack.i.b16 %v3530_v43, %v3530_v43  ;;  %v3534_v53 = vcombine.high %v1896_v35, %v1896_v35  ;;  %v3535_v54 = vcombine.low %v1897_v40, %v1897_v40  ;;  %v2169_v31 = vld [vmem:[%s4778_s2 + $0x28] sm:$0x44]  ;;  %s306_s9 = scalar_lea.vmem %s4777_s1, %s3658_s29 }
  0x46   : > { %v3526_v56 = vcombine.low %v1751_v41, %v1759_v46  ;;  %v3531_v57 = vcombine.low %v1826_v42, %v1833_v47  ;;  %v1909_v58 = vshrl.u32 %v3533_v49, 16  ;;  %v3536_v59 = vcombine.high %v1897_v40, %v1897_v40  ;;  %v2256_v49 = vld [vmem:[%s4778_s2 + $0x20] sm:$0x44] }
  0x47   : > { %v1847_v60 = vrot.slane %v1842_v52, %v3901_v19  ;;  %v1917_v61 = vshrl.u32 %v3534_v53, 16  ;;  %v1925_v62 = vshrl.u32 %v3535_v54, 16  ;;  %v3539_v63 = vcombine.low %v1988_v50, %v1988_v50  ;;  %v2257_v54 = vld [vmem:[%s4778_s2 + $0x28] sm:$0x44] }
  0x48   : > { %1770 = vrot.lane.b32.xlu0 %v3525_v45, %s3827_s23  ;;  %v1910_v0 = vpack.i.b16 %v1909_v58, %v1909_v58  ;;  %v1933_v1 = vshrl.u32 %v3536_v59, 16  ;;  %v3540_v2 = vcombine.high %v1988_v50, %v1988_v50  ;;  %v3541_v3 = vcombine.low %v1989_v55, %v1989_v55 }
  0x49   : > { %1772 = vrot.lane.b32.xlu1 %v3526_v56, %s3827_s23  ;;  %v3532_v4 = vcombine.low %v1840_v51, %v1847_v60  ;;  %v1918_v5 = vpack.i.b16 %v1917_v61, %v1917_v61  ;;  %v1926_v6 = vpack.i.b16 %v1925_v62, %v1925_v62  ;;  %v2001_v7 = vpack.i.b16 %v3539_v63, %v3539_v63  ;;  %v2348_v63 = vld [vmem:[%s4778_s2 + $0x20] sm:$0x88] }
  0x4a   : > { %v1915_v10 = vrot.slane %v1910_v0, %v3901_v19  ;;  %v1934_v11 = vpack.i.b16 %v1933_v1, %v1933_v1  ;;  %v2008_v12 = vpack.i.b16 %v3540_v2, %v3540_v2  ;;  %v3542_v13 = vcombine.high %v1989_v55, %v1989_v55 }
  0x4b   : > { %v1923_v15 = vrot.slane %v1918_v5, %v3901_v19  ;;  %v1931_v16 = vrot.slane %v1926_v6, %v3901_v19  ;;  %v2006_v17 = vrot.slane %v2001_v7, %v3898_v18  ;;  %v2015_v20 = vpack.i.b16 %v3541_v3, %v3541_v3 }
  0x4c   : > { %1858 = vrot.lane.b32.xlu0 %v3531_v57, %s3828_s15  ;;  %v1939_v21 = vrot.slane %v1934_v11, %v3901_v19  ;;  %v2013_v22 = vrot.slane %v2008_v12, %v3898_v18  ;;  %v2022_v24 = vpack.i.b16 %v3542_v13, %v3542_v13  ;;  %v3545_v25 = vcombine.low %v2076_v8, %v2076_v8 }
  0x4d   : > { %1860 = vrot.lane.b32.xlu1 %v3532_v4, %s3828_s15  ;;  %v3537_v27 = vcombine.low %v1915_v10, %v1923_v15  ;;  %v2020_v28 = vrot.slane %v2015_v20, %v3898_v18  ;;  %v3546_v29 = vcombine.high %v2076_v8, %v2076_v8  ;;  %v3547_v30 = vcombine.low %v2077_v14, %v2077_v14  ;;  %v2349_v8 = vld [vmem:[%s4778_s2 + $0x28] sm:$0x88] }
  0x4e   : > { %v3538_v32 = vcombine.low %v1931_v16, %v1939_v21  ;;  %v3543_v33 = vcombine.low %v2006_v17, %v2013_v22  ;;  %v2027_v34 = vrot.slane %v2022_v24, %v3898_v18  ;;  %v2089_v35 = vshrl.u32 %v3545_v25, 16  ;;  %v2436_v25 = vld [vmem:[%s4778_s2 + $0x20] sm:$0x88] }
  0x4f   : > { %v2097_v36 = vshrl.u32 %v3546_v29, 16  ;;  %v3548_v37 = vcombine.high %v2077_v14, %v2077_v14  ;;  %v2105_v38 = vshrl.u32 %v3547_v30, 16  ;;  %v3551_v39 = vcombine.low %v2168_v26, %v2168_v26  ;;  %v2437_v30 = vld [vmem:[%s4778_s2 + $0x28] sm:$0x88] }
  0x50   : > { %1950 = vrot.lane.b32.xlu0 %v3537_v27, %s3829_s14  ;;  %v3544_v40 = vcombine.low %v2020_v28, %v2027_v34  ;;  %v2090_v41 = vpack.i.b16 %v2089_v35, %v2089_v35  ;;  %v3552_v42 = vcombine.high %v2168_v26, %v2168_v26  ;;  %v3553_v43 = vcombine.low %v2169_v31, %v2169_v31 }
  0x51   : > { %1952 = vrot.lane.b32.xlu1 %v3538_v32, %s3829_s14  ;;  %v2098_v44 = vpack.i.b16 %v2097_v36, %v2097_v36  ;;  %v2106_v45 = vpack.i.b16 %v2105_v38, %v2105_v38  ;;  %v2113_v46 = vshrl.u32 %v3548_v37, 16  ;;  %v2181_v47 = vpack.i.b16 %v3551_v39, %v3551_v39  ;;  %v2528_v39 = vld [vmem:[%s4778_s2 + $0x30] sm:$0x11] }
  0x52   : > { %v2095_v50 = vrot.slane %v2090_v41, %v3898_v18  ;;  %v2188_v51 = vpack.i.b16 %v3552_v42, %v3552_v42  ;;  %v3554_v52 = vcombine.high %v2169_v31, %v2169_v31  ;;  %v2195_v53 = vpack.i.b16 %v3553_v43, %v3553_v43 }
  0x53   : > { %v2103_v55 = vrot.slane %v2098_v44, %v3898_v18  ;;  %v2111_v56 = vrot.slane %v2106_v45, %v3898_v18  ;;  %v2114_v57 = vpack.i.b16 %v2113_v46, %v2113_v46  ;;  %v2186_v58 = vrot.slane %v2181_v47, %v3923_v48  ;;  %v2529_v44 = vld [vmem:[%s4778_s2 + $0x38] sm:$0x11] }
  0x54   : > { %2038 = vrot.lane.b32.xlu0 %v3543_v33, %s3814_s18  ;;  %v2193_v59 = vrot.slane %v2188_v51, %v3923_v48  ;;  %v2200_v60 = vrot.slane %v2195_v53, %v3923_v48  ;;  %v2202_v61 = vpack.i.b16 %v3554_v52, %v3554_v52  ;;  %v3557_v62 = vcombine.low %v2256_v49, %v2256_v49 }
  0x55   : > { %2040 = vrot.lane.b32.xlu1 %v3544_v40, %s3814_s18  ;;  %v3549_v0 = vcombine.low %v2095_v50, %v2103_v55  ;;  %v2119_v1 = vrot.slane %v2114_v57, %v3898_v18  ;;  %v3558_v2 = vcombine.high %v2256_v49, %v2256_v49  ;;  %v3559_v3 = vcombine.low %v2257_v54, %v2257_v54 }
  0x56   : > { %v3555_v4 = vcombine.low %v2186_v58, %v2193_v59  ;;  %v2207_v5 = vrot.slane %v2202_v61, %v3923_v48  ;;  %v2269_v6 = vshrl.u32 %v3557_v62, 16  ;;  %v3560_v7 = vcombine.high %v2257_v54, %v2257_v54  ;;  %v2616_v62 = vld [vmem:[%s4778_s2 + $0x30] sm:$0x11] }
  0x57   : > { %v3550_v10 = vcombine.low %v2111_v56, %v2119_v1  ;;  %v2277_v11 = vshrl.u32 %v3558_v2, 16  ;;  %v2285_v12 = vshrl.u32 %v3559_v3, 16  ;;  %v3563_v13 = vcombine.low %v2348_v63, %v2348_v63 }
  0x58   : > { %2130 = vrot.lane.b32.xlu0 %v3549_v0, %s3815_s27  ;;  %v3556_v14 = vcombine.low %v2200_v60, %v2207_v5  ;;  %v2270_v15 = vpack.i.b16 %v2269_v6, %v2269_v6  ;;  %v2293_v16 = vshrl.u32 %v3560_v7, 16  ;;  %v3564_v17 = vcombine.high %v2348_v63, %v2348_v63  ;;  %v2617_v6 = vld [vmem:[%s4778_s2 + $0x38] sm:$0x11] }
  0x59   : > { %2132 = vrot.lane.b32.xlu1 %v3550_v10, %s3815_s27  ;;  %v2278_v20 = vpack.i.b16 %v2277_v11, %v2277_v11  ;;  %v2286_v21 = vpack.i.b16 %v2285_v12, %v2285_v12  ;;  %v2361_v22 = vpack.i.b16 %v3563_v13, %v3563_v13  ;;  %v3565_v24 = vcombine.low %v2349_v8, %v2349_v8 }
  0x5a   : > { %v2275_v26 = vrot.slane %v2270_v15, %v3923_v48  ;;  %v2294_v27 = vpack.i.b16 %v2293_v16, %v2293_v16  ;;  %v2368_v28 = vpack.i.b16 %v3564_v17, %v3564_v17  ;;  %v3566_v29 = vcombine.high %v2349_v8, %v2349_v8  ;;  %v2708_v16 = vld [vmem:[%s4778_s2 + $0x30] sm:$0x22] }
  0x5b   : > { %v2283_v31 = vrot.slane %v2278_v20, %v3923_v48  ;;  %v2291_v32 = vrot.slane %v2286_v21, %v3923_v48  ;;  %v2366_v33 = vrot.slane %v2361_v22, %v3949_v23  ;;  %v2375_v34 = vpack.i.b16 %v3565_v24, %v3565_v24 }
  0x5c   : > { %2218 = vrot.lane.b32.xlu0 %v3555_v4, %s3813_s17  ;;  %v2299_v35 = vrot.slane %v2294_v27, %v3923_v48  ;;  %v2373_v36 = vrot.slane %v2368_v28, %v3949_v23  ;;  %v2382_v37 = vpack.i.b16 %v3566_v29, %v3566_v29  ;;  %v3569_v38 = vcombine.low %v2436_v25, %v2436_v25 }
  0x5d   : > { %2220 = vrot.lane.b32.xlu1 %v3556_v14, %s3813_s17  ;;  %v3561_v40 = vcombine.low %v2275_v26, %v2283_v31  ;;  %v2380_v41 = vrot.slane %v2375_v34, %v3949_v23  ;;  %v3570_v42 = vcombine.high %v2436_v25, %v2436_v25  ;;  %v3571_v43 = vcombine.low %v2437_v30, %v2437_v30  ;;  %v2709_v26 = vld [vmem:[%s4778_s2 + $0x38] sm:$0x22] }
  0x5e   : > { %v3562_v45 = vcombine.low %v2291_v32, %v2299_v35  ;;  %v3567_v46 = vcombine.low %v2366_v33, %v2373_v36  ;;  %v2387_v47 = vrot.slane %v2382_v37, %v3949_v23  ;;  %v2449_v49 = vshrl.u32 %v3569_v38, 16 }
  0x5f   : > { %v2457_v50 = vshrl.u32 %v3570_v42, 16  ;;  %v3572_v51 = vcombine.high %v2437_v30, %v2437_v30  ;;  %v2465_v52 = vshrl.u32 %v3571_v43, 16  ;;  %v3575_v53 = vcombine.low %v2528_v39, %v2528_v39  ;;  %v324_v42 = vld [vmem:[%s301_s21 + $0x8] sm:$0xff] }
  0x60   : > { %2310 = vrot.lane.b32.xlu0 %v3561_v40, %s3816_s13  ;;  %v3568_v54 = vcombine.low %v2380_v41, %v2387_v47  ;;  %v2450_v55 = vpack.i.b16 %v2449_v49, %v2449_v49  ;;  %v3576_v56 = vcombine.high %v2528_v39, %v2528_v39  ;;  %v3577_v57 = vcombine.low %v2529_v44, %v2529_v44  ;;  %v350_v43 = vld [vmem:[%s306_s9 + $0x8] sm:$0xff] }
  0x61   : > { %2312 = vrot.lane.b32.xlu1 %v3562_v45, %s3816_s13  ;;  %v2458_v58 = vpack.i.b16 %v2457_v50, %v2457_v50  ;;  %v2466_v59 = vpack.i.b16 %v2465_v52, %v2465_v52  ;;  %v2473_v60 = vshrl.u32 %v3572_v51, 16  ;;  %v2541_v61 = vpack.i.b16 %v3575_v53, %v3575_v53  ;;  %v323_v52 = vld [vmem:[%s301_s21] sm:$0xff]  ;;  %s4798_s21 = smov 1  }
  0x62   : > { %v2455_v63 = vrot.slane %v2450_v55, %v3949_v23  ;;  %v2548_v0 = vpack.i.b16 %v3576_v56, %v3576_v56  ;;  %v3578_v1 = vcombine.high %v2529_v44, %v2529_v44  ;;  %v2555_v2 = vpack.i.b16 %v3577_v57, %v3577_v57  ;;  %v349_v53 = vld [vmem:[%s306_s9] sm:$0xff]  ;;  %s4801_s9 = smov 120  }
  0x63   : > { %v2463_v3 = vrot.slane %v2458_v58, %v3949_v23  ;;  %v2471_v4 = vrot.slane %v2466_v59, %v3949_v23  ;;  %v2474_v5 = vpack.i.b16 %v2473_v60, %v2473_v60  ;;  %v2546_v7 = vrot.slane %v2541_v61, %v3901_v19 }
  0x64   : > { %2398 = vrot.lane.b32.xlu0 %v3567_v46, %s3817_s16  ;;  %v2553_v8 = vrot.slane %v2548_v0, %v3901_v19  ;;  %v2562_v10 = vpack.i.b16 %v3578_v1, %v3578_v1  ;;  %v3581_v11 = vcombine.low %v2616_v62, %v2616_v62  ;;  %v2560_v14 = vrot.slane %v2555_v2, %v3901_v19 }
  0x65   : > { %2400 = vrot.lane.b32.xlu1 %v3568_v54, %s3817_s16  ;;  %v3573_v12 = vcombine.low %v2455_v63, %v2463_v3  ;;  %v2479_v13 = vrot.slane %v2474_v5, %v3949_v23  ;;  %v3582_v15 = vcombine.high %v2616_v62, %v2616_v62  ;;  %v3583_v21 = vcombine.low %v2617_v6, %v2617_v6 }
  0x66   : > { %v2567_v17 = vrot.slane %v2562_v10, %v3901_v19  ;;  %v2629_v20 = vshrl.u32 %v3581_v11, 16  ;;  %v3584_v25 = vcombine.high %v2617_v6, %v2617_v6  ;;  %v3579_v23 = vcombine.low %v2546_v7, %v2553_v8 }
  0x67   : > { %v3574_v22 = vcombine.low %v2471_v4, %v2479_v13  ;;  %v2637_v24 = vshrl.u32 %v3582_v15, 16  ;;  %v2645_v28 = vshrl.u32 %v3583_v21, 16  ;;  %v3587_v29 = vcombine.low %v2708_v16, %v2708_v16 }
  0x68   : > { %2490 = vrot.lane.b32.xlu0 %v3573_v12, %s3818_s28  ;;  %v2630_v27 = vpack.i.b16 %v2629_v20, %v2629_v20  ;;  %v3580_v30 = vcombine.low %v2560_v14, %v2567_v17  ;;  %v2653_v32 = vshrl.u32 %v3584_v25, 16  ;;  %v3588_v33 = vcombine.high %v2708_v16, %v2708_v16 }
  0x69   : > { %2492 = vrot.lane.b32.xlu1 %v3574_v22, %s3818_s28  ;;  %v2638_v31 = vpack.i.b16 %v2637_v24, %v2637_v24  ;;  %v2646_v35 = vpack.i.b16 %v2645_v28, %v2645_v28  ;;  %v2721_v36 = vpack.i.b16 %v3587_v29, %v3587_v29  ;;  %v3589_v37 = vcombine.low %v2709_v26, %v2709_v26 }
  0x6a   : > { %v2635_v34 = vrot.slane %v2630_v27, %v3901_v19  ;;  %v2654_v39 = vpack.i.b16 %v2653_v32, %v2653_v32  ;;  %v2728_v40 = vpack.i.b16 %v3588_v33, %v3588_v33  ;;  %v3590_v41 = vcombine.high %v2709_v26, %v2709_v26 }
  0x6b   : > { %v2643_v38 = vrot.slane %v2638_v31, %v3901_v19  ;;  %v2651_v44 = vrot.slane %v2646_v35, %v3901_v19  ;;  %v2726_v45 = vrot.slane %v2721_v36, %v3898_v18  ;;  %v2735_v46 = vpack.i.b16 %v3589_v37, %v3589_v37 }
  0x6c   : > { %2578 = vrot.lane.b32.xlu0 %v3579_v23, %s3819_s10  ;;  %v2659_v49 = vrot.slane %v2654_v39, %v3901_v19  ;;  %v2733_v50 = vrot.slane %v2728_v40, %v3898_v18  ;;  %v2742_v51 = vpack.i.b16 %v3590_v41, %v3590_v41  ;;  %v328_v55 = vcombine.high %v324_v42, %v324_v42 }
  0x6d   : > { %2580 = vrot.lane.b32.xlu1 %v3580_v30, %s3819_s10  ;;  %v3585_v47 = vcombine.low %v2635_v34, %v2643_v38  ;;  %v2740_v54 = vrot.slane %v2735_v46, %v3898_v18  ;;  %v354_v56 = vcombine.high %v350_v43, %v350_v43  ;;  %v3830_v62 = vmov 0  }
  0x6e   : > { %v3586_v57 = vcombine.low %v2651_v44, %v2659_v49  ;;  %v3591_v58 = vcombine.low %v2726_v45, %v2733_v50  ;;  %v2747_v59 = vrot.slane %v2742_v51, %v3898_v18  ;;  %v3662_v60 = vpack.c.bf16 %v328_v55, %v324_v42  ;;  %321 = vst [vmem:[#allocation2] sm:$0xf] %v3830_v62 }
  0x6f   : > { %v3664_v61 = vpack.c.bf16 %v354_v56, %v350_v43  ;;  %v327_v19 = vcombine.high %v323_v52, %v323_v52  ;;  %v353_v63 = vcombine.high %v349_v53, %v349_v53  ;;  %322 = vst [vmem:[#allocation2 + $0x14] sm:$0xf] %v3830_v62  ;;  %3692 = vset.pattern.permute.xlu0 %v3830_v62  ;;  %vm436_vm0 = vcmask 449536  }
  0x70   : > { %2670 = vrot.lane.b32.xlu0 %v3585_v47, %s3820_s19  ;;  %v3592_v0 = vcombine.low %v2740_v54, %v2747_v59  ;;  %348 = vst [vmem:[#allocation2 + $0xc] sm:$0x33] %v3662_v60  ;;  %vm438_vm1 = vcmask 1043456   ;;  %vm621_vm2 = vcmask 465920   ;;  %vm805_vm3 = vcmask 523264  }
  0x71   : > { %2672 = vrot.lane.b32.xlu1 %v3586_v57, %s3820_s19  ;;  %v372_v1 = vrot.slane %v3664_v61, 6  ;;  %v3661_v2 = vpack.c.bf16 %v327_v19, %v323_v52  ;;  %v3663_v3 = vpack.c.bf16 %v353_v63, %v349_v53  ;;  %vm531_vm4 = vcmask 457728  }
  0x72   : > { %vm715_vm5 = vcmask 515072   ;;  %vm738_vm6 = vcmask 531456   ;;  %vm4796_vm7 = vcmask 580608   ;;  %vm554_vm8 = vcmask 588800  }
  0x73   : > { %376 = vst [vmem:[#allocation2 + $0xc] sm:$0xcc] %v372_v1  ;;  %347 = vst [vmem:[#allocation2 + $0x4] sm:$0x33] %v3661_v2  ;;  %v371_v18 = vrot.slane %v3663_v3, 6  ;;  %vm460_vm9 = vcmask 596992  }
  0x74   : > { %2758 = vrot.lane.b32.xlu0 %v3591_v58, %s3821_s26  ;;  %vm4794_vm10 = vcmask 973824   ;;  %vm4795_vm11 = vcmask 982016   ;;  %vm1442_vm12 = vcmask 990208   ;;  %vm1532_vm13 = vcmask 1039360  }
  0x75   : > { %2760 = vrot.lane.b32.xlu1 %v3592_v0, %s3821_s26  ;;  %375 = vst [vmem:[#allocation2 + $0x4] sm:$0xcc] %v371_v18  ;;  %vm1555_vm14 = vcmask 7168   ;;  %vm1465_vm15 = vcmask 56320  }
  0x7a   : > { %v379_v8 = vld [vmem:[#allocation2 + $0x10] sm:$0xf] }
  0x7b   : > { %v470_v16 = vld [vmem:[#allocation2 + $0x10] sm:$0xf] }
  0x7c   : > { %v564_v17 = vld [vmem:[#allocation2 + $0x10] sm:$0xf]  ;;  %v4227_v23 = vld [vmem:[#allocation2] sm:$0xff]  ;;  %v4237_v36 = vld [vmem:[#allocation2 + $0x8] sm:$0xff] }
  0x7d   : > { %v654_v26 = vld [vmem:[#allocation2 + $0x10] sm:$0xf] }
  0x81   : > { %v618_v4 = vpop.permute.xlu1 %617  ;;  %v431_v5 = vpop.permute.xlu0 %430 }
  0x82   : > { %v620_v11 = vrot.slane %v618_v4, 4  ;;  %v434_v13 = vrot.slane %v431_v5, 4 }
  0x84   : > { %v630_v22 = vmul.bf16 %v620_v11, %v564_v17  ;;  %v437_v24 = vsel %vm436_vm0, %v434_v13, %v431_v5 }
  0x85   : > { %v526_v6 = vpop.permute.xlu1 %525  ;;  %v433_v7 = vpop.permute.xlu0 %432  ;;  %v444_v32 = vmul.bf16 %v437_v24, %v4227_v23  ;;  %v837_v24 = vld [vmem:[#allocation2 + $0x10] sm:$0xf] }
  0x86   : > { %v435_v10 = vrot.slane %v433_v7, 4  ;;  %v529_v43 = vrot.slane %v526_v6, 4 }
  0x88   : > { %v446_v12 = vmul.bf16 %v435_v10, %v379_v8  ;;  %v439_v27 = vsel %vm438_vm1, %v434_v13, %v435_v10  ;;  %v532_v52 = vsel %vm531_vm4, %v529_v43, %v526_v6  ;;  %v748_v13 = vld [vmem:[#allocation2 + $0x10] sm:$0xf] }
  0x89   : > { %v528_v14 = vpop.permute.xlu1 %527  ;;  %v616_v15 = vpop.permute.xlu0 %615  ;;  %v440_v33 = vsel %vm436_vm0, %v439_v27, %v433_v7  ;;  %v538_v60 = vmul.bf16 %v532_v52, %v4227_v23 }
  0x8a   : > { %v530_v20 = vrot.slane %v528_v14, 4  ;;  %454 = vrot.lane.b32.xlu0 %v446_v12, %s3821_s26  ;;  %v619_v28 = vrot.slane %v616_v15, 4  ;;  %v445_v41 = vmul.bf16 %v440_v33, %v4237_v36 }
  0x8c   : > { %v540_v21 = vmul.bf16 %v530_v20, %v470_v16  ;;  %v622_v34 = vsel %vm621_vm2, %v619_v28, %v616_v15  ;;  %v623_v39 = vsel %vm438_vm1, %v619_v28, %v620_v11  ;;  %v533_v54 = vsel %vm438_vm1, %v529_v43, %v530_v20 }
  0x8d   : > { %v712_v25 = vpop.permute.xlu1 %711  ;;  %v628_v42 = vmul.bf16 %v622_v34, %v4227_v23  ;;  %v624_v45 = vsel %vm621_vm2, %v623_v39, %v618_v4  ;;  %v534_v61 = vsel %vm531_vm4, %v533_v54, %v528_v14 }
  0x8e   : > { %v714_v29 = vrot.slane %v712_v25, 4  ;;  %v710_v30 = vpop.permute.xlu0 %709  ;;  %548 = vrot.lane.b32.xlu1 %v540_v21, %s3820_s19  ;;  %638 = vrot.lane.b32.xlu0 %v630_v22, %s3819_s10  ;;  %v629_v51 = vmul.bf16 %v624_v45, %v4237_v36  ;;  %v539_v3 = vmul.bf16 %v534_v61, %v4237_v36 }
  0x8f   : > { %v713_v55 = vrot.slane %v710_v30, 4 }
  0x90   : > { %v724_v31 = vmul.bf16 %v714_v29, %v654_v26 }
  0x91   : > { %v4235_v35 = vpop.permute.xlu1 %801  ;;  %v716_v62 = vsel %vm715_vm5, %v713_v55, %v710_v30  ;;  %v717_v63 = vsel %vm438_vm1, %v713_v55, %v714_v29 }
  0x92   : > { %732 = vrot.lane.b32.xlu1 %v724_v31, %s3818_s28  ;;  %450 = vrot.lane.b32.xlu0 %v444_v32, %s3821_s26  ;;  %v800_v37 = vpop.permute.xlu0 %799  ;;  %v804_v38 = vrot.slane %v4235_v35, 4  ;;  %v722_v18 = vmul.bf16 %v716_v62, %v4227_v23  ;;  %v718_v4 = vsel %vm715_vm5, %v717_v63, %v712_v25 }
  0x93   : > { %v803_v40 = vrot.slane %v800_v37, 4  ;;  %v723_v11 = vmul.bf16 %v718_v4, %v4237_v36 }
  0x94   : > { %v814_v22 = vmul.bf16 %v804_v38, %v748_v13 }
  0x95   : > { %v806_v44 = vsel %vm805_vm3, %v803_v40, %v800_v37  ;;  %v807_v46 = vsel %vm438_vm1, %v803_v40, %v804_v38 }
  0x96   : > { %452 = vrot.lane.b32.xlu1 %v445_v41, %s3821_s26  ;;  %634 = vrot.lane.b32.xlu0 %v628_v42, %s3819_s10  ;;  %v812_v47 = vmul.bf16 %v806_v44, %v4227_v23  ;;  %v893_v49 = vpop.permute.xlu0 %892  ;;  %v808_v53 = vsel %vm805_vm3, %v807_v46, %v4235_v35  ;;  %v929_v41 = vld [vmem:[#allocation2 + $0x10] sm:$0xf] }
  0x97   : > { %v895_v50 = vpop.permute.xlu1 %894  ;;  %v896_v57 = vrot.slane %v893_v49, 4  ;;  %v813_v59 = vmul.bf16 %v808_v53, %v4237_v36 }
  0x98   : > { %v897_v19 = vrot.slane %v895_v50, 4 }
  0x99   : > { %v898_v1 = vsel %vm738_vm6, %v896_v57, %v893_v49 }
  0x9a   : > { %636 = vrot.lane.b32.xlu1 %v629_v51, %s3819_s10  ;;  %818 = vrot.lane.b32.xlu0 %v812_v47, %s3817_s16  ;;  %v981_v56 = vpop.permute.xlu0 %980  ;;  %v899_v5 = vsel %vm438_vm1, %v896_v57, %v897_v19  ;;  %v904_v6 = vmul.bf16 %v898_v1, %v4227_v23  ;;  %v906_v31 = vmul.bf16 %v897_v19, %v837_v24  ;;  %v1109_v1 = vld [vmem:[#allocation2 + $0x10] sm:$0xf] }
  0x9b   : > { %v4258_v58 = vpop.permute.xlu1 %982  ;;  %v984_v8 = vrot.slane %v981_v56, 4  ;;  %v900_v12 = vsel %vm738_vm6, %v899_v5, %v895_v50  ;;  %v1017_v50 = vld [vmem:[#allocation2 + $0x10] sm:$0xf] }
  0x9c   : > { %v985_v14 = vrot.slane %v4258_v58, 4  ;;  %v905_v21 = vmul.bf16 %v900_v12, %v4237_v36 }
  0x9d   : > { %v986_v16 = vsel %vm4796_vm7, %v984_v8, %v981_v56 }
  0x9e   : > { %820 = vrot.lane.b32.xlu1 %v813_v59, %s3817_s16  ;;  %544 = vrot.lane.b32.xlu0 %v538_v60, %s3820_s19  ;;  %v1073_v0 = vpop.permute.xlu0 %1072  ;;  %v987_v25 = vsel %vm438_vm1, %v984_v8, %v985_v14  ;;  %v992_v27 = vmul.bf16 %v986_v16, %v4227_v23  ;;  %v994_v49 = vmul.bf16 %v985_v14, %v929_v41  ;;  %v1197_v8 = vld [vmem:[#allocation2 + $0x10] sm:$0xf] }
  0x9f   : > { %v4268_v2 = vpop.permute.xlu1 %1074  ;;  %v1076_v17 = vrot.slane %v1073_v0, 4  ;;  %v988_v32 = vsel %vm4796_vm7, %v987_v25, %v4258_v58 }
  0xa0   : > { %v1077_v26 = vrot.slane %v4268_v2, 4  ;;  %v993_v39 = vmul.bf16 %v988_v32, %v4237_v36 }
  0xa1   : > { %v1078_v29 = vsel %vm554_vm8, %v1076_v17, %v1073_v0 }
  0xa2   : > { %546 = vrot.lane.b32.xlu1 %v539_v3, %s3820_s19  ;;  %728 = vrot.lane.b32.xlu0 %v722_v18, %s3818_s28  ;;  %v1161_v7 = vpop.permute.xlu0 %1160  ;;  %v1079_v33 = vsel %vm438_vm1, %v1076_v17, %v1077_v26  ;;  %v1084_v34 = vmul.bf16 %v1078_v29, %v4227_v23  ;;  %v1086_v57 = vmul.bf16 %v1077_v26, %v1017_v50 }
  0xa3   : > { %v4277_v10 = vpop.permute.xlu1 %1162  ;;  %v1164_v37 = vrot.slane %v1161_v7, 4  ;;  %v1080_v40 = vsel %vm554_vm8, %v1079_v33, %v4268_v2 }
  0xa4   : > { %v1165_v42 = vrot.slane %v4277_v10, 4  ;;  %v1085_v47 = vmul.bf16 %v1080_v40, %v4237_v36 }
  0xa5   : > { %v1166_v44 = vsel %vm460_vm9, %v1164_v37, %v1161_v7 }
  0xa6   : > { %730 = vrot.lane.b32.xlu1 %v723_v11, %s3818_s28  ;;  %910 = vrot.lane.b32.xlu0 %v904_v6, %s3816_s13  ;;  %v1253_v15 = vpop.permute.xlu0 %1252  ;;  %v1167_v51 = vsel %vm438_vm1, %v1164_v37, %v1165_v42  ;;  %v1172_v53 = vmul.bf16 %v1166_v44, %v4227_v23  ;;  %v1174_v4 = vmul.bf16 %v1165_v42, %v1109_v1  ;;  %v1475_v42 = vld [vmem:[#allocation2 + $0x10] sm:$0xf]  ;;  %v1627_v1 = vld [vmem:[#allocation2 + $0x14] sm:$0xf] }
  0xa7   : > { %v4285_v20 = vpop.permute.xlu1 %1254  ;;  %v1256_v45 = vrot.slane %v1253_v15, 4  ;;  %v1168_v58 = vsel %vm460_vm9, %v1167_v51, %v4277_v10 }
  0xa8   : > { %v1257_v52 = vrot.slane %v4285_v20, 4  ;;  %v1173_v19 = vmul.bf16 %v1168_v58, %v4237_v36 }
  0xa9   : > { %v1259_v55 = vsel %vm4794_vm10, %v1256_v45, %v1253_v15 }
  0xaa   : > { %912 = vrot.lane.b32.xlu1 %v905_v21, %s3816_s13  ;;  %822 = vrot.lane.b32.xlu0 %v814_v22, %s3817_s16  ;;  %v1343_v28 = vpop.permute.xlu0 %1342  ;;  %v1260_v59 = vsel %vm438_vm1, %v1256_v45, %v1257_v52  ;;  %v1265_v60 = vmul.bf16 %v1259_v55, %v4227_v23  ;;  %v1267_v13 = vmul.bf16 %v1257_v52, %v1197_v8  ;;  %v4402_v52 = vld [vmem:[#allocation2 + $0xc] sm:$0xff] }
  0xab   : > { %v4294_v30 = vpop.permute.xlu1 %1344  ;;  %v1261_v63 = vsel %vm4794_vm10, %v1260_v59, %v4285_v20  ;;  %v1346_v0 = vrot.slane %v1343_v28, 4  ;;  %vm1371_vm10 = vcmask 64512  }
  0xac   : > { %v1347_v2 = vrot.slane %v4294_v30, 4  ;;  %v1266_v18 = vmul.bf16 %v1261_v63, %v4237_v36 }
  0xad   : > { %v1349_v6 = vsel %vm4795_vm11, %v1346_v0, %v1343_v28 }
  0xae   : > { %914 = vrot.lane.b32.xlu1 %v906_v31, %s3816_s13  ;;  %998 = vrot.lane.b32.xlu0 %v992_v27, %s3813_s17  ;;  %v1437_v35 = vpop.permute.xlu0 %1436  ;;  %v1350_v10 = vsel %vm438_vm1, %v1346_v0, %v1347_v2  ;;  %v1355_v14 = vmul.bf16 %v1349_v6, %v4227_v23  ;;  %v1291_v27 = vld [vmem:[#allocation2 + $0x10] sm:$0xf] }
  0xaf   : > { %v4302_v38 = vpop.permute.xlu1 %1438  ;;  %v1440_v7 = vrot.slane %v1437_v35, 4  ;;  %v1351_v15 = vsel %vm4795_vm11, %v1350_v10, %v4294_v30  ;;  %v1357_v30 = vmul.bf16 %v1347_v2, %v1291_v27  ;;  %v1715_v2 = vld [vmem:[#allocation2 + $0x14] sm:$0xf]  ;;  %vm1281_vm11 = vcmask 72704  }
  0xb0   : > { %v1441_v11 = vrot.slane %v4302_v38, 4  ;;  %v1356_v22 = vmul.bf16 %v1351_v15, %v4237_v36  ;;  %v1807_v27 = vld [vmem:[#allocation2 + $0x14] sm:$0xf] }
  0xb1   : > { %v1443_v16 = vsel %vm1442_vm12, %v1440_v7, %v1437_v35 }
  0xb2   : > { %1000 = vrot.lane.b32.xlu1 %v993_v39, %s3813_s17  ;;  %1090 = vrot.lane.b32.xlu0 %v1084_v34, %s3815_s27  ;;  %v4310_v43 = vpop.permute.xlu0 %1526  ;;  %v1444_v17 = vsel %vm438_vm1, %v1440_v7, %v1441_v11  ;;  %v1449_v24 = vmul.bf16 %v1443_v16, %v4227_v23  ;;  %v1381_v34 = vld [vmem:[#allocation2 + $0x10] sm:$0xf] }
  0xb3   : > { %v4313_v46 = vpop.permute.xlu1 %1528  ;;  %v1445_v25 = vsel %vm1442_vm12, %v1444_v17, %v4302_v38  ;;  %v1530_v26 = vrot.slane %v4310_v43, 4  ;;  %v1451_v39 = vmul.bf16 %v1441_v11, %v1381_v34 }
  0xb4   : > { %v1531_v28 = vrot.slane %v4313_v46, 4  ;;  %v1450_v29 = vmul.bf16 %v1445_v25, %v4237_v36 }
  0xb5   : > { %v1533_v33 = vsel %vm1532_vm13, %v1530_v26, %v4310_v43 }
  0xb6   : > { %1092 = vrot.lane.b32.xlu1 %v1085_v47, %s3815_s27  ;;  %1002 = vrot.lane.b32.xlu0 %v994_v49, %s3813_s17  ;;  %v4321_v54 = vpop.permute.xlu0 %1678  ;;  %v1534_v35 = vsel %vm438_vm1, %v1530_v26, %v1531_v28  ;;  %v1539_v40 = vmul.bf16 %v1533_v33, %v4227_v23  ;;  %v1541_v50 = vmul.bf16 %v1531_v28, %v1475_v42  ;;  %v1895_v28 = vld [vmem:[#allocation2 + $0x14] sm:$0xf] }
  0xb7   : > { %v4324_v56 = vpop.permute.xlu1 %1680  ;;  %v1682_v38 = vrot.slane %v4321_v54, 4  ;;  %v1535_v41 = vsel %vm1532_vm13, %v1534_v35, %v4313_v46 }
  0xb8   : > { %v1683_v37 = vrot.slane %v4324_v56, 4  ;;  %v1540_v23 = vmul.bf16 %v1535_v41, %v4237_v36 }
  0xb9   : > { %v1684_v46 = vsel %vm1555_vm14, %v1682_v38, %v4321_v54 }
  0xba   : > { %1094 = vrot.lane.b32.xlu1 %v1086_v57, %s3815_s27  ;;  %1178 = vrot.lane.b32.xlu0 %v1172_v53, %s3814_s18  ;;  %v4332_v61 = vpop.permute.xlu0 %1770  ;;  %v1685_v43 = vsel %vm438_vm1, %v1682_v38, %v1683_v37  ;;  %v4404_v53 = vld [vmem:[#allocation2 + $0x4] sm:$0xff]  ;;  %v1692_v7 = vmul.bf16 %v1683_v37, %v1627_v1 }
  0xbb   : > { %v4334_v62 = vpop.permute.xlu1 %1772  ;;  %v1774_v49 = vrot.slane %v4332_v61, 4  ;;  %v1686_v51 = vsel %vm1555_vm14, %v1685_v43, %v4324_v56  ;;  %v1690_v36 = vmul.bf16 %v4404_v53, %v1684_v46  ;;  %v1987_v46 = vld [vmem:[#allocation2 + $0x14] sm:$0xf] }
  0xbc   : > { %v1775_v44 = vrot.slane %v4334_v62, 4  ;;  %v1691_v57 = vmul.bf16 %v4402_v52, %v1686_v51  ;;  %v2075_v51 = vld [vmem:[#allocation2 + $0x14] sm:$0xf] }
  0xbd   : > { %v1776_v56 = vsel %vm1465_vm15, %v1774_v49, %v4332_v61 }
  0xbe   : > { %1180 = vrot.lane.b32.xlu1 %v1173_v19, %s3814_s18  ;;  %1271 = vrot.lane.b32.xlu0 %v1265_v60, %s3829_s14  ;;  %v4342_v3 = vpop.permute.xlu0 %1858  ;;  %v1777_v55 = vsel %vm438_vm1, %v1774_v49, %v1775_v44  ;;  %v1782_v63 = vmul.bf16 %v4404_v53, %v1776_v56  ;;  %v1784_v8 = vmul.bf16 %v1775_v44, %v1715_v2 }
  0xbf   : > { %v4345_v5 = vpop.permute.xlu1 %1860  ;;  %v1778_v59 = vsel %vm1465_vm15, %v1777_v55, %v4334_v62  ;;  %v1862_v19 = vrot.slane %v4342_v3, 4 }
  0xc0   : > { %v1863_v60 = vrot.slane %v4345_v5, 4  ;;  %v1783_v0 = vmul.bf16 %v4402_v52, %v1778_v59 }
  0xc1   : > { %v1864_v10 = vsel %vm1371_vm10, %v1862_v19, %v4342_v3 }
  0xc2   : > { %1273 = vrot.lane.b32.xlu1 %v1266_v18, %s3829_s14  ;;  %1182 = vrot.lane.b32.xlu0 %v1174_v4, %s3814_s18  ;;  %v4352_v12 = vpop.permute.xlu0 %1950  ;;  %v1865_v61 = vsel %vm438_vm1, %v1862_v19, %v1863_v60  ;;  %v1870_v15 = vmul.bf16 %v4404_v53, %v1864_v10  ;;  %v1872_v33 = vmul.bf16 %v1863_v60, %v1807_v27 }
  0xc3   : > { %v4361_v20 = vpop.permute.xlu1 %1952  ;;  %v1954_v6 = vrot.slane %v4352_v12, 4  ;;  %v1866_v11 = vsel %vm1371_vm10, %v1865_v61, %v4345_v5 }
  0xc4   : > { %v1955_v18 = vrot.slane %v4361_v20, 4 }
  0xc5   : > { %v1956_v3 = vsel %vm1281_vm11, %v1954_v6, %v4352_v12 }
  0xc6   : > { %1275 = vrot.lane.b32.xlu1 %v1267_v13, %s3829_s14  ;;  %1361 = vrot.lane.b32.xlu0 %v1355_v14, %s3828_s15  ;;  %v4363_v21 = vpop.permute.xlu0 %2038  ;;  %v1957_v13 = vsel %vm438_vm1, %v1954_v6, %v1955_v18  ;;  %v1871_v14 = vmul.bf16 %v1866_v11, %v4402_v52  ;;  %v1964_v34 = vmul.bf16 %v1955_v18, %v1895_v28 }
  0xc7   : > { %v4374_v31 = vpop.permute.xlu1 %2040  ;;  %v1958_v5 = vsel %vm1281_vm11, %v1957_v13, %v4361_v20  ;;  %v2042_v26 = vrot.slane %v4363_v21, 4  ;;  %v2255_v13 = vld [vmem:[#allocation2 + $0x14] sm:$0xf] }
  0xc8   : > { %v1963_v25 = vmul.bf16 %v1958_v5, %v4402_v52 }
  0xc9   : > { %v2044_v37 = vsel %vm436_vm0, %v2042_v26, %v4363_v21 }
  0xca   : > { %1363 = vrot.lane.b32.xlu1 %v1356_v22, %s3828_s15  ;;  %1455 = vrot.lane.b32.xlu0 %v1449_v24, %s3827_s23  ;;  %v4376_v32 = vpop.permute.xlu0 %2130  ;;  %v2043_v22 = vrot.slane %v4374_v31, 4  ;;  %v1962_v24 = vmul.bf16 %v1956_v3, %v4404_v53 }
  0xcb   : > { %v4392_v45 = vpop.permute.xlu1 %2132  ;;  %v2134_v35 = vrot.slane %v4376_v32, 4 }
  0xcc   : > { %v2135_v12 = vrot.slane %v4392_v45, 4 }
  0xcd   : > { %v2136_v21 = vsel %vm531_vm4, %v2134_v35, %v4376_v32 }
  0xce   : > { %1457 = vrot.lane.b32.xlu1 %v1450_v29, %s3827_s23  ;;  %1365 = vrot.lane.b32.xlu0 %v1357_v30, %s3828_s15  ;;  %v4394_v47 = vpop.permute.xlu0 %2218  ;;  %v2045_v29 = vsel %vm438_vm1, %v2042_v26, %v2043_v22  ;;  %v2142_v49 = vmul.bf16 %v2136_v21, %v4404_v53  ;;  %v2144_v56 = vmul.bf16 %v2135_v12, %v2075_v51 }
  0xcf   : > { %v4411_v58 = vpop.permute.xlu1 %2220  ;;  %v2046_v38 = vsel %vm436_vm0, %v2045_v29, %v4374_v31 }
  0xd0   : > { %v2051_v41 = vmul.bf16 %v2046_v38, %v4402_v52  ;;  %v2223_v44 = vrot.slane %v4411_v58, 4 }
  0xd2   : > { %1459 = vrot.lane.b32.xlu1 %v1451_v39, %s3827_s23  ;;  %1545 = vrot.lane.b32.xlu0 %v1539_v40, %s4798_s21  ;;  %v4413_v54 = vpop.permute.xlu0 %2310  ;;  %s4802_s23 = smov 119   ;;  %v2137_v39 = vsel %vm438_vm1, %v2134_v35, %v2135_v12  ;;  %v2050_v40 = vmul.bf16 %v2044_v37, %v4404_v53 }
  0xd3   : > { %v4429_v62 = vpop.permute.xlu1 %2312  ;;  %v2138_v31 = vsel %vm531_vm4, %v2137_v39, %v4392_v45  ;;  %v2314_v59 = vrot.slane %v4413_v54, 4 }
  0xd4   : > { %v2315_v32 = vrot.slane %v4429_v62, 4 }
  0xd6   : > { %1547 = vrot.lane.b32.xlu1 %v1540_v23, %s4798_s21  ;;  %1549 = vrot.lane.b32.xlu0 %v1541_v50, %s4798_s21  ;;  %v4431_v4 = vpop.permute.xlu0 %2398  ;;  %v2143_v23 = vmul.bf16 %v2138_v31, %v4402_v52  ;;  %v2222_v50 = vrot.slane %v4394_v47, 4  ;;  %v2324_v3 = vmul.bf16 %v2315_v32, %v2255_v13  ;;  %v2435_v31 = vld [vmem:[#allocation2 + $0x14] sm:$0xf] }
  0xd7   : > { %v4443_v16 = vpop.permute.xlu1 %2400 }
  0xd8   : > { %v2225_v55 = vsel %vm438_vm1, %v2222_v50, %v2223_v44  ;;  %v2224_v60 = vsel %vm621_vm2, %v2222_v50, %v4394_v47  ;;  %v2316_v47 = vsel %vm715_vm5, %v2314_v59, %v4413_v54  ;;  %v2403_v18 = vrot.slane %v4443_v16, 4  ;;  %v2167_v54 = vld [vmem:[#allocation2 + $0x14] sm:$0xf] }
  0xd9   : > { %v2226_v19 = vsel %vm621_vm2, %v2225_v55, %v4411_v58  ;;  %v2322_v6 = vmul.bf16 %v2316_v47, %v4404_v53 }
  0xda   : > { %1696 = vrot.lane.b32.xlu1 %v1690_v36, %s4799_s8  ;;  %1698 = vrot.lane.b32.xlu0 %v1691_v57, %s4799_s8  ;;  %v4445_v17 = vpop.permute.xlu0 %2490  ;;  %v2052_v57 = vmul.bf16 %v2043_v22, %v1987_v46  ;;  %v2231_v1 = vmul.bf16 %v2226_v19, %v4402_v52  ;;  %v2615_v19 = vld [vmem:[#allocation2 + $0x14] sm:$0xf] }
  0xdb   : > { %v4461_v20 = vpop.permute.xlu1 %2492  ;;  %v2494_v5 = vrot.slane %v4445_v17, 4 }
  0xde   : > { %1788 = vrot.lane.b32.xlu1 %v1782_v63, %s4800_s20  ;;  %1790 = vrot.lane.b32.xlu0 %v1783_v0, %s4800_s20  ;;  %v4463_v30 = vpop.permute.xlu0 %2578  ;;  %v2317_v63 = vsel %vm438_vm1, %v2314_v59, %v2315_v32  ;;  %v2230_v0 = vmul.bf16 %v2224_v60, %v4404_v53 }
  0xdf   : > { %v4475_v42 = vpop.permute.xlu1 %2580  ;;  %v2318_v58 = vsel %vm715_vm5, %v2317_v63, %v4429_v62  ;;  %v2582_v35 = vrot.slane %v4463_v30, 4 }
  0xe0   : > { %v2583_v12 = vrot.slane %v4475_v42, 4 }
  0xe2   : > { %1700 = vrot.lane.b32.xlu1 %v1692_v7, %s4799_s8  ;;  %1792 = vrot.lane.b32.xlu0 %v1784_v8, %s4800_s20  ;;  %v4477_v43 = vpop.permute.xlu0 %2670  ;;  %v2323_v7 = vmul.bf16 %v2318_v58, %v4402_v52  ;;  %v2402_v8 = vrot.slane %v4431_v4, 4  ;;  %s319_s20 = scalar_lea.vmem %s4783_s7, %s3425_s30 }
  0xe3   : > { %v4491_v36 = vpop.permute.xlu1 %2672 }
  0xe4   : > { %v2405_v62 = vsel %vm438_vm1, %v2402_v8, %v2403_v18  ;;  %v2675_v37 = vrot.slane %v4491_v36, 4 }
  0xe5   : > { %v2406_v26 = vsel %vm805_vm3, %v2405_v62, %v4443_v16 }
  0xe6   : > { %1876 = vrot.lane.b32.xlu1 %v1870_v15, %s4801_s9  ;;  %1878 = vrot.lane.b32.xlu0 %v1871_v14, %s4801_s9  ;;  %v4495_v45 = vpop.permute.xlu0 %2758  ;;  %v2495_v14 = vrot.slane %v4461_v20, 4  ;;  %v2232_v15 = vmul.bf16 %v2223_v44, %v2167_v54  ;;  %v2411_v29 = vmul.bf16 %v2406_v26, %v4402_v52 }
  0xe7   : > { %v4507_v2 = vpop.permute.xlu1 %2760 }
  0xe8   : > { %v2497_v27 = vsel %vm438_vm1, %v2494_v5, %v2495_v14  ;;  %v2763_v46 = vrot.slane %v4507_v2, 4  ;;  %v2504_v32 = vmul.bf16 %v2495_v14, %v2435_v31 }
  0xe9   : > { %v2498_v16 = vsel %vm738_vm6, %v2497_v27, %v4461_v20  ;;  %v2347_v20 = vld [vmem:[#allocation2 + $0x14] sm:$0xf] }
  0xea   : > { %1968 = vrot.lane.b32.xlu1 %v1962_v24, %s4802_s23  ;;  %1970 = vrot.lane.b32.xlu0 %v1963_v25, %s4802_s23  ;;  %v2404_v25 = vsel %vm805_vm3, %v2402_v8, %v4431_v4  ;;  %v2496_v4 = vsel %vm738_vm6, %v2494_v5, %v4445_v17  ;;  %v2503_v39 = vmul.bf16 %v2498_v16, %v4402_v52 }
  0xeb   : > { %v2410_v28 = vmul.bf16 %v2404_v25, %v4404_v53  ;;  %v2502_v38 = vmul.bf16 %v2496_v4, %v4404_v53  ;;  %v2412_v55 = vmul.bf16 %v2403_v18, %v2347_v20 }
  0xee   : > { %1880 = vrot.lane.b32.xlu1 %v1872_v33, %s4801_s9  ;;  %1972 = vrot.lane.b32.xlu0 %v1964_v34, %s4802_s23 }
  0xf2   : > { %2056 = vrot.lane.b32.xlu1 %v2050_v40, %s3821_s26  ;;  %2058 = vrot.lane.b32.xlu0 %v2051_v41, %s3821_s26  ;;  %v2585_v40 = vsel %vm438_vm1, %v2582_v35, %v2583_v12  ;;  %v2674_v41 = vrot.slane %v4477_v43, 4 }
  0xf3   : > { %v2586_v50 = vsel %vm4796_vm7, %v2585_v40, %v4475_v42 }
  0xf4   : > { %v2677_v44 = vsel %vm438_vm1, %v2674_v41, %v2675_v37 }
  0xf6   : > { %2148 = vrot.lane.b32.xlu1 %v2142_v49, %s3820_s19  ;;  %2150 = vrot.lane.b32.xlu0 %v2143_v23, %s3820_s19  ;;  %v2584_v49 = vsel %vm4796_vm7, %v2582_v35, %v4463_v30  ;;  %v2527_v23 = vld [vmem:[#allocation2 + $0x14] sm:$0xf]  ;;  %v2678_v30 = vsel %vm554_vm8, %v2677_v44, %v4491_v36 }
  0xf7   : > { %v2590_v42 = vmul.bf16 %v2584_v49, %v4404_v53 }
  0xfa   : > { %2060 = vrot.lane.b32.xlu1 %v2052_v57, %s3821_s26  ;;  %2152 = vrot.lane.b32.xlu0 %v2144_v56, %s3820_s19  ;;  %v2676_v57 = vsel %vm554_vm8, %v2674_v41, %v4477_v43  ;;  %v2762_v56 = vrot.slane %v4495_v45, 4  ;;  %s3660_s26 = sshll.u32 %s4810_s25, 3 }
  0xfb   : > { %v2682_v43 = vmul.bf16 %v2676_v57, %v4404_v53  ;;  %v4626_v57 = vld.sshfl [vmem:[%s4779_s3] sm:$0x33 pattern:$0x76325410]  ;;  %s311_s29 = scalar_lea.vmem %s4781_s5, %s3660_s26 }
  0xfc   : > { %v4509_v61 = vpop.permute.xlu0 %454  ;;  %v2765_v58 = vsel %vm438_vm1, %v2762_v56, %v2763_v46  ;;  %v4589_v8 = vsel %vm460_vm9, %v2762_v56, %v4495_v45 }
  0xfd   : > { %v458_v47 = vrot.slane %v4509_v61, 4  ;;  %v4596_v5 = vsel %vm460_vm9, %v2765_v58, %v4507_v2 }
  0xfe   : > { %2236 = vrot.lane.b32.xlu1 %v2230_v0, %s3819_s10  ;;  %2238 = vrot.lane.b32.xlu0 %v2231_v1, %s3819_s10  ;;  %v2591_v0 = vmul.bf16 %v2586_v50, %v4402_v52  ;;  %v2592_v1 = vmul.bf16 %v2583_v12, %v2527_v23 }
 0x100   : > { %v4521_v10 = vpop.permute.xlu1 %548  ;;  %v4523_v11 = vpop.permute.xlu0 %638 }
 0x101   : > { %v552_v62 = vrot.slane %v4521_v10, 4  ;;  %v642_v14 = vrot.slane %v4523_v11, 4 }
 0x102   : > { %2328 = vrot.lane.b32.xlu1 %v2322_v6, %s3818_s28  ;;  %2330 = vrot.lane.b32.xlu0 %v2323_v7, %s3818_s28  ;;  %v2683_v6 = vmul.bf16 %v2678_v30, %v4402_v52  ;;  %v2684_v7 = vmul.bf16 %v2675_v37, %v2615_v19 }
 0x104   : > { %v4530_v22 = vpop.permute.xlu1 %732  ;;  %v4532_v24 = vpop.permute.xlu0 %450 }
 0x105   : > { %v456_v63 = vrot.slane %v4532_v24, 4  ;;  %v736_v25 = vrot.slane %v4530_v22, 4 }
 0x106   : > { %2240 = vrot.lane.b32.xlu1 %v2232_v15, %s3819_s10  ;;  %2332 = vrot.lane.b32.xlu0 %v2324_v3, %s3818_s28 }
 0x108   : > { %v453_v33 = vpop.permute.xlu1 %452  ;;  %v4544_v34 = vpop.permute.xlu0 %634 }
 0x109   : > { %v457_v51 = vrot.slane %v453_v33, 4  ;;  %v640_v26 = vrot.slane %v4544_v34, 4 }
 0x10a   : > { %2416 = vrot.lane.b32.xlu1 %v2410_v28, %s3817_s16  ;;  %2418 = vrot.lane.b32.xlu0 %v2411_v29, %s3817_s16 }
 0x10b   : > { %v459_v18 = vsel %vm438_vm1, %v456_v63, %v457_v51  ;;  %v462_v13 = vsel %vm438_vm1, %v457_v51, %v458_v47 }
 0x10c   : > { %v637_v17 = vpop.permute.xlu1 %636  ;;  %v4558_v21 = vpop.permute.xlu0 %818  ;;  %v461_v45 = vsel %vm460_vm9, %v4532_v24, %v459_v18  ;;  %v463_v27 = vsel %vm460_vm9, %v453_v33, %v462_v13 }
 0x10d   : > { %v641_v36 = vrot.slane %v637_v17, 4  ;;  %v824_v33 = vrot.slane %v4558_v21, 4 }
 0x10e   : > { %2508 = vrot.lane.b32.xlu1 %v2502_v38, %s3816_s13  ;;  %2510 = vrot.lane.b32.xlu0 %v2503_v39, %s3816_s13 }
 0x10f   : > { %v646_v10 = vsel %vm438_vm1, %v641_v36, %v642_v14  ;;  %v643_v29 = vsel %vm438_vm1, %v640_v26, %v641_v36 }
 0x110   : > { %v4571_v59 = vpop.permute.xlu1 %820  ;;  %v545_v60 = vpop.permute.xlu0 %544  ;;  %v647_v40 = vsel %vm4796_vm7, %v637_v17, %v646_v10  ;;  %v645_v49 = vsel %vm4796_vm7, %v4544_v34, %v643_v29  ;;  %vm3134_vm7 = vcmask 719872  }
 0x111   : > { %v550_v15 = vrot.slane %v545_v60, 4  ;;  %v825_v22 = vrot.slane %v4571_v59, 4 }
 0x112   : > { %2420 = vrot.lane.b32.xlu1 %v2412_v55, %s3817_s16  ;;  %2512 = vrot.lane.b32.xlu0 %v2504_v32, %s3816_s13 }
 0x113   : > { %v827_v23 = vsel %vm438_vm1, %v824_v33, %v825_v22 }
 0x114   : > { %v547_v61 = vpop.permute.xlu1 %546  ;;  %v729_v54 = vpop.permute.xlu0 %728  ;;  %v828_v36 = vsel %vm805_vm3, %v4558_v21, %v827_v23  ;;  %v2848_v21 = vld [vmem:[%s4780_s4] sm:$0xf] }
 0x115   : > { %v551_v3 = vrot.slane %v547_v61, 4  ;;  %v734_v37 = vrot.slane %v729_v54, 4 }
 0x116   : > { %2596 = vrot.lane.b32.xlu1 %v2590_v42, %s3813_s17  ;;  %2598 = vrot.lane.b32.xlu0 %v2591_v0, %s3813_s17  ;;  %v2862_v42 = vcombine.high %v4626_v57, %v4626_v57  ;;  %v2770_v0 = vmul.bf16 %v4589_v8, %v4404_v53 }
 0x117   : > { %v553_v11 = vsel %vm438_vm1, %v550_v15, %v551_v3  ;;  %v556_v28 = vsel %vm438_vm1, %v551_v3, %v552_v62 }
 0x118   : > { %v731_v12 = vpop.permute.xlu1 %730  ;;  %v911_v4 = vpop.permute.xlu0 %910  ;;  %v555_v16 = vsel %vm554_vm8, %v545_v60, %v553_v11  ;;  %v557_v35 = vsel %vm554_vm8, %v547_v61, %v556_v28  ;;  %3651 = vmatprep.mubr.msk.bf16.mxu0 %vm3134_vm7, %v2862_v42  ;;  %3653 = vmatprep.mubr.msk.bf16.mxu1 %vm3134_vm7, %v2862_v42  ;;  %vm4803_vm7 = vcmask 982016  }
 0x119   : > { %v735_v24 = vrot.slane %v731_v12, 4  ;;  %v3595_v38 = vcombine.high %v461_v45, %v555_v16  ;;  %v3597_v39 = vcombine.high %v463_v27, %v557_v35  ;;  %v3596_v41 = vcombine.low %v463_v27, %v557_v35 }
 0x11a   : > { %2688 = vrot.lane.b32.xlu1 %v2682_v43, %s3815_s27  ;;  %2690 = vrot.lane.b32.xlu0 %v2683_v6, %s3815_s27  ;;  %v3594_v20 = vcombine.low %v461_v45, %v555_v16  ;;  %v916_v50 = vrot.slane %v911_v4, 4  ;;  %v2771_v43 = vmul.bf16 %v4596_v5, %v4402_v52  ;;  %v2707_v6 = vld [vmem:[#allocation2 + $0x14] sm:$0xf] }
 0x11b   : > { %v737_v31 = vsel %vm438_vm1, %v734_v37, %v735_v24  ;;  %v740_v44 = vsel %vm438_vm1, %v735_v24, %v736_v25  ;;  %3151 = vmatprep.subr.bf16.mxu0 %v3595_v38  ;;  %3192 = vmatprep.subr.bf16.mxu1 %v3597_v39  ;;  %v2772_v62 = vmul.bf16 %v2763_v46, %v2707_v6 }
 0x11c   : > { %v741_v17 = vsel %vm738_vm6, %v731_v12, %v740_v44  ;;  %3193 = vmatpush1.bf16.msra.mxu1 %v3596_v41  ;;  %v913_v51 = vpop.permute.xlu1 %912  ;;  %3152 = vmatpush1.bf16.msra.mxu0 %v3594_v20  ;;  %v823_v55 = vpop.permute.xlu0 %822  ;;  %v739_v32 = vsel %vm738_vm6, %v729_v54, %v737_v31  ;;  %v1565_v31 = vld [vmem:[%s4778_s2 + $0x10] sm:$0x44] }
 0x11d   : > { %v3600_v56 = vcombine.low %v647_v40, %v741_v17  ;;  %v3601_v60 = vcombine.high %v647_v40, %v741_v17  ;;  %v917_v19 = vrot.slane %v913_v51, 4  ;;  %v826_v34 = vrot.slane %v823_v55, 4  ;;  %v1566_v17 = vld [vmem:[%s4778_s2 + $0x18] sm:$0x44] }
 0x11e   : > { %2600 = vrot.lane.b32.xlu1 %v2592_v1, %s3813_s17  ;;  %2692 = vrot.lane.b32.xlu0 %v2684_v7, %s3815_s27  ;;  %v3599_v30 = vcombine.high %v645_v49, %v739_v32  ;;  %v3598_v63 = vcombine.low %v645_v49, %v739_v32  ;;  %v3510_v55 = vcombine.high %v1565_v31, %v1565_v31 }
 0x11f   : > { %v919_v47 = vsel %vm438_vm1, %v916_v50, %v917_v19  ;;  %3194 = vmatprep.subr.bf16.mxu1 %v3601_v60  ;;  %v829_v7 = vsel %vm438_vm1, %v825_v22, %v826_v34  ;;  %v3511_v60 = vcombine.low %v1566_v17, %v1566_v17 }
 0x120   : > { %3153 = vmatprep.subr.bf16.mxu0 %v3599_v30  ;;  %3195 = vmatpush1.bf16.msra.mxu1 %v3600_v56  ;;  %v915_v1 = vpop.permute.xlu1 %914  ;;  %v999_v58 = vpop.permute.xlu0 %998  ;;  %v920_v18 = vsel %vm715_vm5, %v911_v4, %v919_v47  ;;  %v830_v3 = vsel %vm805_vm3, %v4571_v59, %v829_v7 }
 0x121   : > { %v918_v61 = vrot.slane %v915_v1, 4  ;;  %3154 = vmatpush1.bf16.msra.mxu0 %v3598_v63  ;;  %v3603_v8 = vcombine.high %v828_v36, %v920_v18  ;;  %v3602_v54 = vcombine.low %v828_v36, %v920_v18  ;;  %v1004_v10 = vrot.slane %v999_v58, 4 }
 0x122   : > { %2776 = vrot.lane.b32.xlu1 %v2770_v0, %s3814_s18  ;;  %2778 = vrot.lane.b32.xlu0 %v2771_v43, %s3814_s18  ;;  %v1586_v43 = vshrl.u32 %v3510_v55, 16  ;;  %v1594_v6 = vshrl.u32 %v3511_v60, 16 }
 0x123   : > { %v921_v13 = vsel %vm438_vm1, %v917_v19, %v918_v61  ;;  %3155 = vmatprep.subr.bf16.mxu0 %v3603_v8  ;;  %v3512_v19 = vcombine.high %v1566_v17, %v1566_v17 }
 0x124   : > { %v1001_v14 = vpop.permute.xlu1 %1000  ;;  %v1091_v15 = vpop.permute.xlu0 %1090  ;;  %v922_v5 = vsel %vm715_vm5, %v913_v51, %v921_v13  ;;  %v3509_v51 = vcombine.low %v1565_v31, %v1565_v31 }
 0x125   : > { %v1005_v25 = vrot.slane %v1001_v14, 4  ;;  %3156 = vmatpush1.bf16.msra.mxu0 %v3602_v54  ;;  %v3605_v26 = vcombine.high %v830_v3, %v922_v5  ;;  %v3604_v45 = vcombine.low %v830_v3, %v922_v5  ;;  %v1096_v27 = vrot.slane %v1091_v15, 4 }
 0x126   : > { %2780 = vrot.lane.b32.xlu1 %v2772_v62, %s3814_s18  ;;  %2851 = vperm.xlu0 %3692, %v2848_v21   ;;  %v1578_v47 = vshrl.u32 %v3509_v51, 16  ;;  %v1602_v7 = vshrl.u32 %v3512_v19, 16 }
 0x127   : > { %3196 = vmatprep.subr.bf16.mxu1 %v3605_v26  ;;  %v1007_v46 = vsel %vm438_vm1, %v1004_v10, %v1005_v25  ;;  %v1595_v26 = vpack.i.b16 %v1594_v6, %v1594_v6 }
 0x128   : > { %v1093_v11 = vpop.permute.xlu1 %1092  ;;  %3197 = vmatpush1.bf16.msra.mxu1 %v3604_v45  ;;  %v1003_v2 = vpop.permute.xlu0 %1002  ;;  %v1008_v4 = vsel %vm621_vm2, %v999_v58, %v1007_v46  ;;  %v1579_v62 = vpack.i.b16 %v1578_v47, %v1578_v47  ;;  %v1603_v45 = vpack.i.b16 %v1602_v7, %v1602_v7 }
 0x129   : > { %v1097_v28 = vrot.slane %v1093_v11, 4  ;;  %v1006_v29 = vrot.slane %v1003_v2, 4 }
 0x12b   : > { %v1099_v59 = vsel %vm438_vm1, %v1096_v27, %v1097_v28  ;;  %v1009_v35 = vsel %vm438_vm1, %v1005_v25, %v1006_v29  ;;  %v1584_v27 = vrot.slane %v1579_v62, %v3923_v48 }
 0x12c   : > { %v1095_v22 = vpop.permute.xlu1 %1094  ;;  %v1179_v12 = vpop.permute.xlu0 %1178  ;;  %v1100_v16 = vsel %vm531_vm4, %v1091_v15, %v1099_v59  ;;  %v1010_v41 = vsel %vm621_vm2, %v1001_v14, %v1009_v35  ;;  %v1587_v14 = vpack.i.b16 %v1586_v43, %v1586_v43 }
 0x12d   : > { %v1098_v37 = vrot.slane %v1095_v22, 4  ;;  %v3607_v24 = vcombine.high %v1008_v4, %v1100_v16  ;;  %v3606_v38 = vcombine.low %v1008_v4, %v1100_v16  ;;  %v1184_v50 = vrot.slane %v1179_v12, 4 }
 0x12e   : > { %v1600_v22 = vrot.slane %v1595_v26, %v3923_v48 }
 0x12f   : > { %v1101_v39 = vsel %vm438_vm1, %v1097_v28, %v1098_v37  ;;  %3157 = vmatprep.subr.bf16.mxu0 %v3607_v24  ;;  %v1592_v28 = vrot.slane %v1587_v14, %v3923_v48 }
 0x130   : > { %v1181_v40 = vpop.permute.xlu1 %1180  ;;  %3158 = vmatpush1.bf16.msra.mxu0 %v3606_v38  ;;  %v1272_v33 = vpop.permute.xlu0 %1271  ;;  %v1102_v20 = vsel %vm531_vm4, %v1093_v11, %v1101_v39 }
 0x131   : > { %v1185_v44 = vrot.slane %v1181_v40, 4  ;;  %v3609_v49 = vcombine.high %v1010_v41, %v1102_v20  ;;  %v3608_v23 = vcombine.low %v1010_v41, %v1102_v20  ;;  %v1277_v30 = vrot.slane %v1272_v33, 4 }
 0x132   : > { %v3513_v38 = vcombine.low %v1584_v27, %v1592_v28 }
 0x133   : > { %3198 = vmatprep.subr.bf16.mxu1 %v3609_v49  ;;  %v1187_v34 = vsel %vm438_vm1, %v1184_v50, %v1185_v44 }
 0x134   : > { %v1274_v32 = vpop.permute.xlu1 %1273  ;;  %3199 = vmatpush1.bf16.msra.mxu1 %v3608_v23  ;;  %v1183_v56 = vpop.permute.xlu0 %1182  ;;  %v1188_v36 = vsel %vm436_vm0, %v1179_v12, %v1187_v34  ;;  %v1608_v12 = vrot.slane %v1603_v45, %v3923_v48  ;;  %v1621_v17 = vmul.bf16 %v3513_v38, %v4404_v53 }
 0x135   : > { %v1278_v63 = vrot.slane %v1274_v32, 4  ;;  %v1186_v42 = vrot.slane %v1183_v56, 4 }
 0x136   : > { %v3514_v20 = vcombine.low %v1600_v22, %v1608_v12 }
 0x137   : > { %v1280_v0 = vsel %vm438_vm1, %v1277_v30, %v1278_v63  ;;  %v1189_v61 = vsel %vm438_vm1, %v1185_v44, %v1186_v42 }
 0x138   : > { %v1276_v1 = vpop.permute.xlu1 %1275  ;;  %v1362_v58 = vpop.permute.xlu0 %1361  ;;  %v1282_v18 = vsel %vm1281_vm11, %v1272_v33, %v1280_v0  ;;  %v1190_v5 = vsel %vm436_vm0, %v1181_v40, %v1189_v61  ;;  %v1622_v60 = vmul.bf16 %v3514_v20, %v4402_v52 }
 0x139   : > { %v1279_v8 = vrot.slane %v1276_v1, 4  ;;  %v3611_v54 = vcombine.high %v1188_v36, %v1282_v18  ;;  %v3610_v13 = vcombine.low %v1188_v36, %v1282_v18  ;;  %v1367_v46 = vrot.slane %v1362_v58, 4 }
 0x13b   : > { %v1283_v21 = vsel %vm438_vm1, %v1278_v63, %v1279_v8  ;;  %3159 = vmatprep.subr.bf16.mxu0 %v3611_v54 }
 0x13c   : > { %v1364_v15 = vpop.permute.xlu1 %1363  ;;  %3160 = vmatpush1.bf16.msra.mxu0 %v3610_v13  ;;  %v1456_v3 = vpop.permute.xlu0 %1455  ;;  %v1284_v25 = vsel %vm1281_vm11, %v1274_v32, %v1283_v21  ;;  %vm4805_vm11 = vmmov %vm4803_vm7 }
 0x13d   : > { %v1368_v10 = vrot.slane %v1364_v15, 4  ;;  %v3613_v11 = vcombine.high %v1190_v5, %v1284_v25  ;;  %v3612_v2 = vcombine.low %v1190_v5, %v1284_v25  ;;  %v1461_v16 = vrot.slane %v1456_v3, 4 }
 0x13f   : > { %3200 = vmatprep.subr.bf16.mxu1 %v3613_v11  ;;  %v1370_v4 = vsel %vm438_vm1, %v1367_v46, %v1368_v10 }
 0x140   : > { %v1458_v29 = vpop.permute.xlu1 %1457  ;;  %3201 = vmatpush1.bf16.msra.mxu1 %v3612_v2  ;;  %v1366_v59 = vpop.permute.xlu0 %1365  ;;  %v1372_v33 = vsel %vm1371_vm10, %v1362_v58, %v1370_v4 }
 0x141   : > { %v1462_v35 = vrot.slane %v1458_v29, 4  ;;  %v1369_v37 = vrot.slane %v1366_v59, 4 }
 0x143   : > { %v1464_v24 = vsel %vm438_vm1, %v1461_v16, %v1462_v35  ;;  %v1373_v31 = vsel %vm438_vm1, %v1368_v10, %v1369_v37 }
 0x144   : > { %v1460_v39 = vpop.permute.xlu1 %1459  ;;  %v1546_v40 = vpop.permute.xlu0 %1545  ;;  %v1466_v41 = vsel %vm1465_vm15, %v1456_v3, %v1464_v24  ;;  %v1374_v32 = vsel %vm1371_vm10, %v1364_v15, %v1373_v31  ;;  %vm4804_vm10 = vcmask 973824  }
 0x145   : > { %v1463_v44 = vrot.slane %v1460_v39, 4  ;;  %v3615_v49 = vcombine.high %v1372_v33, %v1466_v41  ;;  %v3614_v48 = vcombine.low %v1372_v33, %v1466_v41  ;;  %v1551_v50 = vrot.slane %v1546_v40, 4 }
 0x147   : > { %v1467_v23 = vsel %vm438_vm1, %v1462_v35, %v1463_v44  ;;  %3161 = vmatprep.subr.bf16.mxu0 %v3615_v49 }
 0x148   : > { %v1548_v51 = vpop.permute.xlu1 %1547  ;;  %3162 = vmatpush1.bf16.msra.mxu0 %v3614_v48  ;;  %v1550_v55 = vpop.permute.xlu0 %1549  ;;  %v1468_v56 = vsel %vm1465_vm15, %v1458_v29, %v1467_v23 }
 0x149   : > { %v1552_v19 = vrot.slane %v1548_v51, 4  ;;  %v1553_v34 = vrot.slane %v1550_v55, 4  ;;  %v3617_v30 = vcombine.high %v1374_v32, %v1468_v56  ;;  %v3616_v63 = vcombine.low %v1374_v32, %v1468_v56 }
 0x14b   : > { %v1554_v42 = vsel %vm438_vm1, %v1551_v50, %v1552_v19  ;;  %v1557_v0 = vsel %vm438_vm1, %v1552_v19, %v1553_v34  ;;  %3202 = vmatprep.subr.bf16.mxu1 %v3617_v30 }
 0x14c   : > { %v1697_v53 = vpop.permute.xlu1 %1696  ;;  %3203 = vmatpush1.bf16.msra.mxu1 %v3616_v63  ;;  %v1699_v47 = vpop.permute.xlu0 %1698  ;;  %v1556_v43 = vsel %vm1555_vm14, %v1546_v40, %v1554_v42  ;;  %v1558_v1 = vsel %vm1555_vm14, %v1548_v51, %v1557_v0 }
 0x14d   : > { %v1702_v58 = vrot.slane %v1697_v53, 4  ;;  %v1703_v36 = vrot.slane %v1699_v47, 4  ;;  %v3619_v18 = vcombine.high %v1556_v43, %v1621_v17  ;;  %v3621_v52 = vcombine.high %v1558_v1, %v1622_v60 }
 0x14e   : > { %v3618_v6 = vcombine.low %v1556_v43, %v1621_v17  ;;  %v3620_v7 = vcombine.low %v1558_v1, %v1622_v60 }
 0x14f   : > { %3163 = vmatprep.subr.bf16.mxu0 %v3619_v18  ;;  %3204 = vmatprep.subr.bf16.mxu1 %v3621_v52  ;;  %v1705_v54 = vsel %vm438_vm1, %v1702_v58, %v1703_v36 }
 0x150   : > { %v1789_v61 = vpop.permute.xlu1 %1788  ;;  %3164 = vmatpush1.bf16.msra.mxu0 %v3618_v6  ;;  %3205 = vmatpush1.bf16.msra.mxu1 %v3620_v7  ;;  %v1791_v8 = vpop.permute.xlu0 %1790  ;;  %v1706_v3 = vsel %vm1532_vm13, %v1697_v53, %v1705_v54 }
 0x151   : > { %v1794_v13 = vrot.slane %v1789_v61, 4  ;;  %v1795_v21 = vrot.slane %v1791_v8, 4 }
 0x153   : > { %v1797_v62 = vsel %vm438_vm1, %v1794_v13, %v1795_v21 }
 0x154   : > { %v1701_v14 = vpop.permute.xlu1 %1700  ;;  %v1793_v15 = vpop.permute.xlu0 %1792  ;;  %v1798_v5 = vsel %vm1442_vm12, %v1789_v61, %v1797_v62 }
 0x155   : > { %v1704_v25 = vrot.slane %v1701_v14, 4  ;;  %v1796_v26 = vrot.slane %v1793_v15, 4  ;;  %v3623_v45 = vcombine.high %v1706_v3, %v1798_v5  ;;  %v3622_v10 = vcombine.low %v1706_v3, %v1798_v5 }
 0x157   : > { %v1707_v11 = vsel %vm438_vm1, %v1703_v36, %v1704_v25  ;;  %v1799_v2 = vsel %vm438_vm1, %v1795_v21, %v1796_v26  ;;  %3165 = vmatprep.subr.bf16.mxu0 %v3623_v45 }
 0x158   : > { %v1877_v46 = vpop.permute.xlu1 %1876  ;;  %3166 = vmatpush1.bf16.msra.mxu0 %v3622_v10  ;;  %v1879_v27 = vpop.permute.xlu0 %1878  ;;  %v1708_v28 = vsel %vm1532_vm13, %v1699_v47, %v1707_v11  ;;  %v1800_v29 = vsel %vm1442_vm12, %v1791_v8, %v1799_v2  ;;  %vm4806_vm12 = vmmov %vm4804_vm10  ;;  %vm4807_vm13 = vcmask 580608  }
 0x159   : > { %v1882_v59 = vrot.slane %v1877_v46, 4  ;;  %v1883_v22 = vrot.slane %v1879_v27, 4  ;;  %v3625_v12 = vcombine.high %v1708_v28, %v1800_v29  ;;  %v3624_v4 = vcombine.low %v1708_v28, %v1800_v29 }
 0x15b   : > { %3206 = vmatprep.subr.bf16.mxu1 %v3625_v12  ;;  %v1885_v37 = vsel %vm438_vm1, %v1882_v59, %v1883_v22 }
 0x15c   : > { %v1969_v16 = vpop.permute.xlu1 %1968  ;;  %3207 = vmatpush1.bf16.msra.mxu1 %v3624_v4  ;;  %v1971_v35 = vpop.permute.xlu0 %1970  ;;  %v1886_v41 = vsel %vm4803_vm7, %v1877_v46, %v1885_v37 }
 0x15d   : > { %v1974_v24 = vrot.slane %v1969_v16, 4  ;;  %v1975_v38 = vrot.slane %v1971_v35, 4 }
 0x15f   : > { %v1977_v39 = vsel %vm438_vm1, %v1974_v24, %v1975_v38 }
 0x160   : > { %v1881_v40 = vpop.permute.xlu1 %1880  ;;  %v1973_v33 = vpop.permute.xlu0 %1972  ;;  %v1978_v20 = vsel %vm4804_vm10, %v1969_v16, %v1977_v39 }
 0x161   : > { %v1884_v31 = vrot.slane %v1881_v40, 4  ;;  %v1976_v44 = vrot.slane %v1973_v33, 4  ;;  %v3627_v49 = vcombine.high %v1886_v41, %v1978_v20  ;;  %v3626_v48 = vcombine.low %v1886_v41, %v1978_v20 }
 0x163   : > { %v1887_v23 = vsel %vm438_vm1, %v1883_v22, %v1884_v31  ;;  %v1979_v17 = vsel %vm438_vm1, %v1975_v38, %v1976_v44  ;;  %3167 = vmatprep.subr.bf16.mxu0 %v3627_v49 }
 0x164   : > { %v2057_v50 = vpop.permute.xlu1 %2056  ;;  %3168 = vmatpush1.bf16.msra.mxu0 %v3626_v48  ;;  %v2059_v51 = vpop.permute.xlu0 %2058  ;;  %v1888_v55 = vsel %vm4805_vm11, %v1879_v27, %v1887_v23  ;;  %v1980_v32 = vsel %vm4806_vm12, %v1971_v35, %v1979_v17 }
 0x165   : > { %v2062_v56 = vrot.slane %v2057_v50, 4  ;;  %v2063_v60 = vrot.slane %v2059_v51, 4  ;;  %v3629_v19 = vcombine.high %v1888_v55, %v1980_v32  ;;  %v3628_v34 = vcombine.low %v1888_v55, %v1980_v32 }
 0x167   : > { %3208 = vmatprep.subr.bf16.mxu1 %v3629_v19  ;;  %v2065_v42 = vsel %vm438_vm1, %v2062_v56, %v2063_v60 }
 0x168   : > { %v2149_v30 = vpop.permute.xlu1 %2148  ;;  %3209 = vmatpush1.bf16.msra.mxu1 %v3628_v34  ;;  %v2151_v63 = vpop.permute.xlu0 %2150  ;;  %v2066_v58 = vsel %vm460_vm9, %v2057_v50, %v2065_v42 }
 0x169   : > { %v2154_v0 = vrot.slane %v2149_v30, 4  ;;  %v2155_v53 = vrot.slane %v2151_v63, 4 }
 0x16b   : > { %v2157_v47 = vsel %vm438_vm1, %v2154_v0, %v2155_v53 }
 0x16c   : > { %v2061_v43 = vpop.permute.xlu1 %2060  ;;  %v2153_v1 = vpop.permute.xlu0 %2152  ;;  %v2158_v36 = vsel %vm554_vm8, %v2149_v30, %v2157_v47 }
 0x16d   : > { %v2064_v18 = vrot.slane %v2061_v43, 4  ;;  %v2156_v52 = vrot.slane %v2153_v1, 4  ;;  %v3631_v6 = vcombine.high %v2066_v58, %v2158_v36  ;;  %v3630_v7 = vcombine.low %v2066_v58, %v2158_v36 }
 0x16f   : > { %v2067_v61 = vsel %vm438_vm1, %v2063_v60, %v2064_v18  ;;  %v2159_v8 = vsel %vm438_vm1, %v2155_v53, %v2156_v52  ;;  %3169 = vmatprep.subr.bf16.mxu0 %v3631_v6 }
 0x170   : > { %v2237_v54 = vpop.permute.xlu1 %2236  ;;  %3170 = vmatpush1.bf16.msra.mxu0 %v3630_v7  ;;  %v2239_v13 = vpop.permute.xlu0 %2238  ;;  %v2068_v21 = vsel %vm460_vm9, %v2059_v51, %v2067_v61  ;;  %v2160_v62 = vsel %vm554_vm8, %v2151_v63, %v2159_v8  ;;  %vm4808_vm8 = vmmov %vm4807_vm13 }
 0x171   : > { %v2242_v14 = vrot.slane %v2237_v54, 4  ;;  %v2243_v15 = vrot.slane %v2239_v13, 4  ;;  %v3633_v3 = vcombine.high %v2068_v21, %v2160_v62  ;;  %v3632_v5 = vcombine.low %v2068_v21, %v2160_v62 }
 0x173   : > { %3210 = vmatprep.subr.bf16.mxu1 %v3633_v3  ;;  %v2245_v45 = vsel %vm438_vm1, %v2242_v14, %v2243_v15 }
 0x174   : > { %v2329_v25 = vpop.permute.xlu1 %2328  ;;  %3211 = vmatpush1.bf16.msra.mxu1 %v3632_v5  ;;  %v2331_v26 = vpop.permute.xlu0 %2330  ;;  %v2246_v28 = vsel %vm4807_vm13, %v2237_v54, %v2245_v45 }
 0x175   : > { %v2334_v10 = vrot.slane %v2329_v25, 4  ;;  %v2335_v11 = vrot.slane %v2331_v26, 4 }
 0x177   : > { %v2337_v2 = vsel %vm438_vm1, %v2334_v10, %v2335_v11 }
 0x178   : > { %v2241_v46 = vpop.permute.xlu1 %2240  ;;  %v2333_v27 = vpop.permute.xlu0 %2332  ;;  %v2338_v29 = vsel %vm738_vm6, %v2329_v25, %v2337_v2 }
 0x179   : > { %v2244_v59 = vrot.slane %v2241_v46, 4  ;;  %v2336_v22 = vrot.slane %v2333_v27, 4  ;;  %v3635_v12 = vcombine.high %v2246_v28, %v2338_v29  ;;  %v3634_v4 = vcombine.low %v2246_v28, %v2338_v29 }
 0x17b   : > { %v2247_v16 = vsel %vm438_vm1, %v2243_v15, %v2244_v59  ;;  %v2339_v35 = vsel %vm438_vm1, %v2335_v11, %v2336_v22  ;;  %3171 = vmatprep.subr.bf16.mxu0 %v3635_v12 }
 0x17c   : > { %v2417_v37 = vpop.permute.xlu1 %2416  ;;  %3172 = vmatpush1.bf16.msra.mxu0 %v3634_v4  ;;  %v2419_v24 = vpop.permute.xlu0 %2418  ;;  %v2248_v38 = vsel %vm4808_vm8, %v2239_v13, %v2247_v16  ;;  %v2340_v39 = vsel %vm738_vm6, %v2331_v26, %v2339_v35 }
 0x17d   : > { %v2422_v40 = vrot.slane %v2417_v37, 4  ;;  %v2423_v33 = vrot.slane %v2419_v24, 4  ;;  %v3637_v41 = vcombine.high %v2248_v38, %v2340_v39  ;;  %v3636_v20 = vcombine.low %v2248_v38, %v2340_v39 }
 0x17f   : > { %3212 = vmatprep.subr.bf16.mxu1 %v3637_v41  ;;  %v2425_v49 = vsel %vm438_vm1, %v2422_v40, %v2423_v33  ;;  %v3831_v41 = vmov 1983009808  }
 0x180   : > { %v2509_v31 = vpop.permute.xlu1 %2508  ;;  %3213 = vmatpush1.bf16.msra.mxu1 %v3636_v20  ;;  %v2511_v44 = vpop.permute.xlu0 %2510  ;;  %v2426_v55 = vsel %vm805_vm3, %v2417_v37, %v2425_v49  ;;  %v3269_v20 = vunpack.c.l.s4 %v3831_v41 }
 0x181   : > { %v2514_v48 = vrot.slane %v2509_v31, 4  ;;  %v2515_v23 = vrot.slane %v2511_v44, 4 }
 0x183   : > { %v2517_v17 = vsel %vm438_vm1, %v2514_v48, %v2515_v23 }
 0x184   : > { %v2421_v50 = vpop.permute.xlu1 %2420  ;;  %v2513_v51 = vpop.permute.xlu0 %2512  ;;  %v2518_v32 = vsel %vm715_vm5, %v2509_v31, %v2517_v17 }
 0x185   : > { %v2424_v56 = vrot.slane %v2421_v50, 4  ;;  %v2516_v60 = vrot.slane %v2513_v51, 4  ;;  %v3639_v19 = vcombine.high %v2426_v55, %v2518_v32  ;;  %v3638_v34 = vcombine.low %v2426_v55, %v2518_v32 }
 0x187   : > { %v2427_v30 = vsel %vm438_vm1, %v2423_v33, %v2424_v56  ;;  %v2519_v63 = vsel %vm438_vm1, %v2515_v23, %v2516_v60  ;;  %3173 = vmatprep.subr.bf16.mxu0 %v3639_v19  ;;  %v3270_v23 = vunpack.c.0.s8 %v3269_v20 }
 0x188   : > { %v2597_v42 = vpop.permute.xlu1 %2596  ;;  %3174 = vmatpush1.bf16.msra.mxu0 %v3638_v34  ;;  %v2599_v0 = vpop.permute.xlu0 %2598  ;;  %v2428_v53 = vsel %vm805_vm3, %v2419_v24, %v2427_v30  ;;  %v2520_v47 = vsel %vm715_vm5, %v2511_v44, %v2519_v63 }
 0x189   : > { %v2602_v43 = vrot.slane %v2597_v42, 4  ;;  %v2603_v1 = vrot.slane %v2599_v0, 4  ;;  %v3641_v58 = vcombine.high %v2428_v53, %v2520_v47  ;;  %v3640_v36 = vcombine.low %v2428_v53, %v2520_v47 }
 0x18a   : > { %v3273_v63 = vsub.s32 %v3270_v23, %v3892_v9 }
 0x18b   : > { %3214 = vmatprep.subr.bf16.mxu1 %v3641_v58  ;;  %v2605_v6 = vsel %vm438_vm1, %v2602_v43, %v2603_v1 }
 0x18c   : > { %v2689_v18 = vpop.permute.xlu1 %2688  ;;  %3215 = vmatpush1.bf16.msra.mxu1 %v3640_v36  ;;  %v2691_v52 = vpop.permute.xlu0 %2690  ;;  %v2606_v21 = vsel %vm621_vm2, %v2597_v42, %v2605_v6 }
 0x18d   : > { %v2694_v7 = vrot.slane %v2689_v18, 4  ;;  %v2695_v61 = vrot.slane %v2691_v52, 4 }
 0x18f   : > { %v2697_v8 = vsel %vm438_vm1, %v2694_v7, %v2695_v61 }
 0x190   : > { %v2601_v54 = vpop.permute.xlu1 %2600  ;;  %v2693_v13 = vpop.permute.xlu0 %2692  ;;  %v2698_v62 = vsel %vm531_vm4, %v2689_v18, %v2697_v8 }
 0x191   : > { %v2604_v14 = vrot.slane %v2601_v54, 4  ;;  %v2696_v15 = vrot.slane %v2693_v13, 4  ;;  %v3643_v3 = vcombine.high %v2606_v21, %v2698_v62  ;;  %v3642_v5 = vcombine.low %v2606_v21, %v2698_v62 }
 0x193   : > { %v2607_v25 = vsel %vm438_vm1, %v2603_v1, %v2604_v14  ;;  %v2699_v26 = vsel %vm438_vm1, %v2695_v61, %v2696_v15  ;;  %3175 = vmatprep.subr.bf16.mxu0 %v3643_v3 }
 0x194   : > { %v2777_v45 = vpop.permute.xlu1 %2776  ;;  %3176 = vmatpush1.bf16.msra.mxu0 %v3642_v5  ;;  %v2779_v10 = vpop.permute.xlu0 %2778  ;;  %v2608_v11 = vsel %vm621_vm2, %v2599_v0, %v2607_v25  ;;  %v2700_v2 = vsel %vm531_vm4, %v2691_v52, %v2699_v26 }
 0x195   : > { %v2782_v46 = vrot.slane %v2777_v45, 4  ;;  %v2783_v27 = vrot.slane %v2779_v10, 4  ;;  %v3645_v28 = vcombine.high %v2608_v11, %v2700_v2  ;;  %v3644_v29 = vcombine.low %v2608_v11, %v2700_v2 }
 0x197   : > { %v2785_v59 = vsel %vm438_vm1, %v2782_v46, %v2783_v27  ;;  %3216 = vmatprep.subr.bf16.mxu1 %v3645_v28 }
 0x198   : > { %v2781_v22 = vpop.permute.xlu1 %2780  ;;  %3217 = vmatpush1.bf16.msra.mxu1 %v3644_v29  ;;  %v2786_v12 = vsel %vm436_vm0, %v2777_v45, %v2785_v59 }
 0x199   : > { %v2784_v4 = vrot.slane %v2781_v22, 4  ;;  %v3647_v16 = vcombine.high %v2786_v12, %v2786_v12  ;;  %v3646_v35 = vcombine.low %v2786_v12, %v2786_v12 }
 0x19b   : > { %v2787_v37 = vsel %vm438_vm1, %v2783_v27, %v2784_v4  ;;  %3650 = vmatprep.subr.msk.bf16.mxu0 %vm438_vm1, %v3647_v16  ;;  %v3140_v24 = vsel %vm438_vm1, %v3646_v35, 0 }
 0x19c   : > { %v2788_v38 = vsel %vm436_vm0, %v2779_v10, %v2787_v37  ;;  %3178 = vmatpush1.bf16.msra.mxu0 %v3140_v24  ;;  %vm3242_vm0 = vcmask 3072  }
 0x19d   : > { %v3649_v39 = vcombine.high %v2788_v38, %v2788_v38  ;;  %v3648_v40 = vcombine.low %v2788_v38, %v2788_v38 }
 0x19f   : > { %3184 = vmatmul.mubr.bf16.vlgmr.msra.gmra.mrb[0].mxu0 %v4626_v57  ;;  %3652 = vmatprep.subr.msk.bf16.mxu1 %vm438_vm1, %v3649_v39  ;;  %v3146_v33 = vsel %vm438_vm1, %v3648_v40, 0 }
 0x1a0   : > { %3219 = vmatpush1.bf16.msra.mxu1 %v3146_v33 }
 0x1a3   : > { %3225 = vmatmul.mubr.bf16.vlgmr.msra.gmra.mrb[0].mxu1 %v4626_v57 }
 0x1a5   : > { %v2852_v31 = vpop.permute.xlu0 %2851 }
 0x272   : > { %v3185_v44 = vpop.f32.mrb[0].mxu0 }
 0x273   : > { %v3187_v49 = vpop.f32.mrb[1].mxu0  ;;  %v3186_v48 = vadd.f32 %v3185_v44, %v2852_v31 }
 0x274   : > { %v3188_v17 = vadd.f32 %v3187_v49, %v2852_v31  ;;  %v3189_v50 = vpop.f32.mrb[2].mxu0 }
 0x275   : > { %v3244_v51 = vmul.f32 %v3186_v48, %v3186_v48  ;;  %v3190_v55 = vpop.f32.mrb[3].mxu0  ;;  %v3233_v32 = vsel %vm438_vm1, %v3186_v48, 0.0 }
 0x276   : > { %v3245_v56 = vmul.f32 %v3188_v17, %v3188_v17  ;;  %v3654_v60 = vpack.c.bf16 %v3188_v17, %v3186_v48  ;;  %v3226_v19 = vpop.f32.mrb[0].mxu1  ;;  %v3234_v34 = vsel %vm438_vm1, %v3188_v17, 0.0 }
 0x277   : > { %v3227_v57 = vadd.f32 %v3226_v19, %v2852_v31  ;;  %v3228_v30 = vpop.f32.mrb[1].mxu1  ;;  %v3235_v42 = vadd.f32 %v3234_v34, %v3233_v32  ;;  %v3248_v0 = vsel %vm438_vm1, %v3244_v51, 0.0 }
 0x278   : > { %v3229_v53 = vadd.f32 %v3228_v30, %v2852_v31  ;;  %v3230_v47 = vpop.f32.mrb[2].mxu1  ;;  %v3249_v43 = vsel %vm438_vm1, %v3245_v56, 0.0  ;;  %v3274_v9 = vrot.slane %v3654_v60, %v3273_v63 }
 0x279   : > { %v3236_v1 = vsel %vm438_vm1, %v3227_v57, 0.0  ;;  %v3246_v58 = vmul.f32 %v3227_v57, %v3227_v57  ;;  %v3231_v36 = vpop.f32.mrb[3].mxu1  ;;  %v3250_v18 = vadd.f32 %v3249_v43, %v3248_v0 }
 0x27a   : > { %v3247_v52 = vmul.f32 %v3229_v53, %v3229_v53  ;;  %v3655_v6 = vpack.c.bf16 %v3229_v53, %v3227_v57  ;;  %v3237_v7 = vadd.f32 %v3236_v1, %v3235_v42  ;;  %v3238_v61 = vsel %vm438_vm1, %v3229_v53, 0.0 }
 0x27b   : > { %v3251_v8 = vsel %vm438_vm1, %v3246_v58, 0.0 }
 0x27c   : > { %v3281_v54 = vrot.slane %v3655_v6, %v3273_v63  ;;  %v3239_v13 = vadd.f32 %v3238_v61, %v3237_v7  ;;  %v3252_v21 = vadd.f32 %v3251_v8, %v3250_v18  ;;  %v3253_v62 = vsel %vm438_vm1, %v3247_v52, 0.0 }
 0x27e   : > { %v3282_v14 = vcombine.low %v3274_v9, %v3281_v54  ;;  %3240 = vadd.xlane.f32.xlu1 %v3239_v13  ;;  %v3254_v15 = vadd.f32 %v3253_v62, %v3252_v21 }
 0x280   : > { %3284 = vst [vmem:[%s311_s29] sm:$0xff] %v3282_v14  ;;  %3255 = vadd.xlane.f32.xlu0 %v3254_v15 }
 0x30b   : > { %v3241_v3 = vpop.xlane.xlu1 %3240 }
 0x30c   : > { %3243 = vst.msk [vmem:[%s315_s22] sm:$0xf] %vm3242_vm0, %v3241_v3 }
 0x30d   : > { %v3256_v5 = vpop.xlane.xlu0 %3255 }
 0x30e   : > { %3257 = vst.msk [vmem:[%s319_s20] sm:$0xf] %vm3242_vm0, %v3256_v5 }
 0x30f PF: > { %s18_s24 = sadd.s32 1, %s3811_s24  }
 0x310   : > { %p15_p4 = scmp.ge.s32.totalorder %s18_s24, 4  }
 0x312   :  { %17 = sbr.rel (!%p15_p4) target bundleno = 1 (0x1), region = 97 }

</bundles_post_ra>
